<compile_context>
chip_gen: v7x
topology: tpu7x:2x2x1
jax: 0.10.0
libtpu: 0.0.40
codegen_flags: <defaults>
</compile_context>

<pallas_src>
import functools
import math

import jax
import jax.numpy as jnp
from jax import lax
from jax.experimental import pallas as pl
from jax.experimental.pallas import tpu as pltpu


# ----------------------------- kernel helpers -------------------------------


def _bn(x, gamma, beta):
    """BatchNorm1d, training mode: batch mean, biased variance, eps=1e-5.

    The axis-0 statistics are computed as ones-row matmuls so the reduction
    runs on the MXU (keeps VPU/XLU slots free; survives future row-tiling).
    """
    n = x.shape[0]
    ones_row = jnp.ones((1, n), jnp.float32)
    inv_n = 1.0 / n
    mean = jnp.dot(ones_row, x, preferred_element_type=jnp.float32) * inv_n
    xc = x - mean
    var = jnp.dot(ones_row, xc * xc, preferred_element_type=jnp.float32) * inv_n
    return xc * lax.rsqrt(var + 1e-5) * gamma + beta


def net_kernel(h_raw_ref, e_raw_ref,
               wn_ref, nb_ref, we_ref, eb_ref,
               ssrc_ref, sdst_ref, ppt_ref,
               wq_ref, wk_ref, wv_ref, wpe_ref,
               ohw_ref, ohb_ref, oew_ref, oeb_ref,
               fh1w_ref, fh1b_ref, fh2w_ref, fh2b_ref,
               fe1w_ref, fe1b_ref, fe2w_ref, fe2b_ref,
               bn_ref,
               w1a_ref, w1b_ref, w1c_ref, b1_ref,
               w2_ref, b2_ref, w3_ref, b3_ref,
               score_ref,
               h_state, e_state,
               *, inv_scale):
    """Whole GraphTransformerNet; grid axis = transformer layer index."""
    F32 = jnp.float32
    l = pl.program_id(0)

    # ---- step 0: fused input embeddings, written into the VMEM carry -------
    @pl.when(l == 0)
    def _():
        h_state[...] = (jnp.dot(h_raw_ref[...], wn_ref[...],
                                preferred_element_type=F32) + nb_ref[...])
        e_state[...] = (jnp.dot(e_raw_ref[...], we_ref[...],
                                preferred_element_type=F32) + eb_ref[...])

    h0 = h_state[...]                    # [N, F]  layer input (resident)
    e0 = e_state[...]                    # [E, F]
    ssrc = ssrc_ref[...].astype(F32)     # bf16 one-hot (exact) -> f32 for dots
    sdst = sdst_ref[...].astype(F32)
    ppt = ppt_ref[...]                   # [F, F] block-diagonal head pooling

    # ---- Q/K/V/proj_e projections (separate dots; F < 128, no lane slicing)
    q = jnp.dot(h0, wq_ref[...], preferred_element_type=F32)
    k = jnp.dot(h0, wk_ref[...], preferred_element_type=F32)
    v = jnp.dot(h0, wv_ref[...], preferred_element_type=F32)
    pe = jnp.dot(e0, wpe_ref[...], preferred_element_type=F32)

    # ---- gather node rows onto edges (one-hot matmul on the MXU) -----------
    k_src = jnp.dot(ssrc, k, preferred_element_type=F32)        # [E, F]
    q_dst = jnp.dot(sdst, q, preferred_element_type=F32)        # [E, F]
    v_src = jnp.dot(ssrc, v, preferred_element_type=F32)        # [E, F]

    # ---- edge score: (K_src * Q_dst) / sqrt(d) * proj_e  (== e_attn_out) ---
    score = k_src * q_dst * inv_scale * pe                      # [E, F]

    # per-head sum broadcast back across head_dim lanes in one block-diagonal
    # [F,F] matmul -> exp/clip and the z path stay lane-dense (no [*,H]).
    ssum_b = jnp.dot(score, ppt, preferred_element_type=F32)    # [E, F]
    s_b = jnp.exp(jnp.clip(ssum_b, -5.0, 5.0))                  # [E, F]

    # ---- scatter-add to destination nodes (transposed contraction, MXU) ----
    wV = lax.dot_general(sdst, v_src * s_b, (((0,), (0,)), ((), ())),
                         preferred_element_type=F32)            # [N, F]
    z_b = lax.dot_general(sdst, s_b, (((0,), (0,)), ((), ())),
                          preferred_element_type=F32)           # [N, F]
    h_attn = wV / (z_b + 1e-6)          # exact divide for parity with torch

    # ---- O projections + residual + BatchNorm 1 ----------------------------
    h1 = jnp.dot(h_attn, ohw_ref[...], preferred_element_type=F32) + ohb_ref[...]
    e1 = jnp.dot(score, oew_ref[...], preferred_element_type=F32) + oeb_ref[...]
    h1 = h0 + h1
    e1 = e0 + e1
    h1 = _bn(h1, bn_ref[0:1, :], bn_ref[1:2, :])
    e1 = _bn(e1, bn_ref[2:3, :], bn_ref[3:4, :])

    # ---- FFN + residual + BatchNorm 2 ---------------------------------------
    h2 = jnp.maximum(jnp.dot(h1, fh1w_ref[...], preferred_element_type=F32)
                     + fh1b_ref[...], 0.0)
    h2 = jnp.dot(h2, fh2w_ref[...], preferred_element_type=F32) + fh2b_ref[...]
    h2 = _bn(h1 + h2, bn_ref[4:5, :], bn_ref[5:6, :])

    e2 = jnp.maximum(jnp.dot(e1, fe1w_ref[...], preferred_element_type=F32)
                     + fe1b_ref[...], 0.0)
    e2 = jnp.dot(e2, fe2w_ref[...], preferred_element_type=F32) + fe2b_ref[...]
    e2 = _bn(e1 + e2, bn_ref[6:7, :], bn_ref[7:8, :])

    # ---- outer net-level residual; carry h/e in VMEM (never leaves chip) ---
    h_new = h2 + h0
    e_new = e2 + e0
    h_state[...] = h_new
    e_state[...] = e_new

    # ---- last step: fused edge-wise MLP predictor, lane-padded output ------
    @pl.when(l == pl.num_programs(0) - 1)
    def _():
        h_src = jnp.dot(ssrc, h_new, preferred_element_type=F32)
        h_dst = jnp.dot(sdst, h_new, preferred_element_type=F32)
        y = (jnp.dot(h_src, w1a_ref[...], preferred_element_type=F32)
             + jnp.dot(h_dst, w1b_ref[...], preferred_element_type=F32)
             + jnp.dot(e_new, w1c_ref[...], preferred_element_type=F32)
             + b1_ref[...])
        y = jnp.maximum(y, 0.0)
        y = jnp.dot(y, w2_ref[...], preferred_element_type=F32) + b2_ref[...]
        y = jnp.maximum(y, 0.0)
        score_ref[...] = (jnp.dot(y, w3_ref[...], preferred_element_type=F32)
                          + b3_ref[...])


# ----------------------------- cost estimate ---------------------------------


def _net_cost(N, E, F, L, node_dim, edge_dim, out_pad):
    mm = lambda m, k, n: 2 * m * k * n
    layer = (3 * mm(N, F, F) + mm(E, F, F)                 # Q,K,V + proj_e
             + 3 * mm(E, N, F)                             # edge gathers
             + mm(E, F, F)                                 # head-sum broadcast
             + 2 * mm(N, E, F)                             # scatter wV, z
             + mm(N, F, F) + mm(E, F, F)                   # O_h, O_e
             + 2 * mm(N, F, 2 * F) + 2 * mm(E, F, 2 * F)   # FFNs
             + 4 * (mm(1, N, F) + mm(1, E, F)))            # BN statistics
    embed = mm(N, node_dim, F) + mm(E, edge_dim, F)
    mlp = (2 * mm(E, N, F) + 3 * mm(E, F, 2 * F)
           + mm(E, 2 * F, F) + mm(E, F, out_pad))
    flops = L * layer + embed + mlp
    transcendentals = L * (E * F + 4 * F)
    bytes_accessed = (2 * 2 * E * N                        # bf16 one-hots
                      + 4 * F * F                          # PPt
                      + 4 * (N * node_dim + E * edge_dim
                             + (node_dim + edge_dim + 2) * F)
                      + 4 * L * (14 * F * F + 16 * F)      # layer weights + bn
                      + 4 * (8 * F * F + F * out_pad + 7 * F + out_pad)
                      + 4 * E * out_pad)                   # padded output
    return pl.CostEstimate(flops=flops, transcendentals=transcendentals,
                           bytes_accessed=bytes_accessed)


# ----------------------------- JAX-side wrapper -------------------------------


def graph_transformer_net(params, h_raw, e_raw, graph, *, head_dim, out_dim):
    N = h_raw.shape[0]
    E = e_raw.shape[0]
    Fdim = params["node_emb_w"].shape[1]
    lp = params["layers"]
    mp = params["mlp"]
    L = lp["Wq"].shape[0]
    out_pad = mp["W3p"].shape[1]

    def res(shape):          # resident operand: same block every grid step
        return pl.BlockSpec(shape, lambda l, _n=len(shape): (0,) * _n)

    def per(shape):          # per-layer stacked operand: leading layer axis
        return pl.BlockSpec((None,) + shape,
                            lambda l, _n=len(shape): (l,) + (0,) * _n)

    inputs = (
        h_raw, e_raw,
        params["node_emb_w"], params["node_emb_b"],
        params["edge_emb_w"], params["edge_emb_b"],
        graph["Ssrc"], graph["Sdst"], graph["PPt"],
        lp["Wq"], lp["Wk"], lp["Wv"], lp["Wpe"],
        lp["Oh_w"], lp["Oh_b"], lp["Oe_w"], lp["Oe_b"],
        lp["Fh1_w"], lp["Fh1_b"], lp["Fh2_w"], lp["Fh2_b"],
        lp["Fe1_w"], lp["Fe1_b"], lp["Fe2_w"], lp["Fe2_b"],
        lp["bn"],
        mp["W1a"], mp["W1b"], mp["W1c"], mp["b1"],
        mp["W2"], mp["b2"], mp["W3p"], mp["b3p"],
    )
    in_specs = [per(x.shape[1:]) if x.ndim == 3 else res(x.shape)
                for x in inputs]

    grid_spec = pltpu.PrefetchScalarGridSpec(
        num_scalar_prefetch=0,
        grid=(L,),
        in_specs=in_specs,
        out_specs=pl.BlockSpec((E, out_pad), lambda l: (0, 0)),
        scratch_shapes=[pltpu.VMEM((N, Fdim), jnp.float32),   # h carry
                        pltpu.VMEM((E, Fdim), jnp.float32)],  # e carry
    )

    kern = functools.partial(net_kernel, inv_scale=1.0 / math.sqrt(head_dim))
    score_pad = pl.pallas_call(
        kern,
        out_shape=jax.ShapeDtypeStruct((E, out_pad), jnp.float32),
        grid_spec=grid_spec,
        compiler_params=pltpu.CompilerParams(
            dimension_semantics=("arbitrary",),
            vmem_limit_bytes=64 * 1024 * 1024),
        cost_estimate=_net_cost(N, E, Fdim, L,
                                h_raw.shape[1], e_raw.shape[1], out_pad),
    )(*inputs)

    score = score_pad[:, :out_dim]
    if out_dim == 1:               # torch: .squeeze(1)
        score = score[:, 0]
    return score


# ----------------------------- parameter init --------------------------------


def init_linear(key, in_dim, out_dim, bias=True):
    kw, kb = jax.random.split(key)
    limit = 1.0 / math.sqrt(in_dim)
    w = jax.random.uniform(kw, (in_dim, out_dim), jnp.float32, -limit, limit)
    if bias:
        b = jax.random.uniform(kb, (1, out_dim), jnp.float32, -limit, limit)
    else:
        b = jnp.zeros((1, out_dim), jnp.float32)
    return w, b


def init_params(key, node_dim, edge_dim, emb_dim, out_dim, num_layers):
    keys = jax.random.split(key, 3 + num_layers)
    node_w, node_b = init_linear(keys[0], node_dim, emb_dim)
    edge_w, edge_b = init_linear(keys[1], edge_dim, emb_dim)

    def layer_params(k):
        lk = jax.random.split(k, 10)
        q_w, _ = init_linear(lk[0], emb_dim, emb_dim, bias=False)
        k_w, _ = init_linear(lk[1], emb_dim, emb_dim, bias=False)
        v_w, _ = init_linear(lk[2], emb_dim, emb_dim, bias=False)
        pe_w, _ = init_linear(lk[3], emb_dim, emb_dim, bias=False)
        ohw, ohb = init_linear(lk[4], emb_dim, emb_dim)
        oew, oeb = init_linear(lk[5], emb_dim, emb_dim)
        fh1w, fh1b = init_linear(lk[6], emb_dim, 2 * emb_dim)
        fh2w, fh2b = init_linear(lk[7], 2 * emb_dim, emb_dim)
        fe1w, fe1b = init_linear(lk[8], emb_dim, 2 * emb_dim)
        fe2w, fe2b = init_linear(lk[9], 2 * emb_dim, emb_dim)
        ones = jnp.ones((1, emb_dim), jnp.float32)
        zeros = jnp.zeros((1, emb_dim), jnp.float32)
        # packed BN params (fresh torch module => gamma=1, beta=0); rows =
        # [bn1h_g, bn1h_b, bn1e_g, bn1e_b, bn2h_g, bn2h_b, bn2e_g, bn2e_b]
        bn = jnp.concatenate([ones, zeros, ones, zeros,
                              ones, zeros, ones, zeros], axis=0)
        return dict(Wq=q_w, Wk=k_w, Wv=v_w, Wpe=pe_w,
                    Oh_w=ohw, Oh_b=ohb, Oe_w=oew, Oe_b=oeb,
                    Fh1_w=fh1w, Fh1_b=fh1b, Fh2_w=fh2w, Fh2_b=fh2b,
                    Fe1_w=fe1w, Fe1_b=fe1b, Fe2_w=fe2w, Fe2_b=fe2b,
                    bn=bn)

    per = [layer_params(keys[3 + i]) for i in range(num_layers)]
    layers = {k: jnp.stack([p[k] for p in per], axis=0) for k in per[0]}

    mk = jax.random.split(keys[2], 3)
    w1, b1 = init_linear(mk[0], 3 * emb_dim, 2 * emb_dim)
    w2, b2 = init_linear(mk[1], 2 * emb_dim, emb_dim)
    w3, b3 = init_linear(mk[2], emb_dim, out_dim)
    # lane-pad the final projection to a multiple of 128 (lane-dense store)
    out_pad = ((out_dim + 127) // 128) * 128
    w3p = jnp.zeros((emb_dim, out_pad), jnp.float32).at[:, :out_dim].set(w3)
    b3p = jnp.zeros((1, out_pad), jnp.float32).at[:, :out_dim].set(b3)
    mlp = dict(W1a=w1[:emb_dim], W1b=w1[emb_dim:2 * emb_dim],
               W1c=w1[2 * emb_dim:], b1=b1,
               W2=w2, b2=b2, W3p=w3p, b3p=b3p)

    return dict(node_emb_w=node_w, node_emb_b=node_b,
                edge_emb_w=edge_w, edge_emb_b=edge_b,
                layers=layers, mlp=mlp)


def build_graph(src, dst, num_nodes, num_heads, head_dim):
    # bf16 is exact for 0/1 -> halves the largest DMA/VMEM footprint.
    Ssrc = jax.nn.one_hot(src, num_nodes, dtype=jnp.bfloat16)   # [E, N]
    Sdst = jax.nn.one_hot(dst, num_nodes, dtype=jnp.bfloat16)   # [E, N]
    # block-diagonal [F, F]: PPt[i, j] = 1 iff lanes i, j belong to same head
    P = jnp.repeat(jnp.eye(num_heads, dtype=jnp.float32), head_dim, axis=0)
    PPt = P @ P.T                                               # [F, F]
    return {"Ssrc": Ssrc, "Sdst": Sdst, "PPt": PPt}


# ----------------------------------- main ------------------------------------

if __name__ == "__main__":
    N, E = 8, 16
    node_dim, edge_dim, emb_dim, out_dim = 4, 4, 32, 1
    num_heads, num_layers = 8, 2
    head_dim = emb_dim // num_heads

    key = jax.random.PRNGKey(0)
    k_src, k_dst, k_h, k_e, k_p = jax.random.split(key, 5)

    src = jax.random.randint(k_src, (E,), 0, N)
    dst = jax.random.randint(k_dst, (E,), 0, N)
    h = jax.random.normal(k_h, (N, node_dim), jnp.float32)
    e = jax.random.normal(k_e, (E, edge_dim), jnp.float32)

    params = init_params(k_p, node_dim, edge_dim, emb_dim, out_dim, num_layers)
    graph = build_graph(src, dst, N, num_heads, head_dim)

    fwd = jax.jit(functools.partial(graph_transformer_net,
                                    head_dim=head_dim, out_dim=out_dim))
    score = fwd(params, h, e, graph)
    score = jax.block_until_ready(score)
    assert score.shape == (E,)
    print("KERNEL_OK")
</pallas_src>

<mosaic_0001>
module attributes {stable_mosaic.version = 11 : i64} {
  func.func @net_kernel(%arg0: i32, %arg1: memref<8x4xf32, #tpu.memory_space<vmem>>, %arg2: memref<16x4xf32, #tpu.memory_space<vmem>>, %arg3: memref<4x32xf32, #tpu.memory_space<vmem>>, %arg4: memref<1x32xf32, #tpu.memory_space<vmem>>, %arg5: memref<4x32xf32, #tpu.memory_space<vmem>>, %arg6: memref<1x32xf32, #tpu.memory_space<vmem>>, %arg7: memref<16x8xbf16, #tpu.memory_space<vmem>>, %arg8: memref<16x8xbf16, #tpu.memory_space<vmem>>, %arg9: memref<32x32xf32, #tpu.memory_space<vmem>>, %arg10: memref<1x32x32xf32, #tpu.memory_space<vmem>>, %arg11: memref<1x32x32xf32, #tpu.memory_space<vmem>>, %arg12: memref<1x32x32xf32, #tpu.memory_space<vmem>>, %arg13: memref<1x32x32xf32, #tpu.memory_space<vmem>>, %arg14: memref<1x32x32xf32, #tpu.memory_space<vmem>>, %arg15: memref<1x1x32xf32, #tpu.memory_space<vmem>>, %arg16: memref<1x32x32xf32, #tpu.memory_space<vmem>>, %arg17: memref<1x1x32xf32, #tpu.memory_space<vmem>>, %arg18: memref<1x32x64xf32, #tpu.memory_space<vmem>>, %arg19: memref<1x1x64xf32, #tpu.memory_space<vmem>>, %arg20: memref<1x64x32xf32, #tpu.memory_space<vmem>>, %arg21: memref<1x1x32xf32, #tpu.memory_space<vmem>>, %arg22: memref<1x32x64xf32, #tpu.memory_space<vmem>>, %arg23: memref<1x1x64xf32, #tpu.memory_space<vmem>>, %arg24: memref<1x64x32xf32, #tpu.memory_space<vmem>>, %arg25: memref<1x1x32xf32, #tpu.memory_space<vmem>>, %arg26: memref<1x8x32xf32, #tpu.memory_space<vmem>>, %arg27: memref<32x64xf32, #tpu.memory_space<vmem>>, %arg28: memref<32x64xf32, #tpu.memory_space<vmem>>, %arg29: memref<32x64xf32, #tpu.memory_space<vmem>>, %arg30: memref<1x64xf32, #tpu.memory_space<vmem>>, %arg31: memref<64x32xf32, #tpu.memory_space<vmem>>, %arg32: memref<1x32xf32, #tpu.memory_space<vmem>>, %arg33: memref<32x128xf32, #tpu.memory_space<vmem>>, %arg34: memref<1x128xf32, #tpu.memory_space<vmem>>, %arg35: memref<16x128xf32, #tpu.memory_space<vmem>>, %arg36: memref<8x32xf32, #tpu.memory_space<vmem>>, %arg37: memref<16x32xf32, #tpu.memory_space<vmem>>) attributes {dimension_semantics = [#tpu.dimension_semantics<arbitrary>], iteration_bounds = array<i64: 2>, scalar_prefetch = 0 : i64, scratch_operands = 2 : i64, tpu.core_type = #tpu.core_type<tc>, window_params = [{pipeline_mode = #tpu.pipeline_mode<synchronous>, transform_indices = @transform_0, window_bounds = array<i64: 8, 4>}, {pipeline_mode = #tpu.pipeline_mode<synchronous>, transform_indices = @transform_1, window_bounds = array<i64: 16, 4>}, {pipeline_mode = #tpu.pipeline_mode<synchronous>, transform_indices = @transform_2, window_bounds = array<i64: 4, 32>}, {pipeline_mode = #tpu.pipeline_mode<synchronous>, transform_indices = @transform_3, window_bounds = array<i64: 1, 32>}, {pipeline_mode = #tpu.pipeline_mode<synchronous>, transform_indices = @transform_4, window_bounds = array<i64: 4, 32>}, {pipeline_mode = #tpu.pipeline_mode<synchronous>, transform_indices = @transform_5, window_bounds = array<i64: 1, 32>}, {pipeline_mode = #tpu.pipeline_mode<synchronous>, transform_indices = @transform_6, window_bounds = array<i64: 16, 8>}, {pipeline_mode = #tpu.pipeline_mode<synchronous>, transform_indices = @transform_7, window_bounds = array<i64: 16, 8>}, {pipeline_mode = #tpu.pipeline_mode<synchronous>, transform_indices = @transform_8, window_bounds = array<i64: 32, 32>}, {transform_indices = @transform_9, window_bounds = array<i64: 1, 32, 32>}, {transform_indices = @transform_10, window_bounds = array<i64: 1, 32, 32>}, {transform_indices = @transform_11, window_bounds = array<i64: 1, 32, 32>}, {transform_indices = @transform_12, window_bounds = array<i64: 1, 32, 32>}, {transform_indices = @transform_13, window_bounds = array<i64: 1, 32, 32>}, {transform_indices = @transform_14, window_bounds = array<i64: 1, 1, 32>}, {transform_indices = @transform_15, window_bounds = array<i64: 1, 32, 32>}, {transform_indices = @transform_16, window_bounds = array<i64: 1, 1, 32>}, {transform_indices = @transform_17, window_bounds = array<i64: 1, 32, 64>}, {transform_indices = @transform_18, window_bounds = array<i64: 1, 1, 64>}, {transform_indices = @transform_19, window_bounds = array<i64: 1, 64, 32>}, {transform_indices = @transform_20, window_bounds = array<i64: 1, 1, 32>}, {transform_indices = @transform_21, window_bounds = array<i64: 1, 32, 64>}, {transform_indices = @transform_22, window_bounds = array<i64: 1, 1, 64>}, {transform_indices = @transform_23, window_bounds = array<i64: 1, 64, 32>}, {transform_indices = @transform_24, window_bounds = array<i64: 1, 1, 32>}, {transform_indices = @transform_25, window_bounds = array<i64: 1, 8, 32>}, {pipeline_mode = #tpu.pipeline_mode<synchronous>, transform_indices = @transform_26, window_bounds = array<i64: 32, 64>}, {pipeline_mode = #tpu.pipeline_mode<synchronous>, transform_indices = @transform_27, window_bounds = array<i64: 32, 64>}, {pipeline_mode = #tpu.pipeline_mode<synchronous>, transform_indices = @transform_28, window_bounds = array<i64: 32, 64>}, {pipeline_mode = #tpu.pipeline_mode<synchronous>, transform_indices = @transform_29, window_bounds = array<i64: 1, 64>}, {pipeline_mode = #tpu.pipeline_mode<synchronous>, transform_indices = @transform_30, window_bounds = array<i64: 64, 32>}, {pipeline_mode = #tpu.pipeline_mode<synchronous>, transform_indices = @transform_31, window_bounds = array<i64: 1, 32>}, {pipeline_mode = #tpu.pipeline_mode<synchronous>, transform_indices = @transform_32, window_bounds = array<i64: 32, 128>}, {pipeline_mode = #tpu.pipeline_mode<synchronous>, transform_indices = @transform_33, window_bounds = array<i64: 1, 128>}, {pipeline_mode = #tpu.pipeline_mode<synchronous>, transform_indices = @transform_34, window_bounds = array<i64: 16, 128>}]} {
    %c0_i32 = arith.constant 0 : i32
    %0 = arith.cmpi eq, %arg0, %c0_i32 : i32
    %1 = arith.extui %0 : i1 to i32
    %c0_i32_0 = arith.constant 0 : i32
    %2 = arith.cmpi ne, %1, %c0_i32_0 : i32
    scf.if %2 {
      %c0_125 = arith.constant 0 : index
      %c0_126 = arith.constant 0 : index
      %190 = vector.load %arg1[%c0_125, %c0_126] : memref<8x4xf32, #tpu.memory_space<vmem>>, vector<8x4xf32>
      %c0_127 = arith.constant 0 : index
      %c0_128 = arith.constant 0 : index
      %191 = vector.load %arg3[%c0_127, %c0_128] : memref<4x32xf32, #tpu.memory_space<vmem>>, vector<4x32xf32>
      %cst_129 = arith.constant dense<0.000000e+00> : vector<8x32xf32>
      %192 = tpu.matmul %190, %191, %cst_129 {dimension_numbers = #tpu.dot_dimension_numbers<[1], [0], [0], [1], [0, 0, 1, 1], [], []>} : vector<8x4xf32>, vector<4x32xf32>, vector<8x32xf32> -> vector<8x32xf32>
      %c0_130 = arith.constant 0 : index
      %c0_131 = arith.constant 0 : index
      %193 = vector.load %arg4[%c0_130, %c0_131] : memref<1x32xf32, #tpu.memory_space<vmem>>, vector<1x32xf32>
      %194 = vector.broadcast %193 : vector<1x32xf32> to vector<8x32xf32>
      %195 = arith.addf %192, %194 : vector<8x32xf32>
      %c0_132 = arith.constant 0 : index
      %c0_133 = arith.constant 0 : index
      %196 = vector.load %arg36[%c0_132, %c0_133] : memref<8x32xf32, #tpu.memory_space<vmem>>, vector<8x32xf32>
      tpu.vector_store %arg36[%c0_132, %c0_133], %195 {strides = array<i32>} : memref<8x32xf32, #tpu.memory_space<vmem>>, vector<8x32xf32>,
      %c0_134 = arith.constant 0 : index
      %c0_135 = arith.constant 0 : index
      %197 = vector.load %arg2[%c0_134, %c0_135] : memref<16x4xf32, #tpu.memory_space<vmem>>, vector<16x4xf32>
      %c0_136 = arith.constant 0 : index
      %c0_137 = arith.constant 0 : index
      %198 = vector.load %arg5[%c0_136, %c0_137] : memref<4x32xf32, #tpu.memory_space<vmem>>, vector<4x32xf32>
      %cst_138 = arith.constant dense<0.000000e+00> : vector<16x32xf32>
      %199 = tpu.matmul %197, %198, %cst_138 {dimension_numbers = #tpu.dot_dimension_numbers<[1], [0], [0], [1], [0, 0, 1, 1], [], []>} : vector<16x4xf32>, vector<4x32xf32>, vector<16x32xf32> -> vector<16x32xf32>
      %c0_139 = arith.constant 0 : index
      %c0_140 = arith.constant 0 : index
      %200 = vector.load %arg6[%c0_139, %c0_140] : memref<1x32xf32, #tpu.memory_space<vmem>>, vector<1x32xf32>
      %201 = vector.broadcast %200 : vector<1x32xf32> to vector<16x32xf32>
      %202 = arith.addf %199, %201 : vector<16x32xf32>
      %c0_141 = arith.constant 0 : index
      %c0_142 = arith.constant 0 : index
      %203 = vector.load %arg37[%c0_141, %c0_142] : memref<16x32xf32, #tpu.memory_space<vmem>>, vector<16x32xf32>
      tpu.vector_store %arg37[%c0_141, %c0_142], %202 {strides = array<i32>} : memref<16x32xf32, #tpu.memory_space<vmem>>, vector<16x32xf32>,
    } else {
    }
    %c0 = arith.constant 0 : index
    %c0_1 = arith.constant 0 : index
    %3 = vector.load %arg36[%c0, %c0_1] : memref<8x32xf32, #tpu.memory_space<vmem>>, vector<8x32xf32>
    %c0_2 = arith.constant 0 : index
    %c0_3 = arith.constant 0 : index
    %4 = vector.load %arg37[%c0_2, %c0_3] : memref<16x32xf32, #tpu.memory_space<vmem>>, vector<16x32xf32>
    %c0_4 = arith.constant 0 : index
    %c0_5 = arith.constant 0 : index
    %5 = vector.load %arg7[%c0_4, %c0_5] : memref<16x8xbf16, #tpu.memory_space<vmem>>, vector<16x8xbf16>
    %6 = arith.extf %5 : vector<16x8xbf16> to vector<16x8xf32>
    %c0_6 = arith.constant 0 : index
    %c0_7 = arith.constant 0 : index
    %7 = vector.load %arg8[%c0_6, %c0_7] : memref<16x8xbf16, #tpu.memory_space<vmem>>, vector<16x8xbf16>
    %8 = arith.extf %7 : vector<16x8xbf16> to vector<16x8xf32>
    %c0_8 = arith.constant 0 : index
    %c0_9 = arith.constant 0 : index
    %9 = vector.load %arg9[%c0_8, %c0_9] : memref<32x32xf32, #tpu.memory_space<vmem>>, vector<32x32xf32>
    %c0_10 = arith.constant 0 : index
    %c0_11 = arith.constant 0 : index
    %c0_12 = arith.constant 0 : index
    %10 = vector.load %arg10[%c0_10, %c0_11, %c0_12] : memref<1x32x32xf32, #tpu.memory_space<vmem>>, vector<1x32x32xf32>
    %11 = vector.shape_cast %10 : vector<1x32x32xf32> to vector<32x32xf32>
    %cst = arith.constant dense<0.000000e+00> : vector<8x32xf32>
    %12 = tpu.matmul %3, %11, %cst {dimension_numbers = #tpu.dot_dimension_numbers<[1], [0], [0], [1], [0, 0, 1, 1], [], []>} : vector<8x32xf32>, vector<32x32xf32>, vector<8x32xf32> -> vector<8x32xf32>
    %c0_13 = arith.constant 0 : index
    %c0_14 = arith.constant 0 : index
    %c0_15 = arith.constant 0 : index
    %13 = vector.load %arg11[%c0_13, %c0_14, %c0_15] : memref<1x32x32xf32, #tpu.memory_space<vmem>>, vector<1x32x32xf32>
    %14 = vector.shape_cast %13 : vector<1x32x32xf32> to vector<32x32xf32>
    %cst_16 = arith.constant dense<0.000000e+00> : vector<8x32xf32>
    %15 = tpu.matmul %3, %14, %cst_16 {dimension_numbers = #tpu.dot_dimension_numbers<[1], [0], [0], [1], [0, 0, 1, 1], [], []>} : vector<8x32xf32>, vector<32x32xf32>, vector<8x32xf32> -> vector<8x32xf32>
    %c0_17 = arith.constant 0 : index
    %c0_18 = arith.constant 0 : index
    %c0_19 = arith.constant 0 : index
    %16 = vector.load %arg12[%c0_17, %c0_18, %c0_19] : memref<1x32x32xf32, #tpu.memory_space<vmem>>, vector<1x32x32xf32>
    %17 = vector.shape_cast %16 : vector<1x32x32xf32> to vector<32x32xf32>
    %cst_20 = arith.constant dense<0.000000e+00> : vector<8x32xf32>
    %18 = tpu.matmul %3, %17, %cst_20 {dimension_numbers = #tpu.dot_dimension_numbers<[1], [0], [0], [1], [0, 0, 1, 1], [], []>} : vector<8x32xf32>, vector<32x32xf32>, vector<8x32xf32> -> vector<8x32xf32>
    %c0_21 = arith.constant 0 : index
    %c0_22 = arith.constant 0 : index
    %c0_23 = arith.constant 0 : index
    %19 = vector.load %arg13[%c0_21, %c0_22, %c0_23] : memref<1x32x32xf32, #tpu.memory_space<vmem>>, vector<1x32x32xf32>
    %20 = vector.shape_cast %19 : vector<1x32x32xf32> to vector<32x32xf32>
    %cst_24 = arith.constant dense<0.000000e+00> : vector<16x32xf32>
    %21 = tpu.matmul %4, %20, %cst_24 {dimension_numbers = #tpu.dot_dimension_numbers<[1], [0], [0], [1], [0, 0, 1, 1], [], []>} : vector<16x32xf32>, vector<32x32xf32>, vector<16x32xf32> -> vector<16x32xf32>
    %cst_25 = arith.constant dense<0.000000e+00> : vector<16x32xf32>
    %22 = tpu.matmul %6, %15, %cst_25 {dimension_numbers = #tpu.dot_dimension_numbers<[1], [0], [0], [1], [0, 0, 1, 1], [], []>} : vector<16x8xf32>, vector<8x32xf32>, vector<16x32xf32> -> vector<16x32xf32>
    %cst_26 = arith.constant dense<0.000000e+00> : vector<16x32xf32>
    %23 = tpu.matmul %8, %12, %cst_26 {dimension_numbers = #tpu.dot_dimension_numbers<[1], [0], [0], [1], [0, 0, 1, 1], [], []>} : vector<16x8xf32>, vector<8x32xf32>, vector<16x32xf32> -> vector<16x32xf32>
    %cst_27 = arith.constant dense<0.000000e+00> : vector<16x32xf32>
    %24 = tpu.matmul %6, %18, %cst_27 {dimension_numbers = #tpu.dot_dimension_numbers<[1], [0], [0], [1], [0, 0, 1, 1], [], []>} : vector<16x8xf32>, vector<8x32xf32>, vector<16x32xf32> -> vector<16x32xf32>
    %25 = arith.mulf %22, %23 : vector<16x32xf32>
    %cst_28 = arith.constant 5.000000e-01 : f32
    %26 = vector.broadcast %cst_28 : f32 to vector<16x32xf32>
    %27 = arith.mulf %25, %26 : vector<16x32xf32>
    %28 = arith.mulf %27, %21 : vector<16x32xf32>
    %cst_29 = arith.constant dense<0.000000e+00> : vector<16x32xf32>
    %29 = tpu.matmul %28, %9, %cst_29 {dimension_numbers = #tpu.dot_dimension_numbers<[1], [0], [0], [1], [0, 0, 1, 1], [], []>} : vector<16x32xf32>, vector<32x32xf32>, vector<16x32xf32> -> vector<16x32xf32>
    %cst_30 = arith.constant -5.000000e+00 : f32
    %cst_31 = arith.constant 5.000000e+00 : f32
    %30 = vector.broadcast %cst_30 : f32 to vector<16x32xf32>
    %31 = arith.maximumf %30, %29 : vector<16x32xf32>
    %32 = vector.broadcast %cst_31 : f32 to vector<16x32xf32>
    %33 = arith.minimumf %32, %31 : vector<16x32xf32>
    %34 = math.exp %33 : vector<16x32xf32>
    %35 = arith.mulf %24, %34 : vector<16x32xf32>
    %cst_32 = arith.constant dense<0.000000e+00> : vector<8x32xf32>
    %36 = tpu.matmul %8, %35, %cst_32 {dimension_numbers = #tpu.dot_dimension_numbers<[0], [0], [1], [1], [0, 1, 1, 1], [], []>} : vector<16x8xf32>, vector<16x32xf32>, vector<8x32xf32> -> vector<8x32xf32>
    %cst_33 = arith.constant dense<0.000000e+00> : vector<8x32xf32>
    %37 = tpu.matmul %8, %34, %cst_33 {dimension_numbers = #tpu.dot_dimension_numbers<[0], [0], [1], [1], [0, 1, 1, 1], [], []>} : vector<16x8xf32>, vector<16x32xf32>, vector<8x32xf32> -> vector<8x32xf32>
    %cst_34 = arith.constant 9.99999997E-7 : f32
    %38 = vector.broadcast %cst_34 : f32 to vector<8x32xf32>
    %39 = arith.addf %37, %38 : vector<8x32xf32>
    %40 = arith.divf %36, %39 : vector<8x32xf32>
    %c0_35 = arith.constant 0 : index
    %c0_36 = arith.constant 0 : index
    %c0_37 = arith.constant 0 : index
    %41 = vector.load %arg14[%c0_35, %c0_36, %c0_37] : memref<1x32x32xf32, #tpu.memory_space<vmem>>, vector<1x32x32xf32>
    %42 = vector.shape_cast %41 : vector<1x32x32xf32> to vector<32x32xf32>
    %cst_38 = arith.constant dense<0.000000e+00> : vector<8x32xf32>
    %43 = tpu.matmul %40, %42, %cst_38 {dimension_numbers = #tpu.dot_dimension_numbers<[1], [0], [0], [1], [0, 0, 1, 1], [], []>} : vector<8x32xf32>, vector<32x32xf32>, vector<8x32xf32> -> vector<8x32xf32>
    %c0_39 = arith.constant 0 : index
    %c0_40 = arith.constant 0 : index
    %c0_41 = arith.constant 0 : index
    %44 = vector.load %arg15[%c0_39, %c0_40, %c0_41] : memref<1x1x32xf32, #tpu.memory_space<vmem>>, vector<1x1x32xf32>
    %45 = vector.shape_cast %44 : vector<1x1x32xf32> to vector<1x32xf32>
    %46 = vector.broadcast %45 : vector<1x32xf32> to vector<8x32xf32>
    %47 = arith.addf %43, %46 : vector<8x32xf32>
    %c0_42 = arith.constant 0 : index
    %c0_43 = arith.constant 0 : index
    %c0_44 = arith.constant 0 : index
    %48 = vector.load %arg16[%c0_42, %c0_43, %c0_44] : memref<1x32x32xf32, #tpu.memory_space<vmem>>, vector<1x32x32xf32>
    %49 = vector.shape_cast %48 : vector<1x32x32xf32> to vector<32x32xf32>
    %cst_45 = arith.constant dense<0.000000e+00> : vector<16x32xf32>
    %50 = tpu.matmul %28, %49, %cst_45 {dimension_numbers = #tpu.dot_dimension_numbers<[1], [0], [0], [1], [0, 0, 1, 1], [], []>} : vector<16x32xf32>, vector<32x32xf32>, vector<16x32xf32> -> vector<16x32xf32>
    %c0_46 = arith.constant 0 : index
    %c0_47 = arith.constant 0 : index
    %c0_48 = arith.constant 0 : index
    %51 = vector.load %arg17[%c0_46, %c0_47, %c0_48] : memref<1x1x32xf32, #tpu.memory_space<vmem>>, vector<1x1x32xf32>
    %52 = vector.shape_cast %51 : vector<1x1x32xf32> to vector<1x32xf32>
    %53 = vector.broadcast %52 : vector<1x32xf32> to vector<16x32xf32>
    %54 = arith.addf %50, %53 : vector<16x32xf32>
    %55 = arith.addf %3, %47 : vector<8x32xf32>
    %56 = arith.addf %4, %54 : vector<16x32xf32>
    %c0_49 = arith.constant 0 : index
    %c0_50 = arith.constant 0 : index
    %c0_51 = arith.constant 0 : index
    %57 = vector.load %arg26[%c0_49, %c0_50, %c0_51] : memref<1x8x32xf32, #tpu.memory_space<vmem>>, vector<1x1x32xf32>
    %58 = vector.shape_cast %57 : vector<1x1x32xf32> to vector<1x32xf32>
    %c0_52 = arith.constant 0 : index
    %c1 = arith.constant 1 : index
    %c0_53 = arith.constant 0 : index
    %59 = vector.load %arg26[%c0_52, %c1, %c0_53] : memref<1x8x32xf32, #tpu.memory_space<vmem>>, vector<1x1x32xf32>
    %60 = vector.shape_cast %59 : vector<1x1x32xf32> to vector<1x32xf32>
    %cst_54 = arith.constant 1.000000e+00 : f32
    %61 = vector.broadcast %cst_54 : f32 to vector<1x8xf32>
    %cst_55 = arith.constant dense<0.000000e+00> : vector<1x32xf32>
    %62 = tpu.matmul %61, %55, %cst_55 {dimension_numbers = #tpu.dot_dimension_numbers<[1], [0], [0], [1], [0, 0, 1, 1], [], []>} : vector<1x8xf32>, vector<8x32xf32>, vector<1x32xf32> -> vector<1x32xf32>
    %cst_56 = arith.constant 1.250000e-01 : f32
    %63 = vector.broadcast %cst_56 : f32 to vector<1x32xf32>
    %64 = arith.mulf %62, %63 : vector<1x32xf32>
    %65 = vector.broadcast %64 : vector<1x32xf32> to vector<8x32xf32>
    %66 = arith.subf %55, %65 : vector<8x32xf32>
    %67 = arith.mulf %66, %66 : vector<8x32xf32>
    %cst_57 = arith.constant dense<0.000000e+00> : vector<1x32xf32>
    %68 = tpu.matmul %61, %67, %cst_57 {dimension_numbers = #tpu.dot_dimension_numbers<[1], [0], [0], [1], [0, 0, 1, 1], [], []>} : vector<1x8xf32>, vector<8x32xf32>, vector<1x32xf32> -> vector<1x32xf32>
    %cst_58 = arith.constant 1.250000e-01 : f32
    %69 = vector.broadcast %cst_58 : f32 to vector<1x32xf32>
    %70 = arith.mulf %68, %69 : vector<1x32xf32>
    %cst_59 = arith.constant 9.99999974E-6 : f32
    %71 = vector.broadcast %cst_59 : f32 to vector<1x32xf32>
    %72 = arith.addf %70, %71 : vector<1x32xf32>
    %73 = math.rsqrt %72 : vector<1x32xf32>
    %74 = vector.broadcast %73 : vector<1x32xf32> to vector<8x32xf32>
    %75 = arith.mulf %66, %74 : vector<8x32xf32>
    %76 = vector.broadcast %58 : vector<1x32xf32> to vector<8x32xf32>
    %77 = arith.mulf %75, %76 : vector<8x32xf32>
    %78 = vector.broadcast %60 : vector<1x32xf32> to vector<8x32xf32>
    %79 = arith.addf %77, %78 : vector<8x32xf32>
    %c0_60 = arith.constant 0 : index
    %c2 = arith.constant 2 : index
    %c0_61 = arith.constant 0 : index
    %80 = vector.load %arg26[%c0_60, %c2, %c0_61] : memref<1x8x32xf32, #tpu.memory_space<vmem>>, vector<1x1x32xf32>
    %81 = vector.shape_cast %80 : vector<1x1x32xf32> to vector<1x32xf32>
    %c0_62 = arith.constant 0 : index
    %c3 = arith.constant 3 : index
    %c0_63 = arith.constant 0 : index
    %82 = vector.load %arg26[%c0_62, %c3, %c0_63] : memref<1x8x32xf32, #tpu.memory_space<vmem>>, vector<1x1x32xf32>
    %83 = vector.shape_cast %82 : vector<1x1x32xf32> to vector<1x32xf32>
    %cst_64 = arith.constant 1.000000e+00 : f32
    %84 = vector.broadcast %cst_64 : f32 to vector<1x16xf32>
    %cst_65 = arith.constant dense<0.000000e+00> : vector<1x32xf32>
    %85 = tpu.matmul %84, %56, %cst_65 {dimension_numbers = #tpu.dot_dimension_numbers<[1], [0], [0], [1], [0, 0, 1, 1], [], []>} : vector<1x16xf32>, vector<16x32xf32>, vector<1x32xf32> -> vector<1x32xf32>
    %cst_66 = arith.constant 6.250000e-02 : f32
    %86 = vector.broadcast %cst_66 : f32 to vector<1x32xf32>
    %87 = arith.mulf %85, %86 : vector<1x32xf32>
    %88 = vector.broadcast %87 : vector<1x32xf32> to vector<16x32xf32>
    %89 = arith.subf %56, %88 : vector<16x32xf32>
    %90 = arith.mulf %89, %89 : vector<16x32xf32>
    %cst_67 = arith.constant dense<0.000000e+00> : vector<1x32xf32>
    %91 = tpu.matmul %84, %90, %cst_67 {dimension_numbers = #tpu.dot_dimension_numbers<[1], [0], [0], [1], [0, 0, 1, 1], [], []>} : vector<1x16xf32>, vector<16x32xf32>, vector<1x32xf32> -> vector<1x32xf32>
    %cst_68 = arith.constant 6.250000e-02 : f32
    %92 = vector.broadcast %cst_68 : f32 to vector<1x32xf32>
    %93 = arith.mulf %91, %92 : vector<1x32xf32>
    %cst_69 = arith.constant 9.99999974E-6 : f32
    %94 = vector.broadcast %cst_69 : f32 to vector<1x32xf32>
    %95 = arith.addf %93, %94 : vector<1x32xf32>
    %96 = math.rsqrt %95 : vector<1x32xf32>
    %97 = vector.broadcast %96 : vector<1x32xf32> to vector<16x32xf32>
    %98 = arith.mulf %89, %97 : vector<16x32xf32>
    %99 = vector.broadcast %81 : vector<1x32xf32> to vector<16x32xf32>
    %100 = arith.mulf %98, %99 : vector<16x32xf32>
    %101 = vector.broadcast %83 : vector<1x32xf32> to vector<16x32xf32>
    %102 = arith.addf %100, %101 : vector<16x32xf32>
    %c0_70 = arith.constant 0 : index
    %c0_71 = arith.constant 0 : index
    %c0_72 = arith.constant 0 : index
    %103 = vector.load %arg18[%c0_70, %c0_71, %c0_72] : memref<1x32x64xf32, #tpu.memory_space<vmem>>, vector<1x32x64xf32>
    %104 = vector.shape_cast %103 : vector<1x32x64xf32> to vector<32x64xf32>
    %cst_73 = arith.constant dense<0.000000e+00> : vector<8x64xf32>
    %105 = tpu.matmul %79, %104, %cst_73 {dimension_numbers = #tpu.dot_dimension_numbers<[1], [0], [0], [1], [0, 0, 1, 1], [], []>} : vector<8x32xf32>, vector<32x64xf32>, vector<8x64xf32> -> vector<8x64xf32>
    %c0_74 = arith.constant 0 : index
    %c0_75 = arith.constant 0 : index
    %c0_76 = arith.constant 0 : index
    %106 = vector.load %arg19[%c0_74, %c0_75, %c0_76] : memref<1x1x64xf32, #tpu.memory_space<vmem>>, vector<1x1x64xf32>
    %107 = vector.shape_cast %106 : vector<1x1x64xf32> to vector<1x64xf32>
    %108 = vector.broadcast %107 : vector<1x64xf32> to vector<8x64xf32>
    %109 = arith.addf %105, %108 : vector<8x64xf32>
    %cst_77 = arith.constant 0.000000e+00 : f32
    %110 = vector.broadcast %cst_77 : f32 to vector<8x64xf32>
    %111 = arith.maximumf %109, %110 : vector<8x64xf32>
    %c0_78 = arith.constant 0 : index
    %c0_79 = arith.constant 0 : index
    %c0_80 = arith.constant 0 : index
    %112 = vector.load %arg20[%c0_78, %c0_79, %c0_80] : memref<1x64x32xf32, #tpu.memory_space<vmem>>, vector<1x64x32xf32>
    %113 = vector.shape_cast %112 : vector<1x64x32xf32> to vector<64x32xf32>
    %cst_81 = arith.constant dense<0.000000e+00> : vector<8x32xf32>
    %114 = tpu.matmul %111, %113, %cst_81 {dimension_numbers = #tpu.dot_dimension_numbers<[1], [0], [0], [1], [0, 0, 1, 1], [], []>} : vector<8x64xf32>, vector<64x32xf32>, vector<8x32xf32> -> vector<8x32xf32>
    %c0_82 = arith.constant 0 : index
    %c0_83 = arith.constant 0 : index
    %c0_84 = arith.constant 0 : index
    %115 = vector.load %arg21[%c0_82, %c0_83, %c0_84] : memref<1x1x32xf32, #tpu.memory_space<vmem>>, vector<1x1x32xf32>
    %116 = vector.shape_cast %115 : vector<1x1x32xf32> to vector<1x32xf32>
    %117 = vector.broadcast %116 : vector<1x32xf32> to vector<8x32xf32>
    %118 = arith.addf %114, %117 : vector<8x32xf32>
    %119 = arith.addf %79, %118 : vector<8x32xf32>
    %c0_85 = arith.constant 0 : index
    %c4 = arith.constant 4 : index
    %c0_86 = arith.constant 0 : index
    %120 = vector.load %arg26[%c0_85, %c4, %c0_86] : memref<1x8x32xf32, #tpu.memory_space<vmem>>, vector<1x1x32xf32>
    %121 = vector.shape_cast %120 : vector<1x1x32xf32> to vector<1x32xf32>
    %c0_87 = arith.constant 0 : index
    %c5 = arith.constant 5 : index
    %c0_88 = arith.constant 0 : index
    %122 = vector.load %arg26[%c0_87, %c5, %c0_88] : memref<1x8x32xf32, #tpu.memory_space<vmem>>, vector<1x1x32xf32>
    %123 = vector.shape_cast %122 : vector<1x1x32xf32> to vector<1x32xf32>
    %cst_89 = arith.constant 1.000000e+00 : f32
    %124 = vector.broadcast %cst_89 : f32 to vector<1x8xf32>
    %cst_90 = arith.constant dense<0.000000e+00> : vector<1x32xf32>
    %125 = tpu.matmul %124, %119, %cst_90 {dimension_numbers = #tpu.dot_dimension_numbers<[1], [0], [0], [1], [0, 0, 1, 1], [], []>} : vector<1x8xf32>, vector<8x32xf32>, vector<1x32xf32> -> vector<1x32xf32>
    %cst_91 = arith.constant 1.250000e-01 : f32
    %126 = vector.broadcast %cst_91 : f32 to vector<1x32xf32>
    %127 = arith.mulf %125, %126 : vector<1x32xf32>
    %128 = vector.broadcast %127 : vector<1x32xf32> to vector<8x32xf32>
    %129 = arith.subf %119, %128 : vector<8x32xf32>
    %130 = arith.mulf %129, %129 : vector<8x32xf32>
    %cst_92 = arith.constant dense<0.000000e+00> : vector<1x32xf32>
    %131 = tpu.matmul %124, %130, %cst_92 {dimension_numbers = #tpu.dot_dimension_numbers<[1], [0], [0], [1], [0, 0, 1, 1], [], []>} : vector<1x8xf32>, vector<8x32xf32>, vector<1x32xf32> -> vector<1x32xf32>
    %cst_93 = arith.constant 1.250000e-01 : f32
    %132 = vector.broadcast %cst_93 : f32 to vector<1x32xf32>
    %133 = arith.mulf %131, %132 : vector<1x32xf32>
    %cst_94 = arith.constant 9.99999974E-6 : f32
    %134 = vector.broadcast %cst_94 : f32 to vector<1x32xf32>
    %135 = arith.addf %133, %134 : vector<1x32xf32>
    %136 = math.rsqrt %135 : vector<1x32xf32>
    %137 = vector.broadcast %136 : vector<1x32xf32> to vector<8x32xf32>
    %138 = arith.mulf %129, %137 : vector<8x32xf32>
    %139 = vector.broadcast %121 : vector<1x32xf32> to vector<8x32xf32>
    %140 = arith.mulf %138, %139 : vector<8x32xf32>
    %141 = vector.broadcast %123 : vector<1x32xf32> to vector<8x32xf32>
    %142 = arith.addf %140, %141 : vector<8x32xf32>
    %c0_95 = arith.constant 0 : index
    %c0_96 = arith.constant 0 : index
    %c0_97 = arith.constant 0 : index
    %143 = vector.load %arg22[%c0_95, %c0_96, %c0_97] : memref<1x32x64xf32, #tpu.memory_space<vmem>>, vector<1x32x64xf32>
    %144 = vector.shape_cast %143 : vector<1x32x64xf32> to vector<32x64xf32>
    %cst_98 = arith.constant dense<0.000000e+00> : vector<16x64xf32>
    %145 = tpu.matmul %102, %144, %cst_98 {dimension_numbers = #tpu.dot_dimension_numbers<[1], [0], [0], [1], [0, 0, 1, 1], [], []>} : vector<16x32xf32>, vector<32x64xf32>, vector<16x64xf32> -> vector<16x64xf32>
    %c0_99 = arith.constant 0 : index
    %c0_100 = arith.constant 0 : index
    %c0_101 = arith.constant 0 : index
    %146 = vector.load %arg23[%c0_99, %c0_100, %c0_101] : memref<1x1x64xf32, #tpu.memory_space<vmem>>, vector<1x1x64xf32>
    %147 = vector.shape_cast %146 : vector<1x1x64xf32> to vector<1x64xf32>
    %148 = vector.broadcast %147 : vector<1x64xf32> to vector<16x64xf32>
    %149 = arith.addf %145, %148 : vector<16x64xf32>
    %cst_102 = arith.constant 0.000000e+00 : f32
    %150 = vector.broadcast %cst_102 : f32 to vector<16x64xf32>
    %151 = arith.maximumf %149, %150 : vector<16x64xf32>
    %c0_103 = arith.constant 0 : index
    %c0_104 = arith.constant 0 : index
    %c0_105 = arith.constant 0 : index
    %152 = vector.load %arg24[%c0_103, %c0_104, %c0_105] : memref<1x64x32xf32, #tpu.memory_space<vmem>>, vector<1x64x32xf32>
    %153 = vector.shape_cast %152 : vector<1x64x32xf32> to vector<64x32xf32>
    %cst_106 = arith.constant dense<0.000000e+00> : vector<16x32xf32>
    %154 = tpu.matmul %151, %153, %cst_106 {dimension_numbers = #tpu.dot_dimension_numbers<[1], [0], [0], [1], [0, 0, 1, 1], [], []>} : vector<16x64xf32>, vector<64x32xf32>, vector<16x32xf32> -> vector<16x32xf32>
    %c0_107 = arith.constant 0 : index
    %c0_108 = arith.constant 0 : index
    %c0_109 = arith.constant 0 : index
    %155 = vector.load %arg25[%c0_107, %c0_108, %c0_109] : memref<1x1x32xf32, #tpu.memory_space<vmem>>, vector<1x1x32xf32>
    %156 = vector.shape_cast %155 : vector<1x1x32xf32> to vector<1x32xf32>
    %157 = vector.broadcast %156 : vector<1x32xf32> to vector<16x32xf32>
    %158 = arith.addf %154, %157 : vector<16x32xf32>
    %159 = arith.addf %102, %158 : vector<16x32xf32>
    %c0_110 = arith.constant 0 : index
    %c6 = arith.constant 6 : index
    %c0_111 = arith.constant 0 : index
    %160 = vector.load %arg26[%c0_110, %c6, %c0_111] : memref<1x8x32xf32, #tpu.memory_space<vmem>>, vector<1x1x32xf32>
    %161 = vector.shape_cast %160 : vector<1x1x32xf32> to vector<1x32xf32>
    %c0_112 = arith.constant 0 : index
    %c7 = arith.constant 7 : index
    %c0_113 = arith.constant 0 : index
    %162 = vector.load %arg26[%c0_112, %c7, %c0_113] : memref<1x8x32xf32, #tpu.memory_space<vmem>>, vector<1x1x32xf32>
    %163 = vector.shape_cast %162 : vector<1x1x32xf32> to vector<1x32xf32>
    %cst_114 = arith.constant 1.000000e+00 : f32
    %164 = vector.broadcast %cst_114 : f32 to vector<1x16xf32>
    %cst_115 = arith.constant dense<0.000000e+00> : vector<1x32xf32>
    %165 = tpu.matmul %164, %159, %cst_115 {dimension_numbers = #tpu.dot_dimension_numbers<[1], [0], [0], [1], [0, 0, 1, 1], [], []>} : vector<1x16xf32>, vector<16x32xf32>, vector<1x32xf32> -> vector<1x32xf32>
    %cst_116 = arith.constant 6.250000e-02 : f32
    %166 = vector.broadcast %cst_116 : f32 to vector<1x32xf32>
    %167 = arith.mulf %165, %166 : vector<1x32xf32>
    %168 = vector.broadcast %167 : vector<1x32xf32> to vector<16x32xf32>
    %169 = arith.subf %159, %168 : vector<16x32xf32>
    %170 = arith.mulf %169, %169 : vector<16x32xf32>
    %cst_117 = arith.constant dense<0.000000e+00> : vector<1x32xf32>
    %171 = tpu.matmul %164, %170, %cst_117 {dimension_numbers = #tpu.dot_dimension_numbers<[1], [0], [0], [1], [0, 0, 1, 1], [], []>} : vector<1x16xf32>, vector<16x32xf32>, vector<1x32xf32> -> vector<1x32xf32>
    %cst_118 = arith.constant 6.250000e-02 : f32
    %172 = vector.broadcast %cst_118 : f32 to vector<1x32xf32>
    %173 = arith.mulf %171, %172 : vector<1x32xf32>
    %cst_119 = arith.constant 9.99999974E-6 : f32
    %174 = vector.broadcast %cst_119 : f32 to vector<1x32xf32>
    %175 = arith.addf %173, %174 : vector<1x32xf32>
    %176 = math.rsqrt %175 : vector<1x32xf32>
    %177 = vector.broadcast %176 : vector<1x32xf32> to vector<16x32xf32>
    %178 = arith.mulf %169, %177 : vector<16x32xf32>
    %179 = vector.broadcast %161 : vector<1x32xf32> to vector<16x32xf32>
    %180 = arith.mulf %178, %179 : vector<16x32xf32>
    %181 = vector.broadcast %163 : vector<1x32xf32> to vector<16x32xf32>
    %182 = arith.addf %180, %181 : vector<16x32xf32>
    %183 = arith.addf %142, %3 : vector<8x32xf32>
    %184 = arith.addf %182, %4 : vector<16x32xf32>
    %c0_120 = arith.constant 0 : index
    %c0_121 = arith.constant 0 : index
    %185 = vector.load %arg36[%c0_120, %c0_121] : memref<8x32xf32, #tpu.memory_space<vmem>>, vector<8x32xf32>
    tpu.vector_store %arg36[%c0_120, %c0_121], %183 {strides = array<i32>} : memref<8x32xf32, #tpu.memory_space<vmem>>, vector<8x32xf32>,
    %c0_122 = arith.constant 0 : index
    %c0_123 = arith.constant 0 : index
    %186 = vector.load %arg37[%c0_122, %c0_123] : memref<16x32xf32, #tpu.memory_space<vmem>>, vector<16x32xf32>
    tpu.vector_store %arg37[%c0_122, %c0_123], %184 {strides = array<i32>} : memref<16x32xf32, #tpu.memory_space<vmem>>, vector<16x32xf32>,
    %c1_i32 = arith.constant 1 : i32
    %187 = arith.cmpi eq, %arg0, %c1_i32 : i32
    %188 = arith.extui %187 : i1 to i32
    %c0_i32_124 = arith.constant 0 : i32
    %189 = arith.cmpi ne, %188, %c0_i32_124 : i32
    scf.if %189 {
      %cst_125 = arith.constant dense<0.000000e+00> : vector<16x32xf32>
      %190 = tpu.matmul %6, %183, %cst_125 {dimension_numbers = #tpu.dot_dimension_numbers<[1], [0], [0], [1], [0, 0, 1, 1], [], []>} : vector<16x8xf32>, vector<8x32xf32>, vector<16x32xf32> -> vector<16x32xf32>
      %cst_126 = arith.constant dense<0.000000e+00> : vector<16x32xf32>
      %191 = tpu.matmul %8, %183, %cst_126 {dimension_numbers = #tpu.dot_dimension_numbers<[1], [0], [0], [1], [0, 0, 1, 1], [], []>} : vector<16x8xf32>, vector<8x32xf32>, vector<16x32xf32> -> vector<16x32xf32>
      %c0_127 = arith.constant 0 : index
      %c0_128 = arith.constant 0 : index
      %192 = vector.load %arg27[%c0_127, %c0_128] : memref<32x64xf32, #tpu.memory_space<vmem>>, vector<32x64xf32>
      %cst_129 = arith.constant dense<0.000000e+00> : vector<16x64xf32>
      %193 = tpu.matmul %190, %192, %cst_129 {dimension_numbers = #tpu.dot_dimension_numbers<[1], [0], [0], [1], [0, 0, 1, 1], [], []>} : vector<16x32xf32>, vector<32x64xf32>, vector<16x64xf32> -> vector<16x64xf32>
      %c0_130 = arith.constant 0 : index
      %c0_131 = arith.constant 0 : index
      %194 = vector.load %arg28[%c0_130, %c0_131] : memref<32x64xf32, #tpu.memory_space<vmem>>, vector<32x64xf32>
      %cst_132 = arith.constant dense<0.000000e+00> : vector<16x64xf32>
      %195 = tpu.matmul %191, %194, %cst_132 {dimension_numbers = #tpu.dot_dimension_numbers<[1], [0], [0], [1], [0, 0, 1, 1], [], []>} : vector<16x32xf32>, vector<32x64xf32>, vector<16x64xf32> -> vector<16x64xf32>
      %196 = arith.addf %193, %195 : vector<16x64xf32>
      %c0_133 = arith.constant 0 : index
      %c0_134 = arith.constant 0 : index
      %197 = vector.load %arg29[%c0_133, %c0_134] : memref<32x64xf32, #tpu.memory_space<vmem>>, vector<32x64xf32>
      %cst_135 = arith.constant dense<0.000000e+00> : vector<16x64xf32>
      %198 = tpu.matmul %184, %197, %cst_135 {dimension_numbers = #tpu.dot_dimension_numbers<[1], [0], [0], [1], [0, 0, 1, 1], [], []>} : vector<16x32xf32>, vector<32x64xf32>, vector<16x64xf32> -> vector<16x64xf32>
      %199 = arith.addf %196, %198 : vector<16x64xf32>
      %c0_136 = arith.constant 0 : index
      %c0_137 = arith.constant 0 : index
      %200 = vector.load %arg30[%c0_136, %c0_137] : memref<1x64xf32, #tpu.memory_space<vmem>>, vector<1x64xf32>
      %201 = vector.broadcast %200 : vector<1x64xf32> to vector<16x64xf32>
      %202 = arith.addf %199, %201 : vector<16x64xf32>
      %cst_138 = arith.constant 0.000000e+00 : f32
      %203 = vector.broadcast %cst_138 : f32 to vector<16x64xf32>
      %204 = arith.maximumf %202, %203 : vector<16x64xf32>
      %c0_139 = arith.constant 0 : index
      %c0_140 = arith.constant 0 : index
      %205 = vector.load %arg31[%c0_139, %c0_140] : memref<64x32xf32, #tpu.memory_space<vmem>>, vector<64x32xf32>
      %cst_141 = arith.constant dense<0.000000e+00> : vector<16x32xf32>
      %206 = tpu.matmul %204, %205, %cst_141 {dimension_numbers = #tpu.dot_dimension_numbers<[1], [0], [0], [1], [0, 0, 1, 1], [], []>} : vector<16x64xf32>, vector<64x32xf32>, vector<16x32xf32> -> vector<16x32xf32>
      %c0_142 = arith.constant 0 : index
      %c0_143 = arith.constant 0 : index
      %207 = vector.load %arg32[%c0_142, %c0_143] : memref<1x32xf32, #tpu.memory_space<vmem>>, vector<1x32xf32>
      %208 = vector.broadcast %207 : vector<1x32xf32> to vector<16x32xf32>
      %209 = arith.addf %206, %208 : vector<16x32xf32>
      %cst_144 = arith.constant 0.000000e+00 : f32
      %210 = vector.broadcast %cst_144 : f32 to vector<16x32xf32>
      %211 = arith.maximumf %209, %210 : vector<16x32xf32>
      %c0_145 = arith.constant 0 : index
      %c0_146 = arith.constant 0 : index
      %212 = vector.load %arg33[%c0_145, %c0_146] : memref<32x128xf32, #tpu.memory_space<vmem>>, vector<32x128xf32>
      %cst_147 = arith.constant dense<0.000000e+00> : vector<16x128xf32>
      %213 = tpu.matmul %211, %212, %cst_147 {dimension_numbers = #tpu.dot_dimension_numbers<[1], [0], [0], [1], [0, 0, 1, 1], [], []>} : vector<16x32xf32>, vector<32x128xf32>, vector<16x128xf32> -> vector<16x128xf32>
      %c0_148 = arith.constant 0 : index
      %c0_149 = arith.constant 0 : index
      %214 = vector.load %arg34[%c0_148, %c0_149] : memref<1x128xf32, #tpu.memory_space<vmem>>, vector<1x128xf32>
      %215 = vector.broadcast %214 : vector<1x128xf32> to vector<16x128xf32>
      %216 = arith.addf %213, %215 : vector<16x128xf32>
      %c0_150 = arith.constant 0 : index
      %c0_151 = arith.constant 0 : index
      %217 = vector.load %arg35[%c0_150, %c0_151] : memref<16x128xf32, #tpu.memory_space<vmem>>, vector<16x128xf32>
      tpu.vector_store %arg35[%c0_150, %c0_151], %216 {strides = array<i32>} : memref<16x128xf32, #tpu.memory_space<vmem>>, vector<16x128xf32>,
    } else {
    }
    return
  }
  func.func @transform_0(%arg0: i32) -> (i32, i32) {
    %c0_i32 = arith.constant 0 : i32
    %c0_i32_0 = arith.constant 0 : i32
    %c0_i32_1 = arith.constant 0 : i32
    return %c0_i32, %c0_i32_0 : i32, i32
  }
  func.func @transform_1(%arg0: i32) -> (i32, i32) {
    %c0_i32 = arith.constant 0 : i32
    %c0_i32_0 = arith.constant 0 : i32
    %c0_i32_1 = arith.constant 0 : i32
    return %c0_i32, %c0_i32_0 : i32, i32
  }
  func.func @transform_2(%arg0: i32) -> (i32, i32) {
    %c0_i32 = arith.constant 0 : i32
    %c0_i32_0 = arith.constant 0 : i32
    %c0_i32_1 = arith.constant 0 : i32
    return %c0_i32, %c0_i32_0 : i32, i32
  }
  func.func @transform_3(%arg0: i32) -> (i32, i32) {
    %c0_i32 = arith.constant 0 : i32
    %c0_i32_0 = arith.constant 0 : i32
    %c0_i32_1 = arith.constant 0 : i32
    return %c0_i32, %c0_i32_0 : i32, i32
  }
  func.func @transform_4(%arg0: i32) -> (i32, i32) {
    %c0_i32 = arith.constant 0 : i32
    %c0_i32_0 = arith.constant 0 : i32
    %c0_i32_1 = arith.constant 0 : i32
    return %c0_i32, %c0_i32_0 : i32, i32
  }
  func.func @transform_5(%arg0: i32) -> (i32, i32) {
    %c0_i32 = arith.constant 0 : i32
    %c0_i32_0 = arith.constant 0 : i32
    %c0_i32_1 = arith.constant 0 : i32
    return %c0_i32, %c0_i32_0 : i32, i32
  }
  func.func @transform_6(%arg0: i32) -> (i32, i32) {
    %c0_i32 = arith.constant 0 : i32
    %c0_i32_0 = arith.constant 0 : i32
    %c0_i32_1 = arith.constant 0 : i32
    return %c0_i32, %c0_i32_0 : i32, i32
  }
  func.func @transform_7(%arg0: i32) -> (i32, i32) {
    %c0_i32 = arith.constant 0 : i32
    %c0_i32_0 = arith.constant 0 : i32
    %c0_i32_1 = arith.constant 0 : i32
    return %c0_i32, %c0_i32_0 : i32, i32
  }
  func.func @transform_8(%arg0: i32) -> (i32, i32) {
    %c0_i32 = arith.constant 0 : i32
    %c0_i32_0 = arith.constant 0 : i32
    %c0_i32_1 = arith.constant 0 : i32
    return %c0_i32, %c0_i32_0 : i32, i32
  }
  func.func @transform_9(%arg0: i32) -> (i32, i32, i32) {
    %c0_i32 = arith.constant 0 : i32
    %c0_i32_0 = arith.constant 0 : i32
    %c0_i32_1 = arith.constant 0 : i32
    return %arg0, %c0_i32, %c0_i32_0 : i32, i32, i32
  }
  func.func @transform_10(%arg0: i32) -> (i32, i32, i32) {
    %c0_i32 = arith.constant 0 : i32
    %c0_i32_0 = arith.constant 0 : i32
    %c0_i32_1 = arith.constant 0 : i32
    return %arg0, %c0_i32, %c0_i32_0 : i32, i32, i32
  }
  func.func @transform_11(%arg0: i32) -> (i32, i32, i32) {
    %c0_i32 = arith.constant 0 : i32
    %c0_i32_0 = arith.constant 0 : i32
    %c0_i32_1 = arith.constant 0 : i32
    return %arg0, %c0_i32, %c0_i32_0 : i32, i32, i32
  }
  func.func @transform_12(%arg0: i32) -> (i32, i32, i32) {
    %c0_i32 = arith.constant 0 : i32
    %c0_i32_0 = arith.constant 0 : i32
    %c0_i32_1 = arith.constant 0 : i32
    return %arg0, %c0_i32, %c0_i32_0 : i32, i32, i32
  }
  func.func @transform_13(%arg0: i32) -> (i32, i32, i32) {
    %c0_i32 = arith.constant 0 : i32
    %c0_i32_0 = arith.constant 0 : i32
    %c0_i32_1 = arith.constant 0 : i32
    return %arg0, %c0_i32, %c0_i32_0 : i32, i32, i32
  }
  func.func @transform_14(%arg0: i32) -> (i32, i32, i32) {
    %c0_i32 = arith.constant 0 : i32
    %c0_i32_0 = arith.constant 0 : i32
    %c0_i32_1 = arith.constant 0 : i32
    return %arg0, %c0_i32, %c0_i32_0 : i32, i32, i32
  }
  func.func @transform_15(%arg0: i32) -> (i32, i32, i32) {
    %c0_i32 = arith.constant 0 : i32
    %c0_i32_0 = arith.constant 0 : i32
    %c0_i32_1 = arith.constant 0 : i32
    return %arg0, %c0_i32, %c0_i32_0 : i32, i32, i32
  }
  func.func @transform_16(%arg0: i32) -> (i32, i32, i32) {
    %c0_i32 = arith.constant 0 : i32
    %c0_i32_0 = arith.constant 0 : i32
    %c0_i32_1 = arith.constant 0 : i32
    return %arg0, %c0_i32, %c0_i32_0 : i32, i32, i32
  }
  func.func @transform_17(%arg0: i32) -> (i32, i32, i32) {
    %c0_i32 = arith.constant 0 : i32
    %c0_i32_0 = arith.constant 0 : i32
    %c0_i32_1 = arith.constant 0 : i32
    return %arg0, %c0_i32, %c0_i32_0 : i32, i32, i32
  }
  func.func @transform_18(%arg0: i32) -> (i32, i32, i32) {
    %c0_i32 = arith.constant 0 : i32
    %c0_i32_0 = arith.constant 0 : i32
    %c0_i32_1 = arith.constant 0 : i32
    return %arg0, %c0_i32, %c0_i32_0 : i32, i32, i32
  }
  func.func @transform_19(%arg0: i32) -> (i32, i32, i32) {
    %c0_i32 = arith.constant 0 : i32
    %c0_i32_0 = arith.constant 0 : i32
    %c0_i32_1 = arith.constant 0 : i32
    return %arg0, %c0_i32, %c0_i32_0 : i32, i32, i32
  }
  func.func @transform_20(%arg0: i32) -> (i32, i32, i32) {
    %c0_i32 = arith.constant 0 : i32
    %c0_i32_0 = arith.constant 0 : i32
    %c0_i32_1 = arith.constant 0 : i32
    return %arg0, %c0_i32, %c0_i32_0 : i32, i32, i32
  }
  func.func @transform_21(%arg0: i32) -> (i32, i32, i32) {
    %c0_i32 = arith.constant 0 : i32
    %c0_i32_0 = arith.constant 0 : i32
    %c0_i32_1 = arith.constant 0 : i32
    return %arg0, %c0_i32, %c0_i32_0 : i32, i32, i32
  }
  func.func @transform_22(%arg0: i32) -> (i32, i32, i32) {
    %c0_i32 = arith.constant 0 : i32
    %c0_i32_0 = arith.constant 0 : i32
    %c0_i32_1 = arith.constant 0 : i32
    return %arg0, %c0_i32, %c0_i32_0 : i32, i32, i32
  }
  func.func @transform_23(%arg0: i32) -> (i32, i32, i32) {
    %c0_i32 = arith.constant 0 : i32
    %c0_i32_0 = arith.constant 0 : i32
    %c0_i32_1 = arith.constant 0 : i32
    return %arg0, %c0_i32, %c0_i32_0 : i32, i32, i32
  }
  func.func @transform_24(%arg0: i32) -> (i32, i32, i32) {
    %c0_i32 = arith.constant 0 : i32
    %c0_i32_0 = arith.constant 0 : i32
    %c0_i32_1 = arith.constant 0 : i32
    return %arg0, %c0_i32, %c0_i32_0 : i32, i32, i32
  }
  func.func @transform_25(%arg0: i32) -> (i32, i32, i32) {
    %c0_i32 = arith.constant 0 : i32
    %c0_i32_0 = arith.constant 0 : i32
    %c0_i32_1 = arith.constant 0 : i32
    return %arg0, %c0_i32, %c0_i32_0 : i32, i32, i32
  }
  func.func @transform_26(%arg0: i32) -> (i32, i32) {
    %c0_i32 = arith.constant 0 : i32
    %c0_i32_0 = arith.constant 0 : i32
    %c0_i32_1 = arith.constant 0 : i32
    return %c0_i32, %c0_i32_0 : i32, i32
  }
  func.func @transform_27(%arg0: i32) -> (i32, i32) {
    %c0_i32 = arith.constant 0 : i32
    %c0_i32_0 = arith.constant 0 : i32
    %c0_i32_1 = arith.constant 0 : i32
    return %c0_i32, %c0_i32_0 : i32, i32
  }
  func.func @transform_28(%arg0: i32) -> (i32, i32) {
    %c0_i32 = arith.constant 0 : i32
    %c0_i32_0 = arith.constant 0 : i32
    %c0_i32_1 = arith.constant 0 : i32
    return %c0_i32, %c0_i32_0 : i32, i32
  }
  func.func @transform_29(%arg0: i32) -> (i32, i32) {
    %c0_i32 = arith.constant 0 : i32
    %c0_i32_0 = arith.constant 0 : i32
    %c0_i32_1 = arith.constant 0 : i32
    return %c0_i32, %c0_i32_0 : i32, i32
  }
  func.func @transform_30(%arg0: i32) -> (i32, i32) {
    %c0_i32 = arith.constant 0 : i32
    %c0_i32_0 = arith.constant 0 : i32
    %c0_i32_1 = arith.constant 0 : i32
    return %c0_i32, %c0_i32_0 : i32, i32
  }
  func.func @transform_31(%arg0: i32) -> (i32, i32) {
    %c0_i32 = arith.constant 0 : i32
    %c0_i32_0 = arith.constant 0 : i32
    %c0_i32_1 = arith.constant 0 : i32
    return %c0_i32, %c0_i32_0 : i32, i32
  }
  func.func @transform_32(%arg0: i32) -> (i32, i32) {
    %c0_i32 = arith.constant 0 : i32
    %c0_i32_0 = arith.constant 0 : i32
    %c0_i32_1 = arith.constant 0 : i32
    return %c0_i32, %c0_i32_0 : i32, i32
  }
  func.func @transform_33(%arg0: i32) -> (i32, i32) {
    %c0_i32 = arith.constant 0 : i32
    %c0_i32_0 = arith.constant 0 : i32
    %c0_i32_1 = arith.constant 0 : i32
    return %c0_i32, %c0_i32_0 : i32, i32
  }
  func.func @transform_34(%arg0: i32) -> (i32, i32) {
    %c0_i32 = arith.constant 0 : i32
    %c0_i32_0 = arith.constant 0 : i32
    %c0_i32_1 = arith.constant 0 : i32
    return %c0_i32, %c0_i32_0 : i32, i32
  }
}

</mosaic_0001>

<bundles_post_ra>
// kernel: graph_transformer_net.1
= control target key start
LH: loop header
LB: loop body
LE: loop exit
PB: predicated region body
PF: predicated region fallthrough
CT: control target
= control target key end

     0   :  { %s7495_s6 = smov 1   ;;  %s7496_s10 = smov 2   ;;  %s8909_s0 = inlined_call_operand.smem [shape: u32[35], index: -1, kind: input, shape index: {}] }
   0x1   :  { %s7586_s5 = sld [smem:[%s8909_s0]]   ;;  %s7497_s14 = smov 3  }
   0x2   :  { %s7591_s9 = sld [smem:[%s8909_s0 + %s7495_s6]]   ;;  %s7498_s18 = smov 4  }
   0x3   :  { %s7596_s13 = sld [smem:[%s8909_s0 + %s7496_s10]]   ;;  %s7499_s22 = smov 5  }
   0x4   :  { %s7601_s17 = sld [smem:[%s8909_s0 + %s7497_s14]]   ;;  %s7500_s26 = smov 6  }
   0x5   :  { %s7606_s21 = sld [smem:[%s8909_s0 + %s7498_s18]]   ;;  %s7501_s30 = smov 7  }
   0x6   :  { %s7611_s25 = sld [smem:[%s8909_s0 + %s7499_s22]]   ;;  %s7502_s4 = smov 8  }
   0x7   :  { %8979 = sst [smem:[#allocation78_spill]] %s7586_s5  ;;  %s7503_s10 = smov 9  }
   0x8   :  { %8980 = sst [smem:[#allocation79_spill]] %s7591_s9  ;;  %s7504_s15 = smov 10  }
   0x9   :  { %8981 = sst [smem:[#allocation80_spill]] %s7596_s13  ;;  %s7505_s20 = smov 11  }
   0xa   :  { %8982 = sst [smem:[#allocation81_spill]] %s7601_s17  ;;  %s7507_s1 = smov 13  }
   0xb   :  { %s7616_s29 = sld [smem:[%s8909_s0 + %s7500_s26]]   ;;  %s7506_s26 = smov 12  }
   0xc   :  { %s7621_s3 = sld [smem:[%s8909_s0 + %s7501_s30]]   ;;  %s7508_s7 = smov 14  }
   0xd   :  { %s7626_s8 = sld [smem:[%s8909_s0 + %s7502_s4]]   ;;  %s7510_s22 = smov 16  }
   0xe   :  { %s7631_s14 = sld [smem:[%s8909_s0 + %s7503_s10]]   ;;  %s7511_s28 = smov 17  }
   0xf   :  { %s7636_s19 = sld [smem:[%s8909_s0 + %s7504_s15]]   ;;  %s7509_s15 = smov 15  }
  0x10   :  { %s7641_s24 = sld [smem:[%s8909_s0 + %s7505_s20]]  }
  0x11   :  { %s7646_s30 = sld [smem:[%s8909_s0 + %s7506_s26]]  }
  0x12   :  { %8983 = sst [smem:[#allocation82_spill]] %s7621_s3 }
  0x13   :  { %8984 = sst [smem:[#allocation83_spill]] %s7626_s8 }
  0x14   :  { %8985 = sst [smem:[#allocation84_spill]] %s7631_s14 }
  0x15   :  { %8986 = sst [smem:[#allocation85_spill]] %s7636_s19 }
  0x16   :  { %8987 = sst [smem:[#allocation86_spill]] %s7641_s24 }
  0x17   :  { %8988 = sst [smem:[#allocation87_spill]] %s7646_s30 }
  0x18   :  { %s7651_s6 = sld [smem:[%s8909_s0 + %s7507_s1]]  }
  0x19   :  { %s7656_s12 = sld [smem:[%s8909_s0 + %s7508_s7]]   ;;  %s7512_s7 = smov 18  }
  0x1a   :  { %s7661_s20 = sld [smem:[%s8909_s0 + %s7509_s15]]   ;;  %s7513_s15 = smov 19  }
  0x1b   :  { %s7666_s27 = sld [smem:[%s8909_s0 + %s7510_s22]]   ;;  %s7514_s22 = smov 20  }
  0x1c   :  { %s7671_s4 = sld [smem:[%s8909_s0 + %s7511_s28]]   ;;  %s7515_s28 = smov 21  }
  0x1d   :  { %s7681_s30 = sld [smem:[%s8909_s0 + %s7513_s15]]   ;;  %s7517_s15 = smov 23  }
  0x1e   :  { %8989 = sst [smem:[#allocation88_spill]] %s7651_s6 }
  0x1f   :  { %8990 = sst [smem:[#allocation89_spill]] %s7656_s12 }
  0x20   :  { %8991 = sst [smem:[#allocation90_spill]] %s7661_s20 }
  0x21   :  { %8992 = sst [smem:[#allocation91_spill]] %s7666_s27 }
  0x22   :  { %8993 = sst [smem:[#allocation92_spill]] %s7671_s4 }
  0x23   :  { %s7676_s12 = sld [smem:[%s8909_s0 + %s7512_s7]]   ;;  %s7516_s7 = smov 22  }
  0x24   :  { %8995 = sst [smem:[#allocation94_spill]] %s7681_s30 }
  0x25   :  { %s7686_s27 = sld [smem:[%s8909_s0 + %s7514_s22]]   ;;  %s7518_s22 = smov 24  }
  0x26   :  { %s7691_s19 = sld [smem:[%s8909_s0 + %s7515_s28]]   ;;  %s7519_s28 = smov 25  }
  0x27   :  { %s7701_s30 = sld [smem:[%s8909_s0 + %s7517_s15]]   ;;  %s7521_s15 = smov 27  }
  0x29   :  { %8994 = sst [smem:[#allocation93_spill]] %s7676_s12 }
  0x2a   :  { %s7696_s12 = sld [smem:[%s8909_s0 + %s7516_s7]]   ;;  %s7520_s7 = smov 26  }
  0x2b   :  { %8996 = sst [smem:[#allocation95_spill]] %s7686_s27 }
  0x2c   :  { %8997 = sst [smem:[#allocation96_spill]] %s7691_s19 }
  0x2d   :  { %8999 = sst [smem:[#allocation98_spill]] %s7701_s30 }
  0x2e   :  { %s7706_s27 = sld [smem:[%s8909_s0 + %s7518_s22]]   ;;  %s7522_s22 = smov 28  }
  0x2f   :  { %s7711_s19 = sld [smem:[%s8909_s0 + %s7519_s28]]   ;;  %s7523_s28 = smov 29  }
  0x30   :  { %8998 = sst [smem:[#allocation97_spill]] %s7696_s12 }
  0x31   :  { %s7716_s12 = sld [smem:[%s8909_s0 + %s7520_s7]]   ;;  %s7524_s7 = smov 30  }
  0x32   :  { %s7721_s30 = sld [smem:[%s8909_s0 + %s7521_s15]]   ;;  %s7525_s15 = smov 31  }
  0x33   :  { %s7736_s4 = sld [smem:[%s8909_s0 + %s7524_s7]]   ;;  %s7528_s7 = smov 34  }
  0x34   :  { %9000 = sst [smem:[#allocation99_spill]] %s7706_s27 }
  0x35   :  { %9001 = sst [smem:[#allocation100_spill]] %s7711_s19 }
  0x36   :  { %s7726_s27 = sld [smem:[%s8909_s0 + %s7522_s22]]   ;;  %s7526_s22 = smov 32  }
  0x37   :  { %9002 = sst [smem:[#allocation101_spill]] %s7716_s12 }
  0x38   :  { %s7731_s19 = sld [smem:[%s8909_s0 + %s7523_s28]]   ;;  %s7527_s28 = smov 33  }
  0x39   :  { %9004 = sst [smem:[#allocation103_spill]] %s7736_s4 }
  0x3a   :  { %s7741_s20 = sld [smem:[%s8909_s0 + %s7525_s15]]  }
  0x3b   :  { %s7746_s6 = sld [smem:[%s8909_s0 + %s7526_s22]]  }
  0x3c   :  { %s7751_s24 = sld [smem:[%s8909_s0 + %s7527_s28]]  }
  0x3d   :  { %s7756_s14 = sld [smem:[%s8909_s0 + %s7528_s7]]  }
  0x3e   :  { %9003 = sst [smem:[#allocation102_spill]] %s7731_s19 }
  0x40   :  { %9005 = sst [smem:[#allocation104_spill]] %s7741_s20 }
  0x41   :  { %9006 = sst [smem:[#allocation105_spill]] %s7746_s6 }
  0x43   :  { %9007 = sst [smem:[#allocation106_spill]] %s7756_s14 }
  0x44   :  { %74 = vsyncpa [#allocation5], 0 }
  0x45   :  { %75 = vsyncpa [#allocation8], 0 }
  0x46   :  { %76 = vsyncpa [#allocation11], 0 }
  0x47   :  { %77 = vsyncpa [#allocation14], 0 }
  0x48   :  { %78 = vsyncpa [#allocation17], 0 }
  0x49   :  { %79 = vsyncpa [#allocation20], 0 }
  0x4a   :  { %81 = vsyncpa [#allocation20 + $0x1], 0 }
  0x4b   :  { %82 = vsyncpa [#allocation23], 0 }
  0x4c   :  { %84 = vsyncpa [#allocation23 + $0x1], 0 }
  0x4d   :  { %85 = vsyncpa [#allocation26], 0 }
  0x4e   :  { %87 = vsyncpa [#allocation26 + $0x1], 0 }
  0x4f   :  { %88 = vsyncpa [#allocation29], 0 }
  0x50   :  { %90 = vsyncpa [#allocation29 + $0x1], 0 }
  0x51   :  { %91 = vsyncpa [#allocation32], 0 }
  0x52   :  { %93 = vsyncpa [#allocation32 + $0x1], 0 }
  0x53   :  { %94 = vsyncpa [#allocation35], 0 }
  0x54   :  { %96 = vsyncpa [#allocation35 + $0x1], 0 }
  0x55   :  { %97 = vsyncpa [#allocation38], 0 }
  0x56   :  { %99 = vsyncpa [#allocation38 + $0x1], 0 }
  0x57   :  { %100 = vsyncpa [#allocation41], 0 }
  0x58   :  { %102 = vsyncpa [#allocation41 + $0x1], 0 }
  0x59   :  { %103 = vsyncpa [#allocation44], 0 }
  0x5a   :  { %105 = vsyncpa [#allocation44 + $0x1], 0 }
  0x5b   :  { %106 = vsyncpa [#allocation47], 0 }
  0x5c   :  { %107 = vsyncpa [#allocation50], 0 }
  0x5d   :  { %108 = vsyncpa [#allocation53], 0 }
  0x5e   :  { %109 = vsyncpa [#allocation56], 0 }
  0x5f   :  { %110 = vsyncpa [#allocation6], 0  ;;  %s7758_s0 = smov 0   ;;  %s7760_s15 = smov 0  }
  0x60   :  { %s7762_s16 = smov 0   ;;  %s7764_s18 = smov 0  }
  0x61 LB: > { %s9008_s20 = sld [smem:[#allocation104_spill]]  ;;  %s9009_s19 = sld [smem:[#allocation102_spill]]  ;;  %s7489_s16 = sphi %s7762_s16, %s9100_s16   ;;  %s7485_s15 = sphi %s7760_s15, %s9099_s15   ;;  %s7481_s0 = sphi %s7758_s0, %s9097_s0   ;;  %s7493_s18 = sphi %s7764_s18, %s9096_s18  }
  0x62   : > { %s9010_s17 = sld [smem:[#allocation81_spill]]  ;;  %s9011_s13 = sld [smem:[#allocation80_spill]] }
  0x63   : > { %s9012_s12 = sld [smem:[#allocation101_spill]]  ;;  %s9013_s8 = sld [smem:[#allocation83_spill]] }
  0x64   : > { %s9014_s6 = sld [smem:[#allocation105_spill]]  ;;  %s9015_s4 = sld [smem:[#allocation103_spill]] }
  0x65   : > { %s9016_s5 = sld [smem:[#allocation78_spill]]  ;;  %s9017_s9 = sld [smem:[#allocation79_spill]] }
  0x66   : > { %s9018_s3 = sld [smem:[#allocation82_spill]]  ;;  %9019 = sst [smem:[#allocation107_spill]] %s7485_s15 }
  0x67   : > { %s7777_s22 = sadd.s32 4294967295, %s7493_s18   ;;  %s7780_s23 = sadd.s32 1, %s7493_s18  }
  0x68   : > { %9020 = sst [smem:[#allocation108_spill]] %s7777_s22  ;;  %s309_s26 = ssub.s32 %s7493_s18, %s7780_s23 }
  0x69   : > { %9021 = sst [smem:[#allocation109_spill]] %s7780_s23  ;;  %s312_s28 = sadd.s32 1, %s7489_s16 }
  0x6a   : > { %p310_p0 = scmp.eq.s32.totalorder %s309_s26, 0  ;;  %p319_p1 = scmp.ne.s32.totalorder %s7489_s16, %s7485_s15 }
  0x6b   : > { %p320_p2 = scmp.eq.s32.totalorder %s7493_s18, 0  ;;  %p325_p3 = scmp.ne.s32.totalorder %s7485_s15, %s7481_s0 }
  0x6c   : > { %s7790_s1 = scalar_select %p310_p0, %s7489_s16, %s312_s28  }
  0x6d   : > { %p7792_p4 = por %p320_p2, %p319_p1  ;;  %p8932_p5 = scmp.eq.s32.totalorder %s7777_s22, 0 }
  0x6e   : > { %9022 = sst [smem:[#allocation110_spill]] %s7790_s1  ;;  %p5312_p6 = scmp.ge.s32.totalorder %s7493_s18, 1 }
  0x6f   : > { %s9023_s2 = scalar_select %p7792_p4, 1, 0 }
  0x70   : > { %p941_p7 = scmp.lt.s32.totalorder %s7493_s18, 3  ;;  %p7801_p8 = por %p8932_p5, %p325_p3 }
  0x71   : > { %s7529_s11 = smov [#allocation7]   ;;  %s7530_s28 = smov [#allocation10]  }
  0x72   : > { %s9024_s7 = scalar_select %p7801_p8, 1, 0 }
  0x73   : > { %p7806_p10 = pnand %p5312_p6, %p941_p7  ;;  %s964_s0 = sshll.u32 %s7529_s11, 4  ;;  %s7812_s0 = int_to_ptr.vmem [resolvable:$true] %s964_s0 }
  0x74   : > { %9025 = sst [smem:[#allocation111_spill]] %s9024_s7  ;;  %s989_s1 = sshll.u32 %s7530_s28, 4  ;;  %s7820_s1 = int_to_ptr.vmem [resolvable:$true] %s989_s1 }
  0x75   : > { %s9026_s10 = scalar_select %p7806_p10, 1, 0 }
  0x76   : > { %p6205_p11 = pneg %p7806_p10  ;;  %s7531_s23 = smov [#allocation13]  }
  0x77   : > { %s7822_s14 = sshll.u32 %s7531_s23, 4  ;;  %s6405_s7 = scalar_lea.hbm %s9017_s9, 256  ;;  %s1012_s14 = int_to_ptr.vmem [resolvable:$true] %s7822_s14 }
  0x78   : > { %p7816_p12 = pnand %p6205_p11, %p8932_p5  ;;  %p6406_p13 = scmp.ne.s32.totalorder %s9017_s9, %s6405_s7 }
  0x79   : > { %p6412_p3 = scmp.lt.u32.totalorder %s6405_s7, %s9017_s9 }
  0x7a   : > { %p7828_p0 = pneg %p7816_p12 }
  0x7c   : > { %p6408_p1 = pnand %p7828_p0, %p6406_p13 }
  0x7e   : > { %p6409_p2 = pneg %p6408_p1 }
  0x80   : > { %p6414_p6 = pnand %p6412_p3, %p6409_p2 }
  0x82   : > { %6417 = shalt.err (!%p6414_p6)
}
  0x83   : > { %s6418_s23 = scalar_lea.vmem %s7812_s0, 256  ;;  %p6426_p5 = scmp.lt.s32.totalorder %s7812_s0, %s7812_s0 }
  0x84   : > { %p6419_p7 = scmp.ne.s32.totalorder %s7812_s0, %s6418_s23  ;;  %p6427_p8 = scmp.lt.s32.totalorder %s6418_s23, %s6418_s23 }
  0x86   : > { %p6421_p11 = pnand %p6419_p7, %p7828_p0  ;;  %p6428_p10 = por %p6427_p8, %p6426_p5 }
  0x88   : > { %p6422_p9 = pneg %p6421_p11 }
  0x8a   : > { %p6429_p4 = pnand %p6428_p10, %p6422_p9 }
  0x8c   : > { %6432 = shalt.err (!%p6429_p4)
}
  0x8d   : > { %s8940_s28 = smov 128   ;;  %s8942_s7 = smov 8  }
  0x8e   : > { %6211 = dma.hbm_to_vmem [thread:$0]  (!%p7816_p12), %s9017_s9, 256, %s7812_s0, [#allocation8], %s8940_s28, %s8940_s28, %s8942_s7  }
  0x8f   : > { %s6433_s15 = scalar_lea.hbm %s9010_s17, 16 }
  0x90   : > { %p6434_p13 = scmp.ne.s32.totalorder %s9010_s17, %s6433_s15  ;;  %p6440_p4 = scmp.lt.u32.totalorder %s6433_s15, %s9010_s17 }
  0x92   : > { %p6436_p5 = pnand %p6434_p13, %p7828_p0 }
  0x94   : > { %p6437_p8 = pneg %p6436_p5 }
  0x96   : > { %p6442_p9 = pnand %p6440_p4, %p6437_p8 }
  0x98   : > { %6445 = shalt.err (!%p6442_p9)
}
  0x99   : > { %s6446_s23 = scalar_lea.vmem %s7820_s1, 16  ;;  %s6453_s22 = scalar_lea.vmem %s7820_s1, 32 }
  0x9a   : > { %p6447_p10 = scmp.ne.s32.totalorder %s7820_s1, %s6446_s23  ;;  %p6454_p3 = scmp.lt.s32.totalorder %s7820_s1, %s7820_s1 }
  0x9b   : > { %p6455_p6 = scmp.lt.s32.totalorder %s6453_s22, %s6446_s23 }
  0x9c   : > { %p6449_p1 = pnand %p6447_p10, %p7828_p0 }
  0x9d   : > { %p6456_p7 = por %p6455_p6, %p6454_p3 }
  0x9e   : > { %p6450_p2 = pneg %p6449_p1 }
  0xa0   : > { %p6457_p11 = pnand %p6456_p7, %p6450_p2 }
  0xa2   : > { %6460 = shalt.err (!%p6457_p11)
}
  0xa3   : > { %6217 = dma.hbm_to_vmem [thread:$0]  (!%p7816_p12), %s9010_s17, 16, %s7820_s1, [#allocation11]  }
  0xa4   : > { %s6461_s15 = scalar_lea.hbm %s7611_s25, 16 }
  0xa5   : > { %p6462_p13 = scmp.ne.s32.totalorder %s7611_s25, %s6461_s15  ;;  %p6468_p4 = scmp.lt.u32.totalorder %s6461_s15, %s7611_s25 }
  0xa7   : > { %p6464_p5 = pnand %p6462_p13, %p7828_p0 }
  0xa9   : > { %p6465_p8 = pneg %p6464_p5 }
  0xab   : > { %p6470_p9 = pnand %p6468_p4, %p6465_p8 }
  0xad   : > { %6473 = shalt.err (!%p6470_p9)
}
  0xae   : > { %s6474_s22 = scalar_lea.vmem %s1012_s14, 16  ;;  %s6481_s0 = scalar_lea.vmem %s1012_s14, 32 }
  0xaf   : > { %p6475_p10 = scmp.ne.s32.totalorder %s1012_s14, %s6474_s22  ;;  %p6482_p3 = scmp.lt.s32.totalorder %s1012_s14, %s1012_s14 }
  0xb0   : > { %p6483_p6 = scmp.lt.s32.totalorder %s6481_s0, %s6474_s22 }
  0xb1   : > { %p6477_p1 = pnand %p6475_p10, %p7828_p0 }
  0xb2   : > { %p6484_p7 = por %p6483_p6, %p6482_p3 }
  0xb3   : > { %p6478_p2 = pneg %p6477_p1 }
  0xb5   : > { %p6485_p11 = pnand %p6484_p7, %p6478_p2 }
  0xb7   : > { %6488 = shalt.err (!%p6485_p11)
}
  0xb8   : > { %6223 = dma.hbm_to_vmem [thread:$0]  (!%p7816_p12), %s7611_s25, 16, %s1012_s14, [#allocation14]  }
  0xb9   : > { %s7534_s1 = smov [#allocation16]   ;;  %s7535_s15 = smov [#allocation46]  }
  0xba   : > { %s1034_s23 = sshll.u32 %s7534_s1, 4  ;;  %s1073_s28 = sshll.u32 %s7535_s15, 4  ;;  %s1035_s23 = int_to_ptr.vmem [resolvable:$true] %s1034_s23  ;;  %s1074_s28 = int_to_ptr.vmem [resolvable:$true] %s1073_s28 }
  0xbb   : > { %s6489_s7 = scalar_lea.hbm %s9018_s3, 128 }
  0xbc   : > { %p6490_p13 = scmp.ne.s32.totalorder %s9018_s3, %s6489_s7  ;;  %p6496_p4 = scmp.lt.u32.totalorder %s6489_s7, %s9018_s3 }
  0xbe   : > { %p6492_p5 = pnand %p6490_p13, %p7828_p0 }
  0xc0   : > { %p6493_p8 = pneg %p6492_p5 }
  0xc2   : > { %p6498_p9 = pnand %p6496_p4, %p6493_p8 }
  0xc4   : > { %6501 = shalt.err (!%p6498_p9)
}
  0xc5   : > { %s6502_s22 = scalar_lea.vmem %s1035_s23, 128  ;;  %p6510_p3 = scmp.lt.s32.totalorder %s1035_s23, %s1035_s23 }
  0xc6   : > { %p6503_p10 = scmp.ne.s32.totalorder %s1035_s23, %s6502_s22  ;;  %p6511_p6 = scmp.lt.s32.totalorder %s6502_s22, %s6502_s22 }
  0xc8   : > { %p6505_p1 = pnand %p6503_p10, %p7828_p0  ;;  %p6512_p7 = por %p6511_p6, %p6510_p3 }
  0xca   : > { %p6506_p2 = pneg %p6505_p1 }
  0xcc   : > { %p6513_p11 = pnand %p6512_p7, %p6506_p2 }
  0xce   : > { %6516 = shalt.err (!%p6513_p11)
}
  0xcf   : > { %s8944_s14 = smov 64   ;;  %s8945_s7 = smov 4  }
  0xd0   : > { %6229 = dma.hbm_to_vmem [thread:$0]  (!%p7816_p12), %s9018_s3, 128, %s1035_s23, [#allocation17], %s8944_s14, %s8944_s14, %s8945_s7  }
  0xd1   : > { %s6517_s0 = scalar_lea.hbm %s7721_s30, 512 }
  0xd2   : > { %p6518_p13 = scmp.ne.s32.totalorder %s7721_s30, %s6517_s0  ;;  %p6524_p4 = scmp.lt.u32.totalorder %s6517_s0, %s7721_s30 }
  0xd4   : > { %p6520_p5 = pnand %p6518_p13, %p7828_p0 }
  0xd6   : > { %p6521_p8 = pneg %p6520_p5 }
  0xd8   : > { %p6526_p9 = pnand %p6524_p4, %p6521_p8 }
  0xda   : > { %6529 = shalt.err (!%p6526_p9)
}
  0xdb   : > { %s6530_s1 = scalar_lea.vmem %s1074_s28, 512  ;;  %p6538_p3 = scmp.lt.s32.totalorder %s1074_s28, %s1074_s28 }
  0xdc   : > { %p6531_p10 = scmp.ne.s32.totalorder %s1074_s28, %s6530_s1  ;;  %p6539_p6 = scmp.lt.s32.totalorder %s6530_s1, %s6530_s1 }
  0xde   : > { %p6533_p1 = pnand %p6531_p10, %p7828_p0  ;;  %p6540_p7 = por %p6539_p6, %p6538_p3 }
  0xe0   : > { %p6534_p2 = pneg %p6533_p1 }
  0xe2   : > { %p6541_p11 = pnand %p6540_p7, %p6534_p2 }
  0xe4   : > { %6544 = shalt.err (!%p6541_p11)
}
  0xe5   : > { %s9029_s23 = smov 8   ;;  %s9030_s15 = smov 128  }
  0xe6   : > { %6238 = dma.hbm_to_vmem [thread:$0]  (!%p7816_p12), %s7721_s30, 512, %s1074_s28, [#allocation47], %s9030_s15, %s9030_s15, %s9029_s23  }
  0xe7   : > { %s7538_s22 = smov [#allocation49]   ;;  %s7539_s14 = smov [#allocation52]  }
  0xe8   : > { %s1100_s0 = sshll.u32 %s7538_s22, 4  ;;  %s1124_s7 = sshll.u32 %s7539_s14, 4  ;;  %s1101_s0 = int_to_ptr.vmem [resolvable:$true] %s1100_s0  ;;  %s1125_s7 = int_to_ptr.vmem [resolvable:$true] %s1124_s7 }
  0xe9   : > { %s6545_s1 = scalar_lea.hbm %s9009_s19, 16 }
  0xea   : > { %p6546_p13 = scmp.ne.s32.totalorder %s9009_s19, %s6545_s1  ;;  %p6552_p4 = scmp.lt.u32.totalorder %s6545_s1, %s9009_s19 }
  0xec   : > { %p6548_p5 = pnand %p6546_p13, %p7828_p0 }
  0xee   : > { %p6549_p8 = pneg %p6548_p5 }
  0xf0   : > { %p6554_p9 = pnand %p6552_p4, %p6549_p8 }
  0xf2   : > { %6557 = shalt.err (!%p6554_p9)
}
  0xf3   : > { %s6558_s3 = scalar_lea.vmem %s1101_s0, 16  ;;  %s6565_s28 = scalar_lea.vmem %s1101_s0, 32 }
  0xf4   : > { %p6559_p10 = scmp.ne.s32.totalorder %s1101_s0, %s6558_s3  ;;  %p6566_p3 = scmp.lt.s32.totalorder %s1101_s0, %s1101_s0 }
  0xf5   : > { %p6567_p6 = scmp.lt.s32.totalorder %s6565_s28, %s6558_s3 }
  0xf6   : > { %p6561_p1 = pnand %p6559_p10, %p7828_p0 }
  0xf7   : > { %p6568_p7 = por %p6567_p6, %p6566_p3 }
  0xf8   : > { %p6562_p2 = pneg %p6561_p1 }
  0xfa   : > { %p6569_p11 = pnand %p6568_p7, %p6562_p2 }
  0xfc   : > { %6572 = shalt.err (!%p6569_p11)
}
  0xfd   : > { %6244 = dma.hbm_to_vmem [thread:$0]  (!%p7816_p12), %s9009_s19, 16, %s1101_s0, [#allocation50]  }
  0xfe   : > { %s6573_s14 = scalar_lea.hbm %s9008_s20, 16 }
  0xff   : > { %p6574_p13 = scmp.ne.s32.totalorder %s9008_s20, %s6573_s14  ;;  %p6580_p4 = scmp.lt.u32.totalorder %s6573_s14, %s9008_s20 }
 0x101   : > { %p6576_p5 = pnand %p6574_p13, %p7828_p0 }
 0x103   : > { %p6577_p8 = pneg %p6576_p5 }
 0x105   : > { %p6582_p9 = pnand %p6580_p4, %p6577_p8 }
 0x107   : > { %6585 = shalt.err (!%p6582_p9)
}
 0x108   : > { %s6586_s3 = scalar_lea.vmem %s1125_s7, 16  ;;  %s6593_s22 = scalar_lea.vmem %s1125_s7, 32 }
 0x109   : > { %p6587_p10 = scmp.ne.s32.totalorder %s1125_s7, %s6586_s3  ;;  %p6594_p3 = scmp.lt.s32.totalorder %s1125_s7, %s1125_s7 }
 0x10a   : > { %p6595_p6 = scmp.lt.s32.totalorder %s6593_s22, %s6586_s3 }
 0x10b   : > { %p6589_p1 = pnand %p6587_p10, %p7828_p0 }
 0x10c   : > { %p6596_p7 = por %p6595_p6, %p6594_p3 }
 0x10d   : > { %p6590_p2 = pneg %p6589_p1 }
 0x10f   : > { %p6597_p11 = pnand %p6596_p7, %p6590_p2 }
 0x111   : > { %6600 = shalt.err (!%p6597_p11)
}
 0x112   : > { %6250 = dma.hbm_to_vmem [thread:$0]  (!%p7816_p12), %s9008_s20, 16, %s1125_s7, [#allocation53]  }
 0x113   : > { %s7540_s0 = smov [#allocation4]   ;;  %s7541_s28 = smov [#allocation9]  }
 0x114   : > { %s954_s1 = sshll.u32 %s7540_s0, 4  ;;  %s978_s14 = sshll.u32 %s7541_s28, 4  ;;  %s955_s1 = int_to_ptr.vmem [resolvable:$true] %s954_s1  ;;  %s979_s14 = int_to_ptr.vmem [resolvable:$true] %s978_s14 }
 0x115   : > { %s6601_s9 = scalar_lea.hbm %s9016_s5, 128 }
 0x116   : > { %p6602_p13 = scmp.ne.s32.totalorder %s9016_s5, %s6601_s9  ;;  %p6608_p4 = scmp.lt.u32.totalorder %s6601_s9, %s9016_s5 }
 0x118   : > { %p6604_p5 = pnand %p6602_p13, %p7828_p0 }
 0x11a   : > { %p6605_p8 = pneg %p6604_p5 }
 0x11c   : > { %p6610_p9 = pnand %p6608_p4, %p6605_p8 }
 0x11e   : > { %6613 = shalt.err (!%p6610_p9)
}
 0x11f   : > { %s6614_s3 = scalar_lea.vmem %s955_s1, 128  ;;  %p6622_p3 = scmp.lt.s32.totalorder %s955_s1, %s955_s1 }
 0x120   : > { %p6615_p10 = scmp.ne.s32.totalorder %s955_s1, %s6614_s3  ;;  %p6623_p6 = scmp.lt.s32.totalorder %s6614_s3, %s6614_s3 }
 0x122   : > { %p6617_p1 = pnand %p6615_p10, %p7828_p0  ;;  %p6624_p7 = por %p6623_p6, %p6622_p3 }
 0x124   : > { %p6618_p2 = pneg %p6617_p1 }
 0x126   : > { %p6625_p11 = pnand %p6624_p7, %p6618_p2 }
 0x128   : > { %6628 = shalt.err (!%p6625_p11)
}
 0x129   : > { %6208 = dma.hbm_to_vmem [thread:$0]  (!%p7816_p12), %s9016_s5, 128, %s955_s1, [#allocation5]  }
 0x12a   : > { %s6629_s9 = scalar_lea.hbm %s9011_s13, 64 }
 0x12b   : > { %p6630_p13 = scmp.ne.s32.totalorder %s9011_s13, %s6629_s9  ;;  %p6636_p4 = scmp.lt.u32.totalorder %s6629_s9, %s9011_s13 }
 0x12d   : > { %p6632_p5 = pnand %p6630_p13, %p7828_p0 }
 0x12f   : > { %p6633_p8 = pneg %p6632_p5 }
 0x131   : > { %p6638_p9 = pnand %p6636_p4, %p6633_p8 }
 0x133   : > { %6641 = shalt.err (!%p6638_p9)
}
 0x134   : > { %s6642_s7 = scalar_lea.vmem %s979_s14, 64  ;;  %p6650_p3 = scmp.lt.s32.totalorder %s979_s14, %s979_s14 }
 0x135   : > { %p6643_p10 = scmp.ne.s32.totalorder %s979_s14, %s6642_s7  ;;  %p6651_p6 = scmp.lt.s32.totalorder %s6642_s7, %s6642_s7 }
 0x137   : > { %p6645_p1 = pnand %p6643_p10, %p7828_p0  ;;  %p6652_p7 = por %p6651_p6, %p6650_p3 }
 0x139   : > { %p6646_p2 = pneg %p6645_p1 }
 0x13b   : > { %p6653_p11 = pnand %p6652_p7, %p6646_p2 }
 0x13d   : > { %6656 = shalt.err (!%p6653_p11)
}
 0x13e   : > { %6214 = dma.hbm_to_vmem [thread:$0]  (!%p7816_p12), %s9011_s13, 64, %s979_s14, [#allocation8]  }
 0x13f   : > { %s7542_s22 = smov [#allocation12]   ;;  %s7543_s1 = smov [#allocation15]  }
 0x140   : > { %s1000_s0 = sshll.u32 %s7542_s22, 4  ;;  %s1021_s28 = sshll.u32 %s7543_s1, 4  ;;  %s1001_s0 = int_to_ptr.vmem [resolvable:$true] %s1000_s0  ;;  %s1022_s28 = int_to_ptr.vmem [resolvable:$true] %s1021_s28 }
 0x141   : > { %s6657_s3 = scalar_lea.hbm %s7606_s21, 64 }
 0x142   : > { %p6658_p13 = scmp.ne.s32.totalorder %s7606_s21, %s6657_s3  ;;  %p6664_p4 = scmp.lt.u32.totalorder %s6657_s3, %s7606_s21 }
 0x144   : > { %p6660_p5 = pnand %p6658_p13, %p7828_p0 }
 0x146   : > { %p6661_p8 = pneg %p6660_p5 }
 0x148   : > { %p6666_p9 = pnand %p6664_p4, %p6661_p8 }
 0x14a   : > { %6669 = shalt.err (!%p6666_p9)
}
 0x14b   : > { %s6670_s9 = scalar_lea.vmem %s1001_s0, 64  ;;  %p6678_p3 = scmp.lt.s32.totalorder %s1001_s0, %s1001_s0 }
 0x14c   : > { %p6671_p10 = scmp.ne.s32.totalorder %s1001_s0, %s6670_s9  ;;  %p6679_p6 = scmp.lt.s32.totalorder %s6670_s9, %s6670_s9 }
 0x14e   : > { %p6673_p1 = pnand %p6671_p10, %p7828_p0  ;;  %p6680_p7 = por %p6679_p6, %p6678_p3 }
 0x150   : > { %p6674_p2 = pneg %p6673_p1 }
 0x152   : > { %p6681_p11 = pnand %p6680_p7, %p6674_p2 }
 0x154   : > { %6684 = shalt.err (!%p6681_p11)
}
 0x155   : > { %6220 = dma.hbm_to_vmem [thread:$0]  (!%p7816_p12), %s7606_s21, 64, %s1001_s0, [#allocation11]  }
 0x156   : > { %s6685_s14 = scalar_lea.hbm %s7616_s29, 128 }
 0x157   : > { %p6686_p13 = scmp.ne.s32.totalorder %s7616_s29, %s6685_s14  ;;  %p6692_p4 = scmp.lt.u32.totalorder %s6685_s14, %s7616_s29 }
 0x159   : > { %p6688_p5 = pnand %p6686_p13, %p7828_p0 }
 0x15b   : > { %p6689_p8 = pneg %p6688_p5 }
 0x15d   : > { %p6694_p9 = pnand %p6692_p4, %p6689_p8 }
 0x15f   : > { %6697 = shalt.err (!%p6694_p9)
}
 0x160   : > { %s6698_s7 = scalar_lea.vmem %s1022_s28, 128  ;;  %p6706_p3 = scmp.lt.s32.totalorder %s1022_s28, %s1022_s28 }
 0x161   : > { %p6699_p10 = scmp.ne.s32.totalorder %s1022_s28, %s6698_s7  ;;  %p6707_p6 = scmp.lt.s32.totalorder %s6698_s7, %s6698_s7 }
 0x163   : > { %p6701_p1 = pnand %p6699_p10, %p7828_p0  ;;  %p6708_p7 = por %p6707_p6, %p6706_p3 }
 0x165   : > { %p6702_p2 = pneg %p6701_p1 }
 0x167   : > { %p6709_p11 = pnand %p6708_p7, %p6702_p2 }
 0x169   : > { %6712 = shalt.err (!%p6709_p11)
}
 0x16a   : > { %s9031_s22 = smov 4   ;;  %s9032_s0 = smov 64  }
 0x16b   : > { %6226 = dma.hbm_to_vmem [thread:$0]  (!%p7816_p12), %s7616_s29, 128, %s1022_s28, [#allocation14], %s9032_s0, %s9032_s0, %s9031_s22  }
 0x16c   : > { %s7544_s1 = smov [#allocation18]   ;;  %s7545_s9 = smov [#allocation45]  }
 0x16d   : > { %s1047_s3 = sshll.u32 %s7544_s1, 4  ;;  %s1060_s14 = sshll.u32 %s7545_s9, 4  ;;  %s1048_s3 = int_to_ptr.vmem [resolvable:$true] %s1047_s3  ;;  %s1061_s14 = int_to_ptr.vmem [resolvable:$true] %s1060_s14 }
 0x16e   : > { %s6713_s7 = scalar_lea.hbm %s9013_s8, 512 }
 0x16f   : > { %p6714_p13 = scmp.ne.s32.totalorder %s9013_s8, %s6713_s7  ;;  %p6720_p4 = scmp.lt.u32.totalorder %s6713_s7, %s9013_s8 }
 0x171   : > { %p6716_p5 = pnand %p6714_p13, %p7828_p0 }
 0x173   : > { %p6717_p8 = pneg %p6716_p5 }
 0x175   : > { %p6722_p9 = pnand %p6720_p4, %p6717_p8 }
 0x177   : > { %6725 = shalt.err (!%p6722_p9)
}
 0x178   : > { %s6726_s5 = scalar_lea.vmem %s1048_s3, 512  ;;  %p6734_p3 = scmp.lt.s32.totalorder %s1048_s3, %s1048_s3 }
 0x179   : > { %p6727_p10 = scmp.ne.s32.totalorder %s1048_s3, %s6726_s5  ;;  %p6735_p6 = scmp.lt.s32.totalorder %s6726_s5, %s6726_s5 }
 0x17b   : > { %p6729_p1 = pnand %p6727_p10, %p7828_p0  ;;  %p6736_p7 = por %p6735_p6, %p6734_p3 }
 0x17d   : > { %p6730_p2 = pneg %p6729_p1 }
 0x17f   : > { %p6737_p11 = pnand %p6736_p7, %p6730_p2 }
 0x181   : > { %6740 = shalt.err (!%p6737_p11)
}
 0x182   : > { %6232 = dma.hbm_to_vmem [thread:$0]  (!%p7816_p12), %s9013_s8, 512, %s1048_s3, [#allocation17], %s9030_s15, %s9030_s15, %s9029_s23  }
 0x183   : > { %s6741_s28 = scalar_lea.hbm %s9012_s12, 512 }
 0x184   : > { %p6742_p13 = scmp.ne.s32.totalorder %s9012_s12, %s6741_s28  ;;  %p6748_p4 = scmp.lt.u32.totalorder %s6741_s28, %s9012_s12 }
 0x186   : > { %p6744_p5 = pnand %p6742_p13, %p7828_p0 }
 0x188   : > { %p6745_p8 = pneg %p6744_p5 }
 0x18a   : > { %p6750_p9 = pnand %p6748_p4, %p6745_p8 }
 0x18c   : > { %6753 = shalt.err (!%p6750_p9)
}
 0x18d   : > { %s6754_s5 = scalar_lea.vmem %s1061_s14, 512  ;;  %p6762_p3 = scmp.lt.s32.totalorder %s1061_s14, %s1061_s14 }
 0x18e   : > { %p6755_p10 = scmp.ne.s32.totalorder %s1061_s14, %s6754_s5  ;;  %p6763_p6 = scmp.lt.s32.totalorder %s6754_s5, %s6754_s5 }
 0x190   : > { %p6757_p1 = pnand %p6755_p10, %p7828_p0  ;;  %p6764_p7 = por %p6763_p6, %p6762_p3 }
 0x192   : > { %p6758_p2 = pneg %p6757_p1 }
 0x194   : > { %p6765_p11 = pnand %p6764_p7, %p6758_p2 }
 0x196   : > { %6768 = shalt.err (!%p6765_p11)
}
 0x197   : > { %6235 = dma.hbm_to_vmem [thread:$0]  (!%p7816_p12), %s9012_s12, 512, %s1061_s14, [#allocation44], %s9030_s15, %s9030_s15, %s9029_s23  }
 0x198   : > { %s7546_s22 = smov [#allocation48]   ;;  %s7547_s1 = smov [#allocation51]  }
 0x199   : > { %s1086_s0 = sshll.u32 %s7546_s22, 4  ;;  %s1110_s3 = sshll.u32 %s7547_s1, 4  ;;  %s1087_s0 = int_to_ptr.vmem [resolvable:$true] %s1086_s0  ;;  %s1111_s3 = int_to_ptr.vmem [resolvable:$true] %s1110_s3 }
 0x19a   : > { %s6769_s9 = scalar_lea.hbm %s7726_s27, 512 }
 0x19b   : > { %p6770_p13 = scmp.ne.s32.totalorder %s7726_s27, %s6769_s9  ;;  %p6776_p4 = scmp.lt.u32.totalorder %s6769_s9, %s7726_s27 }
 0x19d   : > { %p6772_p5 = pnand %p6770_p13, %p7828_p0 }
 0x19f   : > { %p6773_p8 = pneg %p6772_p5 }
 0x1a1   : > { %p6778_p9 = pnand %p6776_p4, %p6773_p8 }
 0x1a3   : > { %6781 = shalt.err (!%p6778_p9)
}
 0x1a4   : > { %s6782_s7 = scalar_lea.vmem %s1087_s0, 512  ;;  %p6790_p3 = scmp.lt.s32.totalorder %s1087_s0, %s1087_s0 }
 0x1a5   : > { %p6783_p10 = scmp.ne.s32.totalorder %s1087_s0, %s6782_s7  ;;  %p6791_p6 = scmp.lt.s32.totalorder %s6782_s7, %s6782_s7 }
 0x1a7   : > { %p6785_p1 = pnand %p6783_p10, %p7828_p0  ;;  %p6792_p7 = por %p6791_p6, %p6790_p3 }
 0x1a9   : > { %p6786_p2 = pneg %p6785_p1 }
 0x1ab   : > { %p6793_p11 = pnand %p6792_p7, %p6786_p2 }
 0x1ad   : > { %6796 = shalt.err (!%p6793_p11)
}
 0x1ae   : > { %6241 = dma.hbm_to_vmem [thread:$0]  (!%p7816_p12), %s7726_s27, 512, %s1087_s0, [#allocation47], %s9030_s15, %s9030_s15, %s9029_s23  }
 0x1af   : > { %s6797_s14 = scalar_lea.hbm %s9015_s4, 1024 }
 0x1b0   : > { %p6798_p13 = scmp.ne.s32.totalorder %s9015_s4, %s6797_s14  ;;  %p6804_p4 = scmp.lt.u32.totalorder %s6797_s14, %s9015_s4 }
 0x1b2   : > { %p6800_p5 = pnand %p6798_p13, %p7828_p0 }
 0x1b4   : > { %p6801_p8 = pneg %p6800_p5 }
 0x1b6   : > { %p6806_p9 = pnand %p6804_p4, %p6801_p8 }
 0x1b8   : > { %6809 = shalt.err (!%p6806_p9)
}
 0x1b9   : > { %s6810_s28 = scalar_lea.vmem %s1111_s3, 1024  ;;  %p6818_p3 = scmp.lt.s32.totalorder %s1111_s3, %s1111_s3 }
 0x1ba   : > { %p6811_p10 = scmp.ne.s32.totalorder %s1111_s3, %s6810_s28  ;;  %p6819_p6 = scmp.lt.s32.totalorder %s6810_s28, %s6810_s28 }
 0x1bc   : > { %p6813_p1 = pnand %p6811_p10, %p7828_p0  ;;  %p6820_p7 = por %p6819_p6, %p6818_p3 }
 0x1be   : > { %p6814_p2 = pneg %p6813_p1 }
 0x1c0   : > { %p6821_p11 = pnand %p6820_p7, %p6814_p2 }
 0x1c2   : > { %6824 = shalt.err (!%p6821_p11)
}
 0x1c3   : > { %6247 = dma.hbm_to_vmem [thread:$0]  (!%p7816_p12), %s9015_s4, 1024, %s1111_s3, [#allocation50], %s9030_s15, %s9030_s15, %s9029_s23  }
 0x1c4   : > { %s7548_s5 = smov [#allocation54]   ;;  %s7549_s0 = smov [#allocation55]  }
 0x1c5   : > { %s1134_s22 = sshll.u32 %s7548_s5, 4  ;;  %s1148_s1 = sshll.u32 %s7549_s0, 4  ;;  %s1135_s22 = int_to_ptr.vmem [resolvable:$true] %s1134_s22  ;;  %s1149_s1 = int_to_ptr.vmem [resolvable:$true] %s1148_s1 }
 0x1c6   : > { %s6825_s9 = scalar_lea.hbm %s9014_s6, 512 }
 0x1c7   : > { %p6826_p13 = scmp.ne.s32.totalorder %s9014_s6, %s6825_s9  ;;  %p6832_p4 = scmp.lt.u32.totalorder %s6825_s9, %s9014_s6 }
 0x1c9   : > { %p6828_p5 = pnand %p6826_p13, %p7828_p0 }
 0x1cb   : > { %p6829_p8 = pneg %p6828_p5 }
 0x1cd   : > { %p6834_p9 = pnand %p6832_p4, %p6829_p8 }
 0x1cf   : > { %6837 = shalt.err (!%p6834_p9)
}
 0x1d0   : > { %s6838_s7 = scalar_lea.vmem %s1135_s22, 512  ;;  %p6846_p3 = scmp.lt.s32.totalorder %s1135_s22, %s1135_s22 }
 0x1d1   : > { %p6839_p10 = scmp.ne.s32.totalorder %s1135_s22, %s6838_s7  ;;  %p6847_p6 = scmp.lt.s32.totalorder %s6838_s7, %s6838_s7 }
 0x1d3   : > { %p6841_p1 = pnand %p6839_p10, %p7828_p0  ;;  %p6848_p7 = por %p6847_p6, %p6846_p3 }
 0x1d5   : > { %p6842_p2 = pneg %p6841_p1 }
 0x1d7   : > { %p6849_p11 = pnand %p6848_p7, %p6842_p2 }
 0x1d9   : > { %6852 = shalt.err (!%p6849_p11)
}
 0x1da   : > { %6253 = dma.hbm_to_vmem [thread:$0]  (!%p7816_p12), %s9014_s6, 512, %s1135_s22, [#allocation53], %s9030_s15, %s9030_s15, %s9029_s23  }
 0x1db   : > { %s6853_s3 = scalar_lea.hbm %s7751_s24, 16 }
 0x1dc   : > { %p6854_p13 = scmp.ne.s32.totalorder %s7751_s24, %s6853_s3  ;;  %p6860_p4 = scmp.lt.u32.totalorder %s6853_s3, %s7751_s24 }
 0x1de   : > { %p6856_p5 = pnand %p6854_p13, %p7828_p0 }
 0x1e0   : > { %p6857_p8 = pneg %p6856_p5 }
 0x1e2   : > { %p6862_p9 = pnand %p6860_p4, %p6857_p8 }
 0x1e4   : > { %6865 = shalt.err (!%p6862_p9)
}
 0x1e5   : > { %s6866_s14 = scalar_lea.vmem %s1149_s1, 16  ;;  %s6873_s28 = scalar_lea.vmem %s1149_s1, 32 }
 0x1e6   : > { %p6867_p10 = scmp.ne.s32.totalorder %s1149_s1, %s6866_s14  ;;  %p6874_p3 = scmp.lt.s32.totalorder %s1149_s1, %s1149_s1 }
 0x1e7   : > { %p6875_p6 = scmp.lt.s32.totalorder %s6873_s28, %s6866_s14 }
 0x1e8   : > { %p6869_p1 = pnand %p6867_p10, %p7828_p0 }
 0x1e9   : > { %p6876_p7 = por %p6875_p6, %p6874_p3 }
 0x1ea   : > { %p6870_p2 = pneg %p6869_p1 }
 0x1ec   : > { %p6877_p11 = pnand %p6876_p7, %p6870_p2 }
 0x1ee   : > { %6880 = shalt.err (!%p6877_p11)
}
 0x1ef   : > { %6256 = dma.hbm_to_vmem [thread:$0]  (!%p7816_p12), %s7751_s24, 16, %s1149_s1, [#allocation56]  }
 0x1f0   : > { %p5330_p13 = scmp.ge.s32.totalorder %s7493_s18, 2 }
 0x1f1   : > { %s9033_s23 = sld [smem:[#allocation84_spill]] (!%p5330_p13)  ;;  %s8041_s11 = sand.u32 (!%p5330_p13), 1, %s7493_s18  }
 0x1f2   : > { %1155 = sbr.rel (%p5330_p13) target bundleno = 952 (0x3b8), region = 84  ;;  %s8044_s15 = sand.u32 (!%p5330_p13), 1, %s7489_s16  }
 0x1f3   : > { %s8047_s5 = sshll.u32 (!%p5330_p13), %s8044_s15, 5  ;;  %s8050_s26 = sshll.u32 (!%p5330_p13), %s7493_s18, 9 }
 0x1f4   : > { %s1163_s0 = scalar_lea.vmem (!%p5330_p13), [#allocation19], %s8047_s5  ;;  %p9034_p0 = scmp.ne.s32.totalorder (!%p5330_p13), %s9023_s2, 0 }
 0x1f5   : > { %s1170_s1 = sshll.u32 (!%p5330_p13), %s1163_s0, 4  ;;  %s8057_s1 = int_to_ptr.vmem [resolvable:$true] %s1170_s1 }
 0x1f7   : > { %s8054_s22 = scalar_lea.hbm (!%p5330_p13), %s9033_s23, %s8050_s26  ;;  %s6885_s3 = scalar_lea.hbm (!%p5330_p13), %s9033_s23, 1024 }
 0x1f8   : > { %s6881_s7 = scalar_lea.hbm (!%p5330_p13), %s8054_s22, 512  ;;  %p6886_p4 = scmp.lt.u32.totalorder (!%p5330_p13), %s8054_s22, %s9033_s23 }
 0x1f9   : > { %p6882_p12 = scmp.ne.s32.totalorder %s8054_s22, %s6881_s7  ;;  %p6887_p9 = scmp.lt.u32.totalorder %s6885_s3, %s6881_s7 }
 0x1fa   : > { %p6889_p1 = scmp.lt.u32.totalorder %s6881_s7, %s8054_s22 }
 0x1fb   : > { %p6883_p5 = pnand %p6882_p12, %p9034_p0  ;;  %p6888_p10 = por %p6887_p9, %p6886_p4 }
 0x1fd   : > { %p6884_p8 = pneg %p6883_p5  ;;  %p6890_p2 = por %p6889_p1, %p6888_p10 }
 0x1ff   : > { %p6891_p3 = pnand %p6890_p2, %p6884_p8 }
 0x201   : > { %6894 = shalt.err (!%p6891_p3)
}
 0x202   : > { %s6895_s14 = scalar_lea.vmem %s8057_s1, 512  ;;  %s7550_s28 = smov [#allocation19]  }
 0x203   : > { %p6896_p6 = scmp.ne.s32.totalorder %s8057_s1, %s6895_s14  ;;  %s6899_s0 = sshll.u32 %s7550_s28, 4  ;;  %s6900_s0 = int_to_ptr.vmem [resolvable:$false] %s6899_s0 }
 0x204   : > { %s6901_s9 = scalar_lea.vmem %s6900_s0, 1024  ;;  %p6902_p13 = scmp.lt.s32.totalorder %s8057_s1, %s6900_s0 }
 0x205   : > { %p6897_p7 = pnand %p6896_p6, %p9034_p0  ;;  %p6903_p12 = scmp.lt.s32.totalorder %s6901_s9, %s6895_s14 }
 0x207   : > { %p6898_p11 = pneg %p6897_p7  ;;  %p6904_p5 = por %p6903_p12, %p6902_p13 }
 0x209   : > { %p6905_p4 = pnand %p6904_p5, %p6898_p11 }
 0x20b   : > { %6908 = shalt.err (!%p6905_p4)
}
 0x20c   : > { %s7551_s7 = smov 128   ;;  %s9035_s3 = sld [smem:[#allocation86_spill]] }
 0x20d   : > { %s7552_s28 = smov 8   ;;  %s9036_s9 = scalar_lea.sflag [#allocation20], %s8041_s11 }
 0x20e   : > { %6133 = dma.hbm_to_vmem [thread:$0]  (%p9034_p0), %s8054_s22, 512, %s8057_s1, %s9036_s9, %s7551_s7, %s7551_s7, %s7552_s28  }
 0x20f   : > { %s1205_s0 = scalar_lea.vmem [#allocation22], %s8047_s5  ;;  %s8954_s6 = scalar_lea.sflag [#allocation23], %s8041_s11 }
 0x210   : > { %s1212_s4 = sshll.u32 %s1205_s0, 4  ;;  %s8087_s4 = int_to_ptr.vmem [resolvable:$true] %s1212_s4 }
 0x212   : > { %s8084_s14 = scalar_lea.hbm %s9035_s3, %s8050_s26  ;;  %s6913_s12 = scalar_lea.hbm %s9035_s3, 1024 }
 0x213   : > { %s6909_s8 = scalar_lea.hbm %s8084_s14, 512  ;;  %p6914_p1 = scmp.lt.u32.totalorder %s8084_s14, %s9035_s3 }
 0x214   : > { %p6910_p8 = scmp.ne.s32.totalorder %s8084_s14, %s6909_s8  ;;  %p6915_p2 = scmp.lt.u32.totalorder %s6913_s12, %s6909_s8 }
 0x215   : > { %p6917_p6 = scmp.lt.u32.totalorder %s6909_s8, %s8084_s14 }
 0x216   : > { %p6911_p9 = pnand %p6910_p8, %p9034_p0  ;;  %p6916_p3 = por %p6915_p2, %p6914_p1 }
 0x218   : > { %p6912_p10 = pneg %p6911_p9  ;;  %p6918_p7 = por %p6917_p6, %p6916_p3 }
 0x21a   : > { %p6919_p11 = pnand %p6918_p7, %p6912_p10 }
 0x21c   : > { %6922 = shalt.err (!%p6919_p11)
}
 0x21d   : > { %s6923_s22 = scalar_lea.vmem %s8087_s4, 512  ;;  %s7553_s1 = smov [#allocation22]  }
 0x21e   : > { %p6924_p13 = scmp.ne.s32.totalorder %s8087_s4, %s6923_s22  ;;  %s6927_s9 = sshll.u32 %s7553_s1, 4  ;;  %s6928_s9 = int_to_ptr.vmem [resolvable:$false] %s6927_s9 }
 0x21f   : > { %s6929_s0 = scalar_lea.vmem %s6928_s9, 1024  ;;  %p6930_p4 = scmp.lt.s32.totalorder %s8087_s4, %s6928_s9 }
 0x220   : > { %p6925_p12 = pnand %p6924_p13, %p9034_p0  ;;  %p6931_p8 = scmp.lt.s32.totalorder %s6929_s0, %s6923_s22 }
 0x222   : > { %p6926_p5 = pneg %p6925_p12  ;;  %p6932_p9 = por %p6931_p8, %p6930_p4 }
 0x224   : > { %p6933_p1 = pnand %p6932_p9, %p6926_p5 }
 0x226   : > { %6936 = shalt.err (!%p6933_p1)
}
 0x227   : > { %s9037_s8 = sld [smem:[#allocation88_spill]]  ;;  %s1247_s22 = scalar_lea.vmem [#allocation25], %s8047_s5 }
 0x228   : > { %6135 = dma.hbm_to_vmem [thread:$0]  (%p9034_p0), %s8084_s14, 512, %s8087_s4, %s8954_s6, %s7551_s7, %s7551_s7, %s7552_s28  }
 0x229   : > { %s1254_s1 = sshll.u32 %s1247_s22, 4  ;;  %s8956_s9 = scalar_lea.sflag [#allocation26], %s8041_s11  ;;  %s8117_s1 = int_to_ptr.vmem [resolvable:$true] %s1254_s1 }
 0x22d   : > { %s8114_s12 = scalar_lea.hbm %s9037_s8, %s8050_s26  ;;  %s6941_s3 = scalar_lea.hbm %s9037_s8, 1024 }
 0x22e   : > { %s6937_s0 = scalar_lea.hbm %s8114_s12, 512  ;;  %p6942_p6 = scmp.lt.u32.totalorder %s8114_s12, %s9037_s8 }
 0x22f   : > { %p6938_p10 = scmp.ne.s32.totalorder %s8114_s12, %s6937_s0  ;;  %p6943_p7 = scmp.lt.u32.totalorder %s6941_s3, %s6937_s0 }
 0x230   : > { %p6945_p13 = scmp.lt.u32.totalorder %s6937_s0, %s8114_s12 }
 0x231   : > { %p6939_p2 = pnand %p6938_p10, %p9034_p0  ;;  %p6944_p11 = por %p6943_p7, %p6942_p6 }
 0x233   : > { %p6940_p3 = pneg %p6939_p2  ;;  %p6946_p12 = por %p6945_p13, %p6944_p11 }
 0x235   : > { %p6947_p5 = pnand %p6946_p12, %p6940_p3 }
 0x237   : > { %6950 = shalt.err (!%p6947_p5)
}
 0x238   : > { %s6951_s4 = scalar_lea.vmem %s8117_s1, 512  ;;  %s7554_s14 = smov [#allocation25]  }
 0x239   : > { %p6952_p4 = scmp.ne.s32.totalorder %s8117_s1, %s6951_s4  ;;  %s6955_s22 = sshll.u32 %s7554_s14, 4  ;;  %s6956_s22 = int_to_ptr.vmem [resolvable:$false] %s6955_s22 }
 0x23a   : > { %s6957_s6 = scalar_lea.vmem %s6956_s22, 1024  ;;  %p6958_p1 = scmp.lt.s32.totalorder %s8117_s1, %s6956_s22 }
 0x23b   : > { %p6953_p8 = pnand %p6952_p4, %p9034_p0  ;;  %p6959_p10 = scmp.lt.s32.totalorder %s6957_s6, %s6951_s4 }
 0x23d   : > { %p6954_p9 = pneg %p6953_p8  ;;  %p6960_p2 = por %p6959_p10, %p6958_p1 }
 0x23f   : > { %p6961_p6 = pnand %p6960_p2, %p6954_p9 }
 0x241   : > { %6964 = shalt.err (!%p6961_p6)
}
 0x242   : > { %s9038_s3 = sld [smem:[#allocation90_spill]]  ;;  %s1285_s0 = scalar_lea.vmem [#allocation28], %s8047_s5 }
 0x243   : > { %6137 = dma.hbm_to_vmem [thread:$0]  (%p9034_p0), %s8114_s12, 512, %s8117_s1, %s8956_s9, %s7551_s7, %s7551_s7, %s7552_s28  }
 0x244   : > { %s1292_s4 = sshll.u32 %s1285_s0, 4  ;;  %s8958_s14 = scalar_lea.sflag [#allocation29], %s8041_s11  ;;  %s8147_s4 = int_to_ptr.vmem [resolvable:$true] %s1292_s4 }
 0x248   : > { %s8144_s6 = scalar_lea.hbm %s9038_s3, %s8050_s26  ;;  %s6969_s8 = scalar_lea.hbm %s9038_s3, 1024 }
 0x249   : > { %s6965_s22 = scalar_lea.hbm %s8144_s6, 512  ;;  %p6970_p13 = scmp.lt.u32.totalorder %s8144_s6, %s9038_s3 }
 0x24a   : > { %p6966_p3 = scmp.ne.s32.totalorder %s8144_s6, %s6965_s22  ;;  %p6971_p12 = scmp.lt.u32.totalorder %s6969_s8, %s6965_s22 }
 0x24b   : > { %p6973_p4 = scmp.lt.u32.totalorder %s6965_s22, %s8144_s6 }
 0x24c   : > { %p6967_p7 = pnand %p6966_p3, %p9034_p0  ;;  %p6972_p5 = por %p6971_p12, %p6970_p13 }
 0x24e   : > { %p6968_p11 = pneg %p6967_p7  ;;  %p6974_p8 = por %p6973_p4, %p6972_p5 }
 0x250   : > { %p6975_p9 = pnand %p6974_p8, %p6968_p11 }
 0x252   : > { %6978 = shalt.err (!%p6975_p9)
}
 0x253   : > { %s6979_s12 = scalar_lea.vmem %s8147_s4, 512  ;;  %s7555_s1 = smov [#allocation28]  }
 0x254   : > { %p6980_p1 = scmp.ne.s32.totalorder %s8147_s4, %s6979_s12  ;;  %s6983_s0 = sshll.u32 %s7555_s1, 4  ;;  %s6984_s0 = int_to_ptr.vmem [resolvable:$false] %s6983_s0 }
 0x255   : > { %s6985_s9 = scalar_lea.vmem %s6984_s0, 1024  ;;  %p6986_p6 = scmp.lt.s32.totalorder %s8147_s4, %s6984_s0 }
 0x256   : > { %p6981_p10 = pnand %p6980_p1, %p9034_p0  ;;  %p6987_p3 = scmp.lt.s32.totalorder %s6985_s9, %s6979_s12 }
 0x258   : > { %p6982_p2 = pneg %p6981_p10  ;;  %p6988_p7 = por %p6987_p3, %p6986_p6 }
 0x25a   : > { %p6989_p13 = pnand %p6988_p7, %p6982_p2 }
 0x25c   : > { %6992 = shalt.err (!%p6989_p13)
}
 0x25d   : > { %s9039_s8 = sld [smem:[#allocation92_spill]]  ;;  %s1323_s22 = scalar_lea.vmem [#allocation31], %s8047_s5 }
 0x25e   : > { %6139 = dma.hbm_to_vmem [thread:$0]  (%p9034_p0), %s8144_s6, 512, %s8147_s4, %s8958_s14, %s7551_s7, %s7551_s7, %s7552_s28  }
 0x25f   : > { %s1330_s12 = sshll.u32 %s1323_s22, 4  ;;  %s8961_s1 = scalar_lea.sflag [#allocation32], %s8041_s11  ;;  %s8177_s12 = int_to_ptr.vmem [resolvable:$true] %s1330_s12 }
 0x263   : > { %s8174_s9 = scalar_lea.hbm %s9039_s8, %s8050_s26  ;;  %s6997_s3 = scalar_lea.hbm %s9039_s8, 1024 }
 0x264   : > { %s6993_s0 = scalar_lea.hbm %s8174_s9, 512  ;;  %p6998_p4 = scmp.lt.u32.totalorder %s8174_s9, %s9039_s8 }
 0x265   : > { %p6994_p11 = scmp.ne.s32.totalorder %s8174_s9, %s6993_s0  ;;  %p6999_p8 = scmp.lt.u32.totalorder %s6997_s3, %s6993_s0 }
 0x266   : > { %p7001_p1 = scmp.lt.u32.totalorder %s6993_s0, %s8174_s9 }
 0x267   : > { %p6995_p12 = pnand %p6994_p11, %p9034_p0  ;;  %p7000_p9 = por %p6999_p8, %p6998_p4 }
 0x269   : > { %p6996_p5 = pneg %p6995_p12  ;;  %p7002_p10 = por %p7001_p1, %p7000_p9 }
 0x26b   : > { %p7003_p2 = pnand %p7002_p10, %p6996_p5 }
 0x26d   : > { %7006 = shalt.err (!%p7003_p2)
}
 0x26e   : > { %s7007_s6 = scalar_lea.vmem %s8177_s12, 512  ;;  %s7556_s4 = smov [#allocation31]  }
 0x26f   : > { %p7008_p6 = scmp.ne.s32.totalorder %s8177_s12, %s7007_s6  ;;  %s7011_s22 = sshll.u32 %s7556_s4, 4  ;;  %s7012_s22 = int_to_ptr.vmem [resolvable:$false] %s7011_s22 }
 0x270   : > { %s7013_s14 = scalar_lea.vmem %s7012_s22, 1024  ;;  %p7014_p13 = scmp.lt.s32.totalorder %s8177_s12, %s7012_s22 }
 0x271   : > { %p7009_p3 = pnand %p7008_p6, %p9034_p0  ;;  %p7015_p11 = scmp.lt.s32.totalorder %s7013_s14, %s7007_s6 }
 0x273   : > { %p7010_p7 = pneg %p7009_p3  ;;  %p7016_p12 = por %p7015_p11, %p7014_p13 }
 0x275   : > { %p7017_p4 = pnand %p7016_p12, %p7010_p7 }
 0x277   : > { %7020 = shalt.err (!%p7017_p4)
}
 0x278   : > { %s9040_s3 = sld [smem:[#allocation94_spill]]  ;;  %s8962_s14 = sshll.u32 %s8044_s15, 6 }
 0x279   : > { %6141 = dma.hbm_to_vmem [thread:$0]  (%p9034_p0), %s8174_s9, 512, %s8177_s12, %s8961_s1, %s7551_s7, %s7551_s7, %s7552_s28  }
 0x27a   : > { %s8963_s0 = sshll.u32 %s7493_s18, 10  ;;  %s1361_s4 = scalar_lea.vmem [#allocation34], %s8962_s14 }
 0x27b   : > { %s1368_s22 = sshll.u32 %s1361_s4, 4  ;;  %s8964_s8 = scalar_lea.sflag [#allocation35], %s8041_s11  ;;  %s8211_s22 = int_to_ptr.vmem [resolvable:$true] %s1368_s22 }
 0x27e   : > { %s8207_s6 = scalar_lea.hbm %s9040_s3, %s8963_s0  ;;  %s7025_s9 = scalar_lea.hbm %s9040_s3, 2048 }
 0x27f   : > { %s7021_s13 = scalar_lea.hbm %s8207_s6, 1024  ;;  %p7026_p1 = scmp.lt.u32.totalorder %s8207_s6, %s9040_s3 }
 0x280   : > { %p7022_p5 = scmp.ne.s32.totalorder %s8207_s6, %s7021_s13  ;;  %p7027_p10 = scmp.lt.u32.totalorder %s7025_s9, %s7021_s13 }
 0x281   : > { %p7029_p6 = scmp.lt.u32.totalorder %s7021_s13, %s8207_s6 }
 0x282   : > { %p7023_p8 = pnand %p7022_p5, %p9034_p0  ;;  %p7028_p2 = por %p7027_p10, %p7026_p1 }
 0x284   : > { %p7024_p9 = pneg %p7023_p8  ;;  %p7030_p3 = por %p7029_p6, %p7028_p2 }
 0x286   : > { %p7031_p7 = pnand %p7030_p3, %p7024_p9 }
 0x288   : > { %7034 = shalt.err (!%p7031_p7)
}
 0x289   : > { %s7035_s12 = scalar_lea.vmem %s8211_s22, 1024  ;;  %s7557_s4 = smov [#allocation34]  }
 0x28a   : > { %p7036_p13 = scmp.ne.s32.totalorder %s8211_s22, %s7035_s12  ;;  %s7039_s1 = sshll.u32 %s7557_s4, 4  ;;  %s7040_s1 = int_to_ptr.vmem [resolvable:$false] %s7039_s1 }
 0x28b   : > { %s7041_s14 = scalar_lea.vmem %s7040_s1, 2048  ;;  %p7042_p4 = scmp.lt.s32.totalorder %s8211_s22, %s7040_s1 }
 0x28c   : > { %p7037_p11 = pnand %p7036_p13, %p9034_p0  ;;  %p7043_p5 = scmp.lt.s32.totalorder %s7041_s14, %s7035_s12 }
 0x28e   : > { %p7038_p12 = pneg %p7037_p11  ;;  %p7044_p8 = por %p7043_p5, %p7042_p4 }
 0x290   : > { %p7045_p1 = pnand %p7044_p8, %p7038_p12 }
 0x292   : > { %7048 = shalt.err (!%p7045_p1)
}
 0x293   : > { %s9041_s13 = sld [smem:[#allocation96_spill]]  ;;  %s1399_s14 = scalar_lea.vmem [#allocation37], %s8047_s5 }
 0x294   : > { %6143 = dma.hbm_to_vmem [thread:$0]  (%p9034_p0), %s8207_s6, 1024, %s8211_s22, %s8964_s8, %s7551_s7, %s7551_s7, %s7552_s28  }
 0x295   : > { %s1406_s9 = sshll.u32 %s1399_s14, 4  ;;  %s1396_s12 = scalar_lea.sflag [#allocation38], %s8041_s11  ;;  %s8241_s9 = int_to_ptr.vmem [resolvable:$true] %s1406_s9 }
 0x299   : > { %s8238_s1 = scalar_lea.hbm %s9041_s13, %s8050_s26  ;;  %s7053_s0 = scalar_lea.hbm %s9041_s13, 1024 }
 0x29a   : > { %s7049_s4 = scalar_lea.hbm %s8238_s1, 512  ;;  %p7054_p6 = scmp.lt.u32.totalorder %s8238_s1, %s9041_s13 }
 0x29b   : > { %p7050_p9 = scmp.ne.s32.totalorder %s8238_s1, %s7049_s4  ;;  %p7055_p3 = scmp.lt.u32.totalorder %s7053_s0, %s7049_s4 }
 0x29c   : > { %p7057_p13 = scmp.lt.u32.totalorder %s7049_s4, %s8238_s1 }
 0x29d   : > { %p7051_p10 = pnand %p7050_p9, %p9034_p0  ;;  %p7056_p7 = por %p7055_p3, %p7054_p6 }
 0x29f   : > { %p7052_p2 = pneg %p7051_p10  ;;  %p7058_p11 = por %p7057_p13, %p7056_p7 }
 0x2a1   : > { %p7059_p12 = pnand %p7058_p11, %p7052_p2 }
 0x2a3   : > { %7062 = shalt.err (!%p7059_p12)
}
 0x2a4   : > { %s7063_s6 = scalar_lea.vmem %s8241_s9, 512  ;;  %s7558_s22 = smov [#allocation37]  }
 0x2a5   : > { %p7064_p4 = scmp.ne.s32.totalorder %s8241_s9, %s7063_s6  ;;  %s7067_s14 = sshll.u32 %s7558_s22, 4  ;;  %s7068_s14 = int_to_ptr.vmem [resolvable:$false] %s7067_s14 }
 0x2a6   : > { %s7069_s8 = scalar_lea.vmem %s7068_s14, 1024  ;;  %p7070_p1 = scmp.lt.s32.totalorder %s8241_s9, %s7068_s14 }
 0x2a7   : > { %p7065_p5 = pnand %p7064_p4, %p9034_p0  ;;  %p7071_p9 = scmp.lt.s32.totalorder %s7069_s8, %s7063_s6 }
 0x2a9   : > { %p7066_p8 = pneg %p7065_p5  ;;  %p7072_p10 = por %p7071_p9, %p7070_p1 }
 0x2ab   : > { %p7073_p6 = pnand %p7072_p10, %p7066_p8 }
 0x2ad   : > { %7076 = shalt.err (!%p7073_p6)
}
 0x2ae   : > { %s9042_s0 = sld [smem:[#allocation98_spill]]  ;;  %s9044_s22 = sld [smem:[#allocation85_spill]] }
 0x2af   : > { %6145 = dma.hbm_to_vmem [thread:$0]  (%p9034_p0), %s8238_s1, 512, %s8241_s9, %s1396_s12, %s7551_s7, %s7551_s7, %s7552_s28  }
 0x2b0   : > { %s9045_s8 = sshll.u32 %s7493_s18, 10  ;;  %s9046_s14 = sshll.u32 %s8044_s15, 6 }
 0x2b1   : > { %s1437_s3 = scalar_lea.vmem [#allocation40], %s9046_s14  ;;  %s8970_s19 = scalar_lea.sflag [#allocation41], %s8041_s11 }
 0x2b2   : > { %s1444_s13 = sshll.u32 %s1437_s3, 4  ;;  %s8273_s13 = int_to_ptr.vmem [resolvable:$true] %s1444_s13 }
 0x2b4   : > { %s9043_s4 = smov %s9042_s0  ;;  %s8269_s6 = scalar_lea.hbm %s9042_s0, %s9045_s8 }
 0x2b5   : > { %s8277_s17 = scalar_lea.hbm %s9044_s22, %s8050_s26  ;;  %s7077_s20 = scalar_lea.hbm %s8269_s6, 1024 }
 0x2b6   : > { %p7078_p2 = scmp.ne.s32.totalorder %s8269_s6, %s7077_s20  ;;  %s7081_s1 = scalar_lea.hbm %s9043_s4, 2048 }
 0x2b7   : > { %p7082_p13 = scmp.lt.u32.totalorder %s8269_s6, %s9043_s4  ;;  %p7083_p11 = scmp.lt.u32.totalorder %s7081_s1, %s7077_s20 }
 0x2b8   : > { %p7079_p3 = pnand %p7078_p2, %p9034_p0  ;;  %p7085_p4 = scmp.lt.u32.totalorder %s7077_s20, %s8269_s6 }
 0x2b9   : > { %p7084_p12 = por %p7083_p11, %p7082_p13 }
 0x2ba   : > { %p7080_p7 = pneg %p7079_p3 }
 0x2bb   : > { %p7086_p5 = por %p7085_p4, %p7084_p12 }
 0x2bd   : > { %p7087_p8 = pnand %p7086_p5, %p7080_p7 }
 0x2bf   : > { %7090 = shalt.err (!%p7087_p8)
}
 0x2c0   : > { %s7091_s3 = scalar_lea.vmem %s8273_s13, 1024  ;;  %s7559_s9 = smov [#allocation40]  }
 0x2c1   : > { %p7092_p1 = scmp.ne.s32.totalorder %s8273_s13, %s7091_s3  ;;  %s7095_s0 = sshll.u32 %s7559_s9, 4  ;;  %s7096_s0 = int_to_ptr.vmem [resolvable:$false] %s7095_s0 }
 0x2c2   : > { %s7097_s8 = scalar_lea.vmem %s7096_s0, 2048  ;;  %p7098_p6 = scmp.lt.s32.totalorder %s8273_s13, %s7096_s0 }
 0x2c3   : > { %p7093_p9 = pnand %p7092_p1, %p9034_p0  ;;  %p7099_p2 = scmp.lt.s32.totalorder %s7097_s8, %s7091_s3 }
 0x2c5   : > { %p7094_p10 = pneg %p7093_p9  ;;  %p7100_p3 = por %p7099_p2, %p7098_p6 }
 0x2c7   : > { %p7101_p13 = pnand %p7100_p3, %p7094_p10 }
 0x2c9   : > { %7104 = shalt.err (!%p7101_p13)
}
 0x2ca   : > { %s9047_s20 = sld [smem:[#allocation87_spill]]  ;;  %s1184_s14 = scalar_lea.vmem [#allocation21], %s8047_s5 }
 0x2cb   : > { %6147 = dma.hbm_to_vmem [thread:$0]  (%p9034_p0), %s8269_s6, 1024, %s8273_s13, %s8970_s19, %s7551_s7, %s7551_s7, %s7552_s28  }
 0x2cc   : > { %s1191_s1 = sshll.u32 %s1184_s14, 4  ;;  %s7105_s9 = scalar_lea.hbm %s8277_s17, 512  ;;  %s8303_s1 = int_to_ptr.vmem [resolvable:$true] %s1191_s1 }
 0x2cd   : > { %p7106_p7 = scmp.ne.s32.totalorder %s8277_s17, %s7105_s9  ;;  %s7109_s0 = scalar_lea.hbm %s9044_s22, 1024 }
 0x2ce   : > { %p7110_p4 = scmp.lt.u32.totalorder %s8277_s17, %s9044_s22  ;;  %p7111_p5 = scmp.lt.u32.totalorder %s7109_s0, %s7105_s9 }
 0x2cf   : > { %p7107_p11 = pnand %p7106_p7, %p9034_p0  ;;  %p7113_p1 = scmp.lt.u32.totalorder %s7105_s9, %s8277_s17 }
 0x2d0   : > { %s8307_s3 = scalar_lea.hbm %s9047_s20, %s8050_s26  ;;  %p7112_p8 = por %p7111_p5, %p7110_p4 }
 0x2d1   : > { %p7108_p12 = pneg %p7107_p11 }
 0x2d2   : > { %p7114_p9 = por %p7113_p1, %p7112_p8 }
 0x2d4   : > { %p7115_p10 = pnand %p7114_p9, %p7108_p12 }
 0x2d6   : > { %7118 = shalt.err (!%p7115_p10)
}
 0x2d7   : > { %s7119_s13 = scalar_lea.vmem %s8303_s1, 512  ;;  %s7560_s26 = smov [#allocation21]  }
 0x2d8   : > { %p7120_p6 = scmp.ne.s32.totalorder %s8303_s1, %s7119_s13  ;;  %s7123_s6 = sshll.u32 %s7560_s26, 4  ;;  %s7124_s6 = int_to_ptr.vmem [resolvable:$false] %s7123_s6 }
 0x2d9   : > { %s7125_s8 = scalar_lea.vmem %s7124_s6, 1024  ;;  %p7126_p13 = scmp.lt.s32.totalorder %s8303_s1, %s7124_s6 }
 0x2da   : > { %p7121_p2 = pnand %p7120_p6, %p9034_p0  ;;  %p7127_p7 = scmp.lt.s32.totalorder %s7125_s8, %s7119_s13 }
 0x2dc   : > { %p7122_p3 = pneg %p7121_p2  ;;  %p7128_p11 = por %p7127_p7, %p7126_p13 }
 0x2de   : > { %p7129_p4 = pnand %p7128_p11, %p7122_p3 }
 0x2e0   : > { %7132 = shalt.err (!%p7129_p4)
}
 0x2e1   : > { %s9048_s14 = scalar_lea.sflag [#allocation20], %s8041_s11  ;;  %s1226_s9 = scalar_lea.vmem [#allocation24], %s8047_s5 }
 0x2e2   : > { %6134 = dma.hbm_to_vmem [thread:$0]  (%p9034_p0), %s8277_s17, 512, %s8303_s1, %s9048_s14, %s7551_s7, %s7551_s7, %s7552_s28  }
 0x2e3   : > { %s1233_s0 = sshll.u32 %s1226_s9, 4  ;;  %s8335_s13 = sshll.u32 %s7493_s18, 4  ;;  %s8332_s0 = int_to_ptr.vmem [resolvable:$true] %s1233_s0 }
 0x2e4   : > { %s7133_s26 = scalar_lea.hbm %s8307_s3, 512  ;;  %s7137_s6 = scalar_lea.hbm %s9047_s20, 1024 }
 0x2e5   : > { %p7134_p12 = scmp.ne.s32.totalorder %s8307_s3, %s7133_s26  ;;  %p7138_p1 = scmp.lt.u32.totalorder %s8307_s3, %s9047_s20 }
 0x2e6   : > { %p7139_p9 = scmp.lt.u32.totalorder %s7137_s6, %s7133_s26  ;;  %p7141_p6 = scmp.lt.u32.totalorder %s7133_s26, %s8307_s3 }
 0x2e7   : > { %p7135_p5 = pnand %p7134_p12, %p9034_p0 }
 0x2e8   : > { %p7140_p10 = por %p7139_p9, %p7138_p1 }
 0x2e9   : > { %p7136_p8 = pneg %p7135_p5 }
 0x2ea   : > { %p7142_p2 = por %p7141_p6, %p7140_p10 }
 0x2ec   : > { %p7143_p3 = pnand %p7142_p2, %p7136_p8 }
 0x2ee   : > { %7146 = shalt.err (!%p7143_p3)
}
 0x2ef   : > { %s7147_s17 = scalar_lea.vmem %s8332_s0, 512  ;;  %s7561_s5 = smov [#allocation24]  }
 0x2f0   : > { %p7148_p13 = scmp.ne.s32.totalorder %s8332_s0, %s7147_s17  ;;  %s7151_s1 = sshll.u32 %s7561_s5, 4  ;;  %s7152_s1 = int_to_ptr.vmem [resolvable:$false] %s7151_s1 }
 0x2f1   : > { %s7153_s8 = scalar_lea.vmem %s7152_s1, 1024  ;;  %p7154_p4 = scmp.lt.s32.totalorder %s8332_s0, %s7152_s1 }
 0x2f2   : > { %p7149_p7 = pnand %p7148_p13, %p9034_p0  ;;  %p7155_p12 = scmp.lt.s32.totalorder %s7153_s8, %s7147_s17 }
 0x2f4   : > { %p7150_p11 = pneg %p7149_p7  ;;  %p7156_p5 = por %p7155_p12, %p7154_p4 }
 0x2f6   : > { %p7157_p1 = pnand %p7156_p5, %p7150_p11 }
 0x2f8   : > { %7160 = shalt.err (!%p7157_p1)
}
 0x2f9   : > { %s9049_s14 = scalar_lea.sflag [#allocation23], %s8041_s11  ;;  %s9050_s9 = sld [smem:[#allocation89_spill]] }
 0x2fa   : > { %6136 = dma.hbm_to_vmem [thread:$0]  (%p9034_p0), %s8307_s3, 512, %s8332_s0, %s9049_s14, %s7551_s7, %s7551_s7, %s7552_s28  }
 0x2fb   : > { %s1267_s6 = scalar_lea.vmem [#allocation27], %s8044_s15 }
 0x2fc   : > { %s1274_s17 = sshll.u32 %s1267_s6, 4  ;;  %s1275_s17 = int_to_ptr.vmem [resolvable:$true] %s1274_s17 }
 0x2ff   : > { %s8361_s26 = scalar_lea.hbm %s9050_s9, %s8335_s13  ;;  %s7165_s1 = scalar_lea.hbm %s9050_s9, 32 }
 0x300   : > { %s7161_s5 = scalar_lea.hbm %s8361_s26, 16  ;;  %p7166_p6 = scmp.lt.u32.totalorder %s8361_s26, %s9050_s9 }
 0x301   : > { %p7162_p8 = scmp.ne.s32.totalorder %s8361_s26, %s7161_s5  ;;  %p7167_p2 = scmp.lt.u32.totalorder %s7165_s1, %s7161_s5 }
 0x302   : > { %p7169_p13 = scmp.lt.u32.totalorder %s7161_s5, %s8361_s26 }
 0x303   : > { %p7163_p9 = pnand %p7162_p8, %p9034_p0  ;;  %p7168_p3 = por %p7167_p2, %p7166_p6 }
 0x305   : > { %p7164_p10 = pneg %p7163_p9  ;;  %p7170_p7 = por %p7169_p13, %p7168_p3 }
 0x307   : > { %p7171_p11 = pnand %p7170_p7, %p7164_p10 }
 0x309   : > { %7174 = shalt.err (!%p7171_p11)
}
 0x30a   : > { %s7175_s7 = scalar_lea.vmem %s1275_s17, 16  ;;  %s7562_s28 = smov [#allocation27]  }
 0x30b   : > { %p7176_p4 = scmp.ne.s32.totalorder %s1275_s17, %s7175_s7  ;;  %s7179_s3 = sshll.u32 %s7562_s28, 4  ;;  %s7180_s3 = int_to_ptr.vmem [resolvable:$false] %s7179_s3 }
 0x30c   : > { %s7181_s0 = scalar_lea.vmem %s7180_s3, 32  ;;  %p7182_p1 = scmp.lt.s32.totalorder %s1275_s17, %s7180_s3 }
 0x30d   : > { %p7177_p12 = pnand %p7176_p4, %p9034_p0  ;;  %p7183_p8 = scmp.lt.s32.totalorder %s7181_s0, %s7175_s7 }
 0x30f   : > { %p7178_p5 = pneg %p7177_p12  ;;  %p7184_p9 = por %p7183_p8, %p7182_p1 }
 0x311   : > { %p7185_p2 = pnand %p7184_p9, %p7178_p5 }
 0x313   : > { %7188 = shalt.err (!%p7185_p2)
}
 0x314   : > { %s9051_s8 = scalar_lea.sflag [#allocation26], %s8041_s11  ;;  %s9052_s14 = sld [smem:[#allocation91_spill]] }
 0x315   : > { %6138 = dma.hbm_to_vmem [thread:$0]  (%p9034_p0), %s8361_s26, 16, %s1275_s17, %s9051_s8  }
 0x316   : > { %s1305_s5 = scalar_lea.vmem [#allocation30], %s8044_s15 }
 0x317   : > { %s1312_s1 = sshll.u32 %s1305_s5, 4  ;;  %s1313_s1 = int_to_ptr.vmem [resolvable:$true] %s1312_s1 }
 0x31a   : > { %s8381_s6 = scalar_lea.hbm %s9052_s14, %s8335_s13  ;;  %s7193_s28 = scalar_lea.hbm %s9052_s14, 32 }
 0x31b   : > { %s7189_s7 = scalar_lea.hbm %s8381_s6, 16  ;;  %p7194_p13 = scmp.lt.u32.totalorder %s8381_s6, %s9052_s14 }
 0x31c   : > { %p7190_p10 = scmp.ne.s32.totalorder %s8381_s6, %s7189_s7  ;;  %p7195_p7 = scmp.lt.u32.totalorder %s7193_s28, %s7189_s7 }
 0x31d   : > { %p7197_p4 = scmp.lt.u32.totalorder %s7189_s7, %s8381_s6 }
 0x31e   : > { %p7191_p6 = pnand %p7190_p10, %p9034_p0  ;;  %p7196_p11 = por %p7195_p7, %p7194_p13 }
 0x320   : > { %p7192_p3 = pneg %p7191_p6  ;;  %p7198_p12 = por %p7197_p4, %p7196_p11 }
 0x322   : > { %p7199_p5 = pnand %p7198_p12, %p7192_p3 }
 0x324   : > { %7202 = shalt.err (!%p7199_p5)
}
 0x325   : > { %s7203_s26 = scalar_lea.vmem %s1313_s1, 16  ;;  %s7563_s17 = smov [#allocation30]  }
 0x326   : > { %p7204_p1 = scmp.ne.s32.totalorder %s1313_s1, %s7203_s26  ;;  %s7207_s3 = sshll.u32 %s7563_s17, 4  ;;  %s7208_s3 = int_to_ptr.vmem [resolvable:$false] %s7207_s3 }
 0x327   : > { %s7209_s0 = scalar_lea.vmem %s7208_s3, 32  ;;  %p7210_p2 = scmp.lt.s32.totalorder %s1313_s1, %s7208_s3 }
 0x328   : > { %p7205_p8 = pnand %p7204_p1, %p9034_p0  ;;  %p7211_p10 = scmp.lt.s32.totalorder %s7209_s0, %s7203_s26 }
 0x32a   : > { %p7206_p9 = pneg %p7205_p8  ;;  %p7212_p6 = por %p7211_p10, %p7210_p2 }
 0x32c   : > { %p7213_p7 = pnand %p7212_p6, %p7206_p9 }
 0x32e   : > { %7216 = shalt.err (!%p7213_p7)
}
 0x32f   : > { %s9053_s8 = scalar_lea.sflag [#allocation29], %s8041_s11  ;;  %s9054_s5 = sld [smem:[#allocation93_spill]] }
 0x330   : > { %6140 = dma.hbm_to_vmem [thread:$0]  (%p9034_p0), %s8381_s6, 16, %s1313_s1, %s9053_s8  }
 0x331   : > { %s1343_s28 = scalar_lea.vmem [#allocation33], %s8044_s15 }
 0x332   : > { %s1350_s26 = sshll.u32 %s1343_s28, 4  ;;  %s1351_s26 = int_to_ptr.vmem [resolvable:$true] %s1350_s26 }
 0x335   : > { %s8401_s7 = scalar_lea.hbm %s9054_s5, %s8335_s13  ;;  %s7221_s3 = scalar_lea.hbm %s9054_s5, 32 }
 0x336   : > { %s7217_s17 = scalar_lea.hbm %s8401_s7, 16  ;;  %p7222_p4 = scmp.lt.u32.totalorder %s8401_s7, %s9054_s5 }
 0x337   : > { %p7218_p3 = scmp.ne.s32.totalorder %s8401_s7, %s7217_s17  ;;  %p7223_p12 = scmp.lt.u32.totalorder %s7221_s3, %s7217_s17 }
 0x338   : > { %p7225_p1 = scmp.lt.u32.totalorder %s7217_s17, %s8401_s7 }
 0x339   : > { %p7219_p13 = pnand %p7218_p3, %p9034_p0  ;;  %p7224_p5 = por %p7223_p12, %p7222_p4 }
 0x33b   : > { %p7220_p11 = pneg %p7219_p13  ;;  %p7226_p8 = por %p7225_p1, %p7224_p5 }
 0x33d   : > { %p7227_p9 = pnand %p7226_p8, %p7220_p11 }
 0x33f   : > { %7230 = shalt.err (!%p7227_p9)
}
 0x340   : > { %s7231_s6 = scalar_lea.vmem %s1351_s26, 16  ;;  %s7564_s1 = smov [#allocation33]  }
 0x341   : > { %p7232_p2 = scmp.ne.s32.totalorder %s1351_s26, %s7231_s6  ;;  %s7235_s0 = sshll.u32 %s7564_s1, 4  ;;  %s7236_s0 = int_to_ptr.vmem [resolvable:$false] %s7235_s0 }
 0x342   : > { %s7237_s8 = scalar_lea.vmem %s7236_s0, 32  ;;  %p7238_p7 = scmp.lt.s32.totalorder %s1351_s26, %s7236_s0 }
 0x343   : > { %p7233_p10 = pnand %p7232_p2, %p9034_p0  ;;  %p7239_p3 = scmp.lt.s32.totalorder %s7237_s8, %s7231_s6 }
 0x345   : > { %p7234_p6 = pneg %p7233_p10  ;;  %p7240_p13 = por %p7239_p3, %p7238_p7 }
 0x347   : > { %p7241_p4 = pnand %p7240_p13, %p7234_p6 }
 0x349   : > { %7244 = shalt.err (!%p7241_p4)
}
 0x34a   : > { %s9055_s28 = scalar_lea.sflag [#allocation32], %s8041_s11  ;;  %s9056_s17 = sld [smem:[#allocation95_spill]] }
 0x34b   : > { %6142 = dma.hbm_to_vmem [thread:$0]  (%p9034_p0), %s8401_s7, 16, %s1351_s26, %s9055_s28  }
 0x34c   : > { %s1381_s6 = scalar_lea.vmem [#allocation36], %s8044_s15 }
 0x34d   : > { %s1388_s1 = sshll.u32 %s1381_s6, 4  ;;  %s1389_s1 = int_to_ptr.vmem [resolvable:$true] %s1388_s1 }
 0x350   : > { %s8421_s3 = scalar_lea.hbm %s9056_s17, %s8335_s13  ;;  %s7249_s8 = scalar_lea.hbm %s9056_s17, 32 }
 0x351   : > { %s7245_s0 = scalar_lea.hbm %s8421_s3, 16  ;;  %p7250_p1 = scmp.lt.u32.totalorder %s8421_s3, %s9056_s17 }
 0x352   : > { %p7246_p11 = scmp.ne.s32.totalorder %s8421_s3, %s7245_s0  ;;  %p7251_p8 = scmp.lt.u32.totalorder %s7249_s8, %s7245_s0 }
 0x353   : > { %p7253_p2 = scmp.lt.u32.totalorder %s7245_s0, %s8421_s3 }
 0x354   : > { %p7247_p12 = pnand %p7246_p11, %p9034_p0  ;;  %p7252_p9 = por %p7251_p8, %p7250_p1 }
 0x356   : > { %p7248_p5 = pneg %p7247_p12  ;;  %p7254_p10 = por %p7253_p2, %p7252_p9 }
 0x358   : > { %p7255_p6 = pnand %p7254_p10, %p7248_p5 }
 0x35a   : > { %7258 = shalt.err (!%p7255_p6)
}
 0x35b   : > { %s7259_s7 = scalar_lea.vmem %s1389_s1, 16  ;;  %s7565_s26 = smov [#allocation36]  }
 0x35c   : > { %p7260_p7 = scmp.ne.s32.totalorder %s1389_s1, %s7259_s7  ;;  %s7263_s28 = sshll.u32 %s7565_s26, 4  ;;  %s7264_s28 = int_to_ptr.vmem [resolvable:$false] %s7263_s28 }
 0x35d   : > { %s7265_s6 = scalar_lea.vmem %s7264_s28, 32  ;;  %p7266_p4 = scmp.lt.s32.totalorder %s1389_s1, %s7264_s28 }
 0x35e   : > { %p7261_p3 = pnand %p7260_p7, %p9034_p0  ;;  %p7267_p11 = scmp.lt.s32.totalorder %s7265_s6, %s7259_s7 }
 0x360   : > { %p7262_p13 = pneg %p7261_p3  ;;  %p7268_p12 = por %p7267_p11, %p7266_p4 }
 0x362   : > { %p7269_p1 = pnand %p7268_p12, %p7262_p13 }
 0x364   : > { %7272 = shalt.err (!%p7269_p1)
}
 0x365   : > { %s9057_s0 = scalar_lea.sflag [#allocation35], %s8041_s11  ;;  %s9058_s8 = sld [smem:[#allocation97_spill]] }
 0x366   : > { %6144 = dma.hbm_to_vmem [thread:$0]  (%p9034_p0), %s8421_s3, 16, %s1389_s1, %s9057_s0  }
 0x367   : > { %s1419_s7 = scalar_lea.vmem [#allocation39], %s8044_s15 }
 0x368   : > { %s1426_s28 = sshll.u32 %s1419_s7, 4  ;;  %s1427_s28 = int_to_ptr.vmem [resolvable:$true] %s1426_s28 }
 0x36b   : > { %s8441_s26 = scalar_lea.hbm %s9058_s8, %s8335_s13  ;;  %s7277_s19 = scalar_lea.hbm %s9058_s8, 32 }
 0x36c   : > { %s7273_s6 = scalar_lea.hbm %s8441_s26, 16  ;;  %p7278_p2 = scmp.lt.u32.totalorder %s8441_s26, %s9058_s8 }
 0x36d   : > { %p7274_p5 = scmp.ne.s32.totalorder %s8441_s26, %s7273_s6  ;;  %p7279_p10 = scmp.lt.u32.totalorder %s7277_s19, %s7273_s6 }
 0x36e   : > { %p7281_p7 = scmp.lt.u32.totalorder %s7273_s6, %s8441_s26 }
 0x36f   : > { %p7275_p8 = pnand %p7274_p5, %p9034_p0  ;;  %p7280_p6 = por %p7279_p10, %p7278_p2 }
 0x371   : > { %p7276_p9 = pneg %p7275_p8  ;;  %p7282_p3 = por %p7281_p7, %p7280_p6 }
 0x373   : > { %p7283_p13 = pnand %p7282_p3, %p7276_p9 }
 0x375   : > { %7286 = shalt.err (!%p7283_p13)
}
 0x376   : > { %s7287_s3 = scalar_lea.vmem %s1427_s28, 16  ;;  %s7566_s1 = smov [#allocation39]  }
 0x377   : > { %p7288_p4 = scmp.ne.s32.totalorder %s1427_s28, %s7287_s3  ;;  %s7291_s0 = sshll.u32 %s7566_s1, 4  ;;  %s7292_s0 = int_to_ptr.vmem [resolvable:$false] %s7291_s0 }
 0x378   : > { %s7293_s7 = scalar_lea.vmem %s7292_s0, 32  ;;  %p7294_p1 = scmp.lt.s32.totalorder %s1427_s28, %s7292_s0 }
 0x379   : > { %p7289_p11 = pnand %p7288_p4, %p9034_p0  ;;  %p7295_p5 = scmp.lt.s32.totalorder %s7293_s7, %s7287_s3 }
 0x37b   : > { %p7290_p12 = pneg %p7289_p11  ;;  %p7296_p8 = por %p7295_p5, %p7294_p1 }
 0x37d   : > { %p7297_p2 = pnand %p7296_p8, %p7290_p12 }
 0x37f   : > { %7300 = shalt.err (!%p7297_p2)
}
 0x380   : > { %s9059_s19 = sld [smem:[#allocation99_spill]]  ;;  %s1457_s3 = scalar_lea.vmem [#allocation42], %s8044_s15 }
 0x381   : > { %6146 = dma.hbm_to_vmem [thread:$0]  (%p9034_p0), %s8441_s26, 16, %s1427_s28, %s1396_s12  }
 0x382   : > { %s1464_s1 = sshll.u32 %s1457_s3, 4  ;;  %s1465_s1 = int_to_ptr.vmem [resolvable:$true] %s1464_s1 }
 0x386   : > { %s8461_s6 = scalar_lea.hbm %s9059_s19, %s8335_s13  ;;  %s7305_s7 = scalar_lea.hbm %s9059_s19, 32 }
 0x387   : > { %s7301_s0 = scalar_lea.hbm %s8461_s6, 16  ;;  %p7306_p7 = scmp.lt.u32.totalorder %s8461_s6, %s9059_s19 }
 0x388   : > { %p7302_p9 = scmp.ne.s32.totalorder %s8461_s6, %s7301_s0  ;;  %p7307_p3 = scmp.lt.u32.totalorder %s7305_s7, %s7301_s0 }
 0x389   : > { %p7309_p4 = scmp.lt.u32.totalorder %s7301_s0, %s8461_s6 }
 0x38a   : > { %p7303_p10 = pnand %p7302_p9, %p9034_p0  ;;  %p7308_p13 = por %p7307_p3, %p7306_p7 }
 0x38c   : > { %p7304_p6 = pneg %p7303_p10  ;;  %p7310_p11 = por %p7309_p4, %p7308_p13 }
 0x38e   : > { %p7311_p12 = pnand %p7310_p11, %p7304_p6 }
 0x390   : > { %7314 = shalt.err (!%p7311_p12)
}
 0x391   : > { %s7315_s12 = scalar_lea.vmem %s1465_s1, 16  ;;  %s7567_s13 = smov [#allocation42]  }
 0x392   : > { %p7316_p1 = scmp.ne.s32.totalorder %s1465_s1, %s7315_s12  ;;  %s7319_s26 = sshll.u32 %s7567_s13, 4  ;;  %s7320_s26 = int_to_ptr.vmem [resolvable:$false] %s7319_s26 }
 0x393   : > { %s7321_s28 = scalar_lea.vmem %s7320_s26, 32  ;;  %p7322_p2 = scmp.lt.s32.totalorder %s1465_s1, %s7320_s26 }
 0x394   : > { %p7317_p5 = pnand %p7316_p1, %p9034_p0  ;;  %p7323_p9 = scmp.lt.s32.totalorder %s7321_s28, %s7315_s12 }
 0x396   : > { %p7318_p8 = pneg %p7317_p5  ;;  %p7324_p10 = por %p7323_p9, %p7322_p2 }
 0x398   : > { %p7325_p3 = pnand %p7324_p10, %p7318_p8 }
 0x39a   : > { %7328 = shalt.err (!%p7325_p3)
}
 0x39b   : > { %s9060_s3 = scalar_lea.sflag [#allocation41], %s8041_s11  ;;  %s9061_s0 = sld [smem:[#allocation100_spill]] }
 0x39c   : > { %6148 = dma.hbm_to_vmem [thread:$0]  (%p9034_p0), %s8461_s6, 16, %s1465_s1, %s9060_s3  }
 0x39d   : > { %s5367_s13 = sshll.u32 %s8044_s15, 3  ;;  %s5368_s4 = sshll.u32 %s7493_s18, 7 }
 0x39e   : > { %s1475_s12 = scalar_lea.vmem [#allocation43], %s5367_s13  ;;  %s1472_s5 = scalar_lea.sflag [#allocation44], %s8041_s11 }
 0x39f   : > { %s1482_s28 = sshll.u32 %s1475_s12, 4  ;;  %s1483_s28 = int_to_ptr.vmem [resolvable:$true] %s1482_s28 }
 0x3a1   : > { %s9062_s7 = smov %s9061_s0  ;;  %s8482_s26 = scalar_lea.hbm %s9061_s0, %s5368_s4 }
 0x3a2   : > { %s7329_s8 = scalar_lea.hbm %s8482_s26, 128  ;;  %s7333_s9 = scalar_lea.hbm %s9062_s7, 256 }
 0x3a3   : > { %p7330_p6 = scmp.ne.s32.totalorder %s8482_s26, %s7329_s8  ;;  %p7334_p4 = scmp.lt.u32.totalorder %s8482_s26, %s9062_s7 }
 0x3a4   : > { %p7335_p11 = scmp.lt.u32.totalorder %s7333_s9, %s7329_s8  ;;  %p7337_p1 = scmp.lt.u32.totalorder %s7329_s8, %s8482_s26 }
 0x3a5   : > { %p7331_p7 = pnand %p7330_p6, %p9034_p0 }
 0x3a6   : > { %p7336_p12 = por %p7335_p11, %p7334_p4 }
 0x3a7   : > { %p7332_p13 = pneg %p7331_p7 }
 0x3a8   : > { %p7338_p5 = por %p7337_p1, %p7336_p12 }
 0x3aa   : > { %p7339_p8 = pnand %p7338_p5, %p7332_p13 }
 0x3ac   : > { %7342 = shalt.err (!%p7339_p8)
}
 0x3ad   : > { %s7343_s18 = scalar_lea.vmem %s1483_s28, 128  ;;  %s7568_s11 = smov [#allocation43]  }
 0x3ae   : > { %p7344_p2 = scmp.ne.s32.totalorder %s1483_s28, %s7343_s18  ;;  %s7347_s15 = sshll.u32 %s7568_s11, 4  ;;  %s7348_s15 = int_to_ptr.vmem [resolvable:$false] %s7347_s15 }
 0x3af   : > { %s7349_s4 = scalar_lea.vmem %s7348_s15, 256  ;;  %p7350_p3 = scmp.lt.s32.totalorder %s1483_s28, %s7348_s15 }
 0x3b0   : > { %p7345_p9 = pnand %p7344_p2, %p9034_p0  ;;  %p7351_p6 = scmp.lt.s32.totalorder %s7349_s4, %s7343_s18 }
 0x3b2   : > { %p7346_p10 = pneg %p7345_p9  ;;  %p7352_p7 = por %p7351_p6, %p7350_p3 }
 0x3b4   : > { %p7353_p4 = pnand %p7352_p7, %p7346_p10 }
 0x3b6   : > { %7356 = shalt.err (!%p7353_p4)
}
 0x3b7   : > { %6149 = dma.hbm_to_vmem [thread:$0]  (%p9034_p0), %s8482_s26, 128, %s1483_s28, %s1472_s5  }
 0x3b8 PF: > { %p9063_p13 = scmp.ne.s32.totalorder %s9026_s10, 0 }
 0x3b9   : > { %s9064_s9 = sld [smem:[#allocation108_spill]] (!%p9063_p13) }
 0x3ba   : > { %1491 = sbr.rel (%p9063_p13) target bundleno = 5100 (0x13ec), region = 156 }
 0x3bf   : > { %p9065_p11 = scmp.eq.s32.totalorder (!%p9063_p13), %s9064_s9, 0 }
 0x3c1   : > { %7400 = dma.done.wait (%p9065_p11), [#allocation5], 128   ;;  %p9066_p12 = pmov %p9065_p11 }
 0x3c2   : > { %p9067_p1 = pmov %p9065_p11 }
 0x3c3   : > { %7402 = vsyncadd (%p9066_p12), [#allocation5], 4294967168 }
 0x3c4   : > { %7404 = dma.done.wait (%p9067_p1), [#allocation8], 320   ;;  %p9068_p5 = pmov %p9067_p1 }
 0x3c5   : > { %p9069_p8 = pmov %p9067_p1 }
 0x3c6   : > { %7406 = vsyncadd (%p9068_p5), [#allocation8], 4294966976 }
 0x3c7   : > { %7408 = dma.done.wait (%p9069_p8), [#allocation11], 80   ;;  %p9070_p0 = pmov %p9067_p1 }
 0x3c9   : > { %7410 = vsyncadd (%p9070_p0), [#allocation11], 4294967216  ;;  %p9071_p2 = pmov %p9070_p0 }
 0x3ca   : > { %p9072_p9 = pmov %p9070_p0 }
 0x3cb   : > { %7412 = dma.done.wait (%p9071_p2), [#allocation14], 144  }
 0x3cc   : > { %7414 = vsyncadd (%p9072_p9), [#allocation14], 4294967152  ;;  %p9073_p10 = pmov %p9070_p0 }
 0x3cd   : > { %p9074_p3 = pmov %p9070_p0 }
 0x3ce   : > { %7416 = dma.done.wait (%p9073_p10), [#allocation17], 640  }
 0x3cf   : > { %7418 = vsyncadd (%p9074_p3), [#allocation17], 4294966656  ;;  %s9075_s2 = sld [smem:[#allocation107_spill]]  ;;  %s9076_s10 = sld [smem:[#allocation111_spill]] }
 0x3d0   : > { %s8521_s5 = sand.u32 1, %s9064_s9  }
 0x3d1   : > { %s1530_s1 = scalar_lea.sflag [#allocation20], %s8521_s5 }
 0x3d5   : > { %s8524_s8 = sand.u32 1, %s9075_s2   ;;  %p9077_p6 = scmp.ne.s32.totalorder %s9076_s10, 0 }
 0x3d6   : > { %s8527_s6 = sshll.u32 %s8524_s8, 5 }
 0x3d7   : > { %s8531_s3 = scalar_lea.vmem [#allocation19], %s8527_s6 }
 0x3d8   : > { %7420 = dma.done.wait (%p9077_p6), %s1530_s1, 1024  }
 0x3d9   : > { %7422 = vsyncadd (%p9077_p6), %s1530_s1, 4294966272  ;;  %s8538_s0 = scalar_lea.vmem [#allocation21], %s8527_s6  ;;  %s1548_s13 = scalar_lea.sflag [#allocation23], %s8521_s5 }
 0x3da   : > { %s8542_s26 = scalar_lea.vmem [#allocation22], %s8527_s6 }
 0x3db   : > { %7424 = dma.done.wait (%p9077_p6), %s1548_s13, 1024  }
 0x3dc   : > { %7426 = vsyncadd (%p9077_p6), %s1548_s13, 4294966272  ;;  %s8549_s12 = scalar_lea.vmem [#allocation24], %s8527_s6  ;;  %s1566_s28 = scalar_lea.sflag [#allocation26], %s8521_s5 }
 0x3dd   : > { %s8553_s18 = scalar_lea.vmem [#allocation25], %s8527_s6 }
 0x3de   : > { %7428 = dma.done.wait (%p9077_p6), %s1566_s28, 528  }
 0x3df   : > { %7430 = vsyncadd (%p9077_p6), %s1566_s28, 4294966768  ;;  %s1583_s15 = scalar_lea.sflag [#allocation29], %s8521_s5  ;;  %s8562_s4 = scalar_lea.vmem [#allocation28], %s8527_s6 }
 0x3e0   : > { %7432 = dma.done.wait (%p9077_p6), %s1583_s15, 528  }
 0x3e1   : > { %7434 = vsyncadd (%p9077_p6), %s1583_s15, 4294966768  ;;  %s1600_s1 = scalar_lea.sflag [#allocation32], %s8521_s5  ;;  %s8571_s13 = scalar_lea.vmem [#allocation31], %s8527_s6 }
 0x3e2   : > { %7436 = dma.done.wait (%p9077_p6), %s1600_s1, 528  }
 0x3e3   : > { %7438 = vsyncadd (%p9077_p6), %s1600_s1, 4294966768  ;;  %s5386_s28 = sshll.u32 %s8524_s8, 6  ;;  %s1617_s15 = scalar_lea.sflag [#allocation35], %s8521_s5 }
 0x3e4   : > { %s8580_s7 = scalar_lea.vmem [#allocation34], %s5386_s28 }
 0x3e5   : > { %7440 = dma.done.wait (%p9077_p6), %s1617_s15, 1040  }
 0x3e6   : > { %7442 = vsyncadd (%p9077_p6), %s1617_s15, 4294966256  ;;  %s1634_s1 = scalar_lea.sflag [#allocation38], %s8521_s5  ;;  %s8589_s14 = scalar_lea.vmem [#allocation37], %s8527_s6 }
 0x3e7   : > { %7444 = dma.done.wait (%p9077_p6), %s1634_s1, 528  }
 0x3e8   : > { %7446 = vsyncadd (%p9077_p6), %s1634_s1, 4294966768  ;;  %s1645_s11 = scalar_lea.vmem [#allocation39], %s8524_s8  ;;  %s1651_s17 = scalar_lea.sflag [#allocation41], %s8521_s5 }
 0x3e9   : > { %s8597_s19 = scalar_lea.vmem [#allocation40], %s5386_s28 }
 0x3ea   : > { %7448 = dma.done.wait (%p9077_p6), %s1651_s17, 1040  }
 0x3eb   : > { %7450 = vsyncadd (%p9077_p6), %s1651_s17, 4294966256  ;;  %s5389_s6 = sshll.u32 %s8524_s8, 3  ;;  %s1662_s15 = scalar_lea.vmem [#allocation42], %s8524_s8 }
 0x3ec   : > { %s1668_s2 = scalar_lea.sflag [#allocation44], %s8521_s5  ;;  %s8606_s1 = scalar_lea.vmem [#allocation43], %s5389_s6 }
 0x3ed   : > { %7452 = dma.done.wait (%p9077_p6), %s1668_s2, 128  }
 0x3ee   : > { %7454 = vsyncadd (%p9077_p6), %s1668_s2, 4294967168  ;;  %p9078_p7 = pmov %p9070_p0 }
 0x3ef   : > { %p9079_p4 = pmov %p9070_p0 }
 0x3f0   : > { %7456 = dma.done.wait (%p9078_p7), [#allocation44], 512  }
 0x3f1   : > { %7458 = vsyncadd (%p9079_p4), [#allocation44], 4294966784  ;;  %p9080_p13 = pmov %p9070_p0 }
 0x3f2   : > { %p9081_p11 = pmov %p9070_p0 }
 0x3f3   : > { %7460 = dma.done.wait (%p9080_p13), [#allocation47], 1024  }
 0x3f4   : > { %7462 = vsyncadd (%p9081_p11), [#allocation47], 4294966272  ;;  %p9082_p12 = pmov %p9070_p0 }
 0x3f5   : > { %p9083_p1 = pmov %p9070_p0 }
 0x3f6   : > { %7464 = dma.done.wait (%p9082_p12), [#allocation50], 1040  }
 0x3f7   : > { %7466 = vsyncadd (%p9083_p1), [#allocation50], 4294966256  ;;  %p9084_p5 = pmov %p9070_p0 }
 0x3f8   : > { %p9085_p8 = pmov %p9070_p0 }
 0x3f9   : > { %7468 = dma.done.wait (%p9084_p5), [#allocation53], 528  }
 0x3fa   : > { %7470 = vsyncadd (%p9085_p8), [#allocation53], 4294966768 }
 0x3fb   : > { %7472 = dma.done.wait (%p9070_p0), [#allocation56], 16   ;;  %p9086_p2 = pmov %p9070_p0 }
 0x3fc   : > { %p9087_p9 = scmp.ne.s32.totalorder %s9064_s9, 0 }
 0x3fd   : > { %7474 = vsyncadd (%p9086_p2), [#allocation56], 4294967280  ;;  %vm1874_vm0 = vcmask (!%p9087_p9), 1043456   ;;  %v1952_v0 = vld [vmem:[#allocation12] sm:$0xf] (!%p9087_p9)  ;;  %v7569_v2 = vmov (!%p9087_p9), 0.0  }
 0x3fe   : > { %1860 = sbr.rel (%p9087_p9) target bundleno = 1241 (0x4d9), region = 296  ;;  %v1862_v1 = vld [vmem:[#allocation9] sm:$0xf] (!%p9087_p9)  ;;  %5642 = vmatprep.subr.mxu0 (!%p9087_p9), %v7569_v2  ;;  %5647 = vmatprep.subr.msk.mxu1 (!%p9087_p9), %vm1874_vm0, %v1952_v0  ;;  %vm1870_vm1 = vcmask (!%p9087_p9), 31744   ;;  %v1950_v3 = vld [vmem:[#allocation7] sm:$0xff] (!%p9087_p9)  ;;  %v1861_v4 = vld [vmem:[#allocation4] sm:$0xff] (!%p9087_p9) }
 0x3ff   : > { %v1951_v5 = vld [vmem:[#allocation7 + $0x8] sm:$0xff] (!%p9087_p9)  ;;  %5643 = vmatpush3.msk.msra.mxu0 (!%p9087_p9), %vm1874_vm0, %v1862_v1  ;;  %vm7570_vm2 = vmmov (!%p9087_p9), 0   ;;  %5648 = vmatpush3.msk.msra.mxu1 (!%p9087_p9), %vm1874_vm0, %v1952_v0  ;;  %v5399_v6 = vld [vmem:[#allocation10] ss:$0 sm:$0xff] (!%p9087_p9)  ;;  %v5402_v7 = vld [vmem:[#allocation13] ss:$0 sm:$0xff] (!%p9087_p9) }
 0x400   : > { %5644 = vmatprep.mubr.msk.f32.mxu0 (!%p9087_p9), %vm7570_vm2, %v7569_v2  ;;  %5649 = vmatprep.mubr.msk.f32.mxu1 (!%p9087_p9), %vm1870_vm1, %v1950_v3  ;;  %vm1948_vm3 = vcmask (!%p9087_p9), 261120  }
 0x401   : > { %5645 = vmatmul.mubr.msk.f32.vlgmr.msra.gmra.mrb[0].mxu0 (!%p9087_p9), %vm1870_vm1, %v1861_v4  ;;  %5650 = vmatmul.mubr.msk.f32.vlgmr.msra.gmra.mrb[0].mxu1 (!%p9087_p9), %vm1870_vm1, %v1951_v5 }
 0x4d4   : > { %v1944_v8 = vpop.f32.mrb[0].mxu0  ;;  %v5651_v9 = vpop.f32.mrb[0].mxu1 }
 0x4d5   : > { %v1945_v10 = vadd.f32 %v5399_v6, %v1944_v8  ;;  %v2041_v11 = vadd.f32 %v5651_v9, %v5402_v7  ;;  %v5646_v12 = vpop.f32.mrb[1].mxu0  ;;  %v2035_v13 = vpop.f32.mrb[1].mxu1 }
 0x4d6   : > { %v2036_v14 = vadd.f32 %v5402_v7, %v2035_v13 }
 0x4d7   : > { %1949 = vst.msk [vmem:[#allocation2] sm:$0xff] %vm1948_vm3, %v1945_v10  ;;  %2045 = vst.msk [vmem:[#allocation3 + $0x8] sm:$0xff] %vm1948_vm3, %v2041_v11 }
 0x4d8   : > { %2044 = vst.msk [vmem:[#allocation3] sm:$0xff] %vm1948_vm3, %v2036_v14 }
 0x4d9 PF: > { %v2061_v15 = vld [vmem:[%s8531_s3] sm:$0xff]  ;;  %v2062_v16 = vld [vmem:[%s8531_s3 + $0x8] sm:$0xff]  ;;  %v7571_v18 = vmov 0.0|0.0   ;;  %v2063_v21 = vld [vmem:[%s8531_s3 + $0x10] sm:$0xff]  ;;  %vm7572_vm4 = vmmov 0   ;;  %v7573_v26 = vmov 0.0  }
 0x4da   : > { %v2139_v17 = vld [vmem:[%s8538_s0] sm:$0xff]  ;;  %5939 = vmatprep.subr.bf16.mxu0 %v7571_v18  ;;  %5945 = vmatprep.subr.bf16.mxu1 %v7571_v18  ;;  %v5940_v19 = vpack.c.bf16 %v2062_v16, %v2061_v15  ;;  %v2140_v20 = vld [vmem:[%s8538_s0 + $0x8] sm:$0xff]  ;;  %v2064_v22 = vld [vmem:[%s8531_s3 + $0x18] sm:$0xff]  ;;  %vm2065_vm5 = vcmask 261120   ;;  %vm2372_vm6 = vcmask 64512   ;;  %vm2739_vm7 = vcmask 130048  }
 0x4db   : > { %v5946_v23 = vpack.c.bf16 %v2140_v20, %v2139_v17  ;;  %v2141_v24 = vld [vmem:[%s8538_s0 + $0x10] sm:$0xff]  ;;  %v2142_v25 = vld [vmem:[%s8538_s0 + $0x18] sm:$0xff]  ;;  %5660 = vmatprep.mubr.msk.f32.mxu0 %vm7572_vm4, %v7573_v26  ;;  %5671 = vmatprep.mubr.msk.f32.mxu1 %vm7572_vm4, %v7573_v26  ;;  %v5943_v27 = vpack.c.bf16 %v2064_v22, %v2063_v21  ;;  %v2287_v28 = vld [vmem:[%s8549_s12] sm:$0xff]  ;;  %s9088_s17 = scalar_lea.vmem [#allocation30], %s8524_s8  ;;  %s9089_s9 = scalar_lea.vmem [#allocation27], %s8524_s8  ;;  %vm3502_vm8 = vcmask 523264  }
 0x4dc   : > { %5941 = vmatpush3.bf16.msra.mxu0 %v5940_v19  ;;  %v2288_v29 = vld [vmem:[%s8549_s12 + $0x8] sm:$0xff]  ;;  %v5949_v30 = vpack.c.bf16 %v2142_v25, %v2141_v24  ;;  %v2213_v31 = vld [vmem:[%s8542_s26] sm:$0xff]  ;;  %v2289_v34 = vld [vmem:[%s8549_s12 + $0x10] sm:$0xff]  ;;  %s9090_s10 = scalar_lea.vmem [#allocation33], %s8524_s8  ;;  %s9091_s5 = scalar_lea.vmem [#allocation36], %s8524_s8 }
 0x4dd   : > { %5947 = vmatpush3.bf16.msra.mxu1 %v5946_v23  ;;  %5942 = vmatprep.subr.bf16.mxu0 %v7571_v18  ;;  %v2214_v32 = vld [vmem:[%s8542_s26 + $0x8] sm:$0xff]  ;;  %v5957_v33 = vpack.c.bf16 %v2288_v29, %v2287_v28  ;;  %v2290_v35 = vld [vmem:[%s8549_s12 + $0x18] sm:$0xff]  ;;  %v2215_v38 = vld [vmem:[%s8542_s26 + $0x10] sm:$0xff] }
 0x4de   : > { %5948 = vmatprep.subr.bf16.mxu1 %v7571_v18  ;;  %v8656_v36 = vld [vmem:[#allocation2] sm:$0xff]  ;;  %v5952_v37 = vpack.c.bf16 %v2214_v32, %v2213_v31  ;;  %v5961_v40 = vpack.c.bf16 %v2290_v35, %v2289_v34  ;;  %v8672_v43 = vld [vmem:[#allocation3 + $0x8] sm:$0xff] }
 0x4df   : > { %v2216_v39 = vld [vmem:[%s8542_s26 + $0x18] sm:$0xff]  ;;  %v5487_v44 = vld [vmem:[#allocation15] sm:$0xff]   ;;  %v2057_v58 = vld [vmem:[#allocation18] sm:$0xff] }
 0x4e0   : > { %5944 = vmatpush3.bf16.msra.mxu0 %v5943_v27  ;;  %v5955_v41 = vpack.c.bf16 %v2216_v39, %v2215_v38  ;;  %v8665_v42 = vld [vmem:[#allocation3] sm:$0xff]  ;;  %v8678_v46 = vunpack.c.l.bf16 %v5487_v44  ;;  %v8690_v50 = vunpack.c.h.bf16 %v5487_v44  ;;  %v2058_v59 = vld [vmem:[#allocation18 + $0x8] sm:$0xff]  ;;  %v2059_v61 = vld [vmem:[#allocation18 + $0x10] sm:$0xff] }
 0x4e1   : > { %5950 = vmatpush3.bf16.msra.mxu1 %v5949_v30  ;;  %5951 = vmatprep.subr.bf16.mxu0 %v7571_v18  ;;  %v5491_v45 = vld [vmem:[#allocation16] sm:$0xff]   ;;  %v5965_v60 = vpack.c.bf16 %v2058_v59, %v2057_v58  ;;  %v2969_v25 = vld [vmem:[%s8562_s4] sm:$0xff]  ;;  %v2970_v27 = vld [vmem:[%s8562_s4 + $0x8] sm:$0xff] }
 0x4e2   : > { %5958 = vmatprep.subr.bf16.mxu1 %v5957_v33  ;;  %v8680_v47 = vunpack.c.l.bf16 %v5491_v45  ;;  %v8687_v48 = vunpack.c.h.bf16 %v5491_v45  ;;  %v2060_v62 = vld [vmem:[#allocation18 + $0x18] sm:$0xff]  ;;  %v5985_v29 = vpack.c.bf16 %v2970_v27, %v2969_v25  ;;  %v2886_v34 = vld [vmem:[%s8553_s18 + $0x8] sm:$0xff]  ;;  %v5423_v58 = vld [vmem:[%s9089_s9] ss:$0 sm:$0xff] }
 0x4e3   : > { %5661 = vmatmul.mubr.msk.f32.vlgmr.msra.gmra.mrb[0].mxu0 %vm2065_vm5, %v8656_v36  ;;  %v5969_v63 = vpack.c.bf16 %v2060_v62, %v2059_v61  ;;  %v2971_v30 = vld [vmem:[%s8562_s4 + $0x10] sm:$0xff]  ;;  %v2972_v31 = vld [vmem:[%s8562_s4 + $0x18] sm:$0xff] }
 0x4e4   : > { %5672 = vmatmul.mubr.msk.f32.vlgmr.msra.gmra.mrb[0].mxu1 %vm2065_vm5, %v8656_v36  ;;  %5953 = vmatpush3.bf16.msra.mxu0 %v5952_v37  ;;  %v5989_v32 = vpack.c.bf16 %v2972_v31, %v2971_v30  ;;  %v2887_v37 = vld [vmem:[%s8553_s18 + $0x10] sm:$0xff]  ;;  %v2888_v38 = vld [vmem:[%s8553_s18 + $0x18] sm:$0xff] }
 0x4e5   : > { %5960 = vmatpush3.bf16.msra.mxu1 %v5957_v33  ;;  %5954 = vmatprep.subr.bf16.mxu0 %v7571_v18  ;;  %v2885_v33 = vld [vmem:[%s8553_s18] sm:$0xff]  ;;  %v5983_v39 = vpack.c.bf16 %v2888_v38, %v2887_v37  ;;  %v3404_v25 = vld [vmem:[%s8571_s13 + $0x10] sm:$0xff] }
 0x4e6   : > { %5962 = vmatprep.subr.bf16.mxu1 %v5961_v40  ;;  %5682 = vmatprep.mubr.msk.f32.mxu0 %vm7572_vm4, %v7573_v26  ;;  %v5980_v35 = vpack.c.bf16 %v2886_v34, %v2885_v33  ;;  %v3405_v27 = vld [vmem:[%s8571_s13 + $0x18] sm:$0xff]  ;;  %v3488_v30 = vld [vmem:[%s8580_s7 + $0x8] sm:$0xff] }
 0x4e7   : > { %5693 = vmatprep.mubr.msk.f32.mxu1 %vm2065_vm5, %v8665_v42  ;;  %2707 = vxpose.xlu0.b32.start [1/2] (short) (narrow) %v8680_v47, 8  ;;  %v3489_v31 = vld [vmem:[%s8580_s7 + $0x10] sm:$0xff]  ;;  %v3490_v33 = vld [vmem:[%s8580_s7 + $0x18] sm:$0xff]  ;;  %v3492_v37 = vld [vmem:[%s8580_s7 + $0x28] sm:$0xff] }
 0x4e8   : > { %5956 = vmatpush3.bf16.msra.mxu0 %v5955_v41  ;;  %v6009_v34 = vpack.c.bf16 %v3490_v33, %v3489_v31  ;;  %v3747_v31 = vld [vmem:[%s8589_s14 + $0x18] sm:$0xff]  ;;  %v5435_v33 = vld [vmem:[%s8606_s1 + $0x3] ss:$0 sm:$0xff] }
 0x4e9   : > { %5964 = vmatpush3.bf16.msra.mxu1 %v5961_v40 }
 0x4eb   : > { %5683 = vmatmul.mubr.msk.f32.vlgmr.msra.gmra.mrb[2].mxu0 %vm2065_vm5, %v8656_v36  ;;  %2708 = vxpose.xlu0.b32.end [2/2] (short) (narrow) %v8687_v48, 8 }
 0x4ec   : > { %5694 = vmatmul.mubr.msk.f32.vlgmr.msra.gmra.mrb[2].mxu1 %vm2065_vm5, %v8672_v43  ;;  %5698 = vmatprep.mubr.msk.f32.mxu0 %vm2372_vm6, %v8678_v46 }
 0x4ed   : > { %5703 = vmatprep.mubr.msk.f32.mxu1 %vm2372_vm6, %v8680_v47 }
 0x567   : > { %v2723_v28 = vpop.trf.xlu0 }
 0x5b6   : > { %v2135_v49 = vpop.f32.mrb[0].mxu0 }
 0x5b7   : > { %v2209_v51 = vpop.f32.mrb[0].mxu1  ;;  %v5662_v52 = vpop.f32.mrb[1].mxu0  ;;  %5701 = vmatprep.subr.mxu1 %v2135_v49 }
 0x5b8   : > { %v5673_v53 = vpop.f32.mrb[1].mxu1  ;;  %5696 = vmatprep.subr.mxu0 %v2209_v51  ;;  %5702 = vmatpush3.msra.mxu1 %v2135_v49 }
 0x5b9   : > { %5697 = vmatpush3.msra.mxu0 %v2209_v51  ;;  %5704 = vmatmul.mubr.msk.f32.vlgmr.msra.gmra.mrb[4].mxu1 %vm2372_vm6, %v8687_v48 }
 0x5ba   : > { %5699 = vmatmul.mubr.msk.f32.vlgmr.msra.gmra.mrb[4].mxu0 %vm2372_vm6, %v8690_v50  ;;  %5966 = vmatprep.subr.bf16.mxu1 %v5965_v60 }
 0x5bb   : > { %5708 = vmatprep.mubr.msk.f32.mxu0 %vm2372_vm6, %v8678_v46  ;;  %5968 = vmatpush3.bf16.msra.mxu1 %v5965_v60 }
 0x5bc   : > { %5970 = vmatprep.subr.bf16.mxu1 %v5969_v63 }
 0x5be   : > { %v2283_v54 = vpop.f32.mrb[2].mxu0 }
 0x5bf   : > { %v5695_v55 = vpop.f32.mrb[2].mxu1  ;;  %v5684_v56 = vpop.f32.mrb[3].mxu0  ;;  %5706 = vmatprep.subr.mxu0 %v2283_v54  ;;  %5972 = vmatpush3.bf16.msra.mxu1 %v5969_v63 }
 0x5c0   : > { %v2363_v57 = vpop.f32.mrb[3].mxu1  ;;  %5707 = vmatpush3.msra.mxu0 %v2283_v54  ;;  %5979 = vmatprep.subr.bf16.mxu1 %v7571_v18 }
 0x5c1   : > { %5709 = vmatmul.mubr.msk.f32.vlgmr.msra.gmra.mrb[6].mxu0 %vm2372_vm6, %v8690_v50  ;;  %5973 = vmatprep.subr.bf16.mxu0 %v7571_v18 }
 0x5c2   : > { %5726 = vmatprep.mubr.msk.f32.mxu0 %vm7572_vm4, %v7573_v26 }
 0x68c   : > { %v5705_v0 = vpop.f32.mrb[4].mxu1 }
 0x68d   : > { %v5700_v1 = vpop.f32.mrb[4].mxu0  ;;  %v2526_v2 = vpop.f32.mrb[5].mxu1 }
 0x68e   : > { %v2611_v3 = vmul.f32 %v5705_v0, %v5700_v1  ;;  %v2445_v4 = vpop.f32.mrb[5].mxu0 }
 0x68f   : > { %v2610_v5 = vmul.f32 %v2526_v2, %v2445_v4  ;;  %v7574_v2 = vmov 1.0  }
 0x690   : > { %v2613_v6 = vmul.f32 0.5, %v2611_v3  ;;  %v3134_v3 = vlaneseq }
 0x691   : > { %v2612_v7 = vmul.f32 0.5, %v2610_v5 }
 0x692   : > { %v2615_v8 = vmul.f32 %v5695_v55, %v2613_v6  ;;  %v5425_v55 = vld [vmem:[%s9088_s17] ss:$0 sm:$0xff]  ;;  %v3135_v4 = vshrl.u32 %v3134_v3, 7 }
 0x693   : > { %v2614_v9 = vmul.f32 %v2612_v7, %v2363_v57  ;;  %v5438_v3 = vld [vmem:[%s9091_s5] ss:$0 sm:$0xff] }
 0x694   : > { %v5710_v10 = vpop.f32.mrb[6].mxu0  ;;  %v8748_v5 = vsub.s32 0, %v3135_v4 }
 0x695   : > { %5719 = vmatprep.mubr.msk.f32.mxu1 %vm2065_vm5, %v2614_v9  ;;  %v2601_v11 = vpop.f32.mrb[7].mxu0 }
 0x696   : > { %5720 = vmatmul.mubr.msk.f32.vlgmr.msra.gmra.mrb[6].mxu1 %vm2065_vm5, %v2615_v8 }
 0x697   : > { %5744 = vmatprep.mubr.msk.f32.mxu1 %vm7572_vm4, %v7573_v26  ;;  %5981 = vmatpush3.bf16.msra.mxu1 %v5980_v35  ;;  %v3491_v35 = vld [vmem:[%s8580_s7 + $0x20] sm:$0xff] }
 0x698   : > { %5982 = vmatprep.subr.bf16.mxu1 %v7571_v18  ;;  %v6012_v38 = vpack.c.bf16 %v3492_v37, %v3491_v35 }
 0x69b   : > { %5984 = vmatpush3.bf16.msra.mxu1 %v5983_v39 }
 0x69c   : > { %5758 = vmatprep.subr.mxu1 %v7573_v26 }
 0x769   : > { %v5721_v12 = vpop.f32.mrb[6].mxu1 }
 0x76a   : > { %v5420_v13 = vclamps-f32 %v5721_v12, 5.0  ;;  %v2688_v14 = vpop.f32.mrb[7].mxu1 }
 0x76b   : > { %v5419_v15 = vclamps-f32 %v2688_v14, 5.0 }
 0x76c   : > { %v2703_v16 = vmul.f32 1.442695, %v5420_v13 }
 0x76d   : > { %v2701_v17 = vmul.f32 1.442695, %v5419_v15 }
 0x76e   : > { %6391 = vpow2.f32 %v2703_v16 }
 0x76f   : > { %6393 = vpow2.f32 %v2701_v17 }
 0x778   : > { %v6392_v19 = vpop.eup %6391 }
 0x779   : > { %v6394_v20 = vpop.eup %6393  ;;  %v2706_v21 = vmul.f32 %v6392_v19, %v5710_v10 }
 0x77a   : > { %v2705_v22 = vmul.f32 %v6394_v20, %v2601_v11  ;;  %v5977_v23 = vpack.c.bf16 %v6392_v19, %v6394_v20 }
 0x77c   : > { %v5974_v24 = vpack.c.bf16 %v2706_v21, %v2705_v22  ;;  %v3402_v22 = vld [vmem:[%s8571_s13] sm:$0xff] }
 0x77e   : > { %5975 = vmatpush3.bf16.msra.mxu0 %v5974_v24 }
 0x77f   : > { %5976 = vmatprep.subr.bf16.mxu0 %v7571_v18 }
 0x781   : > { %5727 = vmatmul.mubr.msk.f32.vlgmr.msra.gmra.mrb[8].mxu0 %vm2739_vm7, %v2723_v28 }
 0x782   : > { %5978 = vmatpush3.bf16.msra.mxu0 %v5977_v23  ;;  %5733 = vmatprep.mubr.msk.f32.mxu0 %vm7572_vm4, %v7573_v26  ;;  %v3403_v23 = vld [vmem:[%s8571_s13 + $0x8] sm:$0xff] }
 0x783   : > { %5986 = vmatprep.subr.bf16.mxu0 %v5985_v29  ;;  %v6000_v24 = vpack.c.bf16 %v3403_v23, %v3402_v22  ;;  %v5434_v23 = vld [vmem:[%s8606_s1 + $0x2] ss:$0 sm:$0xff] }
 0x785   : > { %5734 = vmatmul.mubr.msk.f32.vlgmr.msra.gmra.mrb[10].mxu0 %vm2739_vm7, %v2723_v28  ;;  %v6003_v28 = vpack.c.bf16 %v3405_v27, %v3404_v25  ;;  %v3744_v25 = vld [vmem:[%s8589_s14] sm:$0xff]  ;;  %v3745_v27 = vld [vmem:[%s8589_s14 + $0x8] sm:$0xff] }
 0x786   : > { %5988 = vmatpush3.bf16.msra.mxu0 %v5985_v29  ;;  %5755 = vmatprep.mubr.msk.f32.mxu0 %vm2065_vm5, %v2614_v9  ;;  %v3487_v29 = vld [vmem:[%s8580_s7] sm:$0xff] }
 0x787   : > { %5990 = vmatprep.subr.bf16.mxu0 %v5989_v32 }
 0x78a   : > { %5992 = vmatpush3.bf16.msra.mxu0 %v5989_v32  ;;  %v6006_v32 = vpack.c.bf16 %v3488_v30, %v3487_v29  ;;  %v3746_v30 = vld [vmem:[%s8589_s14 + $0x10] sm:$0xff]  ;;  %s9092_s14 = sld [smem:[#allocation108_spill]] }
 0x78b   : > { %5763 = vmatprep.subr.mxu0 %v7573_v26  ;;  %v6021_v37 = vpack.c.bf16 %v3747_v31, %v3746_v30 }
 0x78d   : > { %5756 = vmatmul.mubr.msk.f32.vlgmr.msra.gmra.mrb[12].mxu0 %vm2065_vm5, %v2615_v8 }
 0x78e   : > { %5765 = vmatprep.mubr.msk.f32.mxu0 %vm7572_vm4, %v7573_v26 }
 0x790   : > { %p5454_p10 = scmp.ne.s32.totalorder %s9092_s14, 1 }
 0x854   : > { %v2809_v40 = vpop.f32.mrb[8].mxu0 }
 0x855   : > { %v5728_v41 = vpop.f32.mrb[9].mxu0 }
 0x858   : > { %v2879_v44 = vpop.f32.mrb[10].mxu0 }
 0x859   : > { %v2880_v45 = vadd.f32 1e-06, %v2879_v44  ;;  %v5735_v49 = vpop.f32.mrb[11].mxu0 }
 0x85b   : > { %6395 = vrcp.f32 %v2880_v45 }
 0x860   : > { %v5757_v51 = vpop.f32.mrb[12].mxu0 }
 0x861   : > { %v3046_v52 = vpop.f32.mrb[13].mxu0  ;;  %v3052_v56 = vadd.f32 %v5757_v51, %v5425_v55 }
 0x862   : > { %v3047_v57 = vadd.f32 %v5425_v55, %v3046_v52  ;;  %v5431_v55 = vld [vmem:[%s8606_s1 + $0x1] ss:$0 sm:$0xff] }
 0x863   : > { %v3057_v60 = vadd.f32 %v3052_v56, %v8672_v43 }
 0x864   : > { %v3056_v61 = vadd.f32 %v3047_v57, %v8665_v42 }
 0x865   : > { %v6396_v53 = vpop.eup %6395 }
 0x866   : > { %v2884_v54 = vmul.f32 %v6396_v53, %v2809_v40  ;;  %v5994_v1 = vpack.c.bf16 %v3057_v60, %v3056_v61  ;;  %v5430_v53 = vld [vmem:[%s8606_s1] ss:$0 sm:$0xff] }
 0x868   : > { %5745 = vmatmul.mubr.msk.f32.vlgmr.msra.gmra.mrb[8].mxu1 %vm2065_vm5, %v2884_v54 }
 0x869   : > { %5760 = vmatprep.mubr.msk.f32.mxu1 %vm7572_vm4, %v7573_v26 }
 0x93b   : > { %v2965_v59 = vpop.f32.mrb[8].mxu1 }
 0x93c   : > { %v2966_v62 = vadd.f32 %v5423_v58, %v2965_v59  ;;  %v5746_v63 = vpop.f32.mrb[9].mxu1  ;;  %v3493_v58 = vld [vmem:[%s8580_s7 + $0x30] sm:$0xff]  ;;  %v3494_v59 = vld [vmem:[%s8580_s7 + $0x38] sm:$0xff] }
 0x93e   : > { %v3055_v0 = vadd.f32 %v2966_v62, %v8656_v36 }
 0x940   : > { %5759 = vmatpush3.msra.mxu1 %v3055_v0 }
 0x941   : > { %5761 = vmatmul.mubr.msk.f32.vlgmr.msra.gmra.mrb[10].mxu1 %vm2372_vm6, %v7574_v2  ;;  %5993 = vmatprep.subr.bf16.mxu1 %v7571_v18 }
 0x942   : > { %5995 = vmatpush3.bf16.msra.mxu1 %v5994_v1  ;;  %5772 = vmatprep.mubr.msk.f32.mxu1 %vm7572_vm4, %v7573_v26 }
 0x943   : > { %5999 = vmatprep.subr.bf16.mxu1 %v7571_v18 }
 0x945   : > { %5773 = vmatmul.mubr.msk.f32.vlgmr.msra.gmra.mrb[12].mxu1 %vm2739_vm7, %v7574_v2 }
 0x946   : > { %5790 = vmatprep.mubr.msk.f32.mxu1 %vm7572_vm4, %v7573_v26  ;;  %6001 = vmatpush3.bf16.msra.mxu1 %v6000_v24 }
 0x947   : > { %6002 = vmatprep.subr.bf16.mxu1 %v7571_v18 }
 0x94a   : > { %6004 = vmatpush3.bf16.msra.mxu1 %v6003_v28 }
 0x94b   : > { %5812 = vmatprep.subr.mxu1 %v7573_v26 }
 0xa14   : > { %v3129_v6 = vpop.f32.mrb[10].mxu1 }
 0xa15   : > { %v3133_v7 = vmul.f32 0.125, %v3129_v6  ;;  %v5762_v8 = vpop.f32.mrb[11].mxu1 }
 0xa17   : > { %v3137_v9 = vrot.slane %v3133_v7, %v8748_v5 }
 0xa18   : > { %v3298_v10 = vpop.f32.mrb[12].mxu1 }
 0xa19   : > { %v3138_v11 = vsub.f32 %v3055_v0, %v3137_v9  ;;  %v3302_v12 = vmul.f32 0.0625, %v3298_v10  ;;  %v5774_v13 = vpop.f32.mrb[13].mxu1  ;;  %v3838_v9 = vld [vmem:[%s8597_s19] sm:$0xff]  ;;  %v3839_v10 = vld [vmem:[%s8597_s19 + $0x8] sm:$0xff] }
 0xa1b   : > { %v3139_v14 = vmul.f32 %v3138_v11, %v3138_v11  ;;  %v3306_v15 = vrot.slane %v3302_v12, %v8748_v5 }
 0xa1d   : > { %v8752_v16 = vsub.f32 %v3056_v61, %v3306_v15  ;;  %v8754_v17 = vsub.f32 %v3057_v60, %v3306_v15  ;;  %5764 = vmatpush3.msra.mxu0 %v3139_v14  ;;  %v6015_v60 = vpack.c.bf16 %v3494_v59, %v3493_v58  ;;  %v5436_v61 = vld [vmem:[%s9090_s10] ss:$0 sm:$0xff] }
 0xa1e   : > { %5766 = vmatmul.mubr.msk.f32.vlgmr.msra.gmra.mrb[14].mxu0 %vm2372_vm6, %v7574_v2  ;;  %5996 = vmatprep.subr.bf16.mxu0 %v7571_v18  ;;  %v5444_v58 = vld [vmem:[%s1645_s11] ss:$0 sm:$0xff] }
 0xa1f   : > { %v3309_v19 = vmul.f32 %v8752_v16, %v8752_v16  ;;  %v3310_v20 = vmul.f32 %v8754_v17, %v8754_v17  ;;  %5779 = vmatprep.mubr.msk.f32.mxu0 %vm7572_vm4, %v7573_v26 }
 0xa21   : > { %v5997_v21 = vpack.c.bf16 %v3310_v20, %v3309_v19 }
 0xa23   : > { %5998 = vmatpush3.bf16.msra.mxu0 %v5997_v21 }
 0xa24   : > { %6005 = vmatprep.subr.bf16.mxu0 %v7571_v18 }
 0xa26   : > { %5780 = vmatmul.mubr.msk.f32.vlgmr.msra.gmra.mrb[16].mxu0 %vm2739_vm7, %v7574_v2 }
 0xa27   : > { %5809 = vmatprep.mubr.msk.f32.mxu0 %vm7572_vm4, %v7573_v26  ;;  %6007 = vmatpush3.bf16.msra.mxu0 %v6006_v32  ;;  %v6017_v32 = vpack.c.bf16 %v3745_v27, %v3744_v25 }
 0xa28   : > { %6008 = vmatprep.subr.bf16.mxu0 %v7571_v18 }
 0xa2b   : > { %6010 = vmatpush3.bf16.msra.mxu0 %v6009_v34 }
 0xa2c   : > { %6011 = vmatprep.subr.bf16.mxu0 %v7571_v18 }
 0xa2f   : > { %6013 = vmatpush3.bf16.msra.mxu0 %v6012_v38 }
 0xa30   : > { %6014 = vmatprep.subr.bf16.mxu0 %v7571_v18 }
 0xa33   : > { %6016 = vmatpush3.bf16.msra.mxu0 %v6015_v60 }
 0xaf1   : > { %v3206_v39 = vpop.f32.mrb[14].mxu0 }
 0xaf2   : > { %v3210_v40 = vmul.f32 0.125, %v3206_v39  ;;  %v5767_v41 = vpop.f32.mrb[15].mxu0 }
 0xaf4   : > { %v3211_v44 = vadd.f32 1e-05, %v3210_v40  ;;  %v3841_v40 = vld [vmem:[%s8597_s19 + $0x18] sm:$0xff] }
 0xaf6   : > { %6397 = vrsqrt.f32 %v3211_v44  ;;  %v3842_v44 = vld [vmem:[%s8597_s19 + $0x20] sm:$0xff] }
 0xaf9   : > { %v3377_v45 = vpop.f32.mrb[16].mxu0 }
 0xafa   : > { %v5781_v49 = vpop.f32.mrb[17].mxu0  ;;  %v3381_v12 = vmul.f32 0.0625, %v3377_v45  ;;  %v3843_v45 = vld [vmem:[%s8597_s19 + $0x28] sm:$0xff] }
 0xafb   : > { %v6033_v49 = vpack.c.bf16 %v3843_v45, %v3842_v44  ;;  %v4273_v45 = vld [vmem:[#allocation46 + $0x8] sm:$0xff] (!%p5454_p10) }
 0xafc   : > { %v3382_v13 = vadd.f32 1e-05, %v3381_v12 }
 0xafe   : > { %6399 = vrsqrt.f32 %v3382_v13 }
 0xb00   : > { %v6398_v51 = vpop.eup %6397 }
 0xb01   : > { %v3216_v52 = vrot.slane %v6398_v51, %v8748_v5  ;;  %v3844_v51 = vld [vmem:[%s8597_s19 + $0x30] sm:$0xff] }
 0xb03   : > { %v3217_v54 = vmul.f32 %v3216_v52, %v3138_v11  ;;  %v6025_v11 = vpack.c.bf16 %v3839_v10, %v3838_v9  ;;  %v3845_v52 = vld [vmem:[%s8597_s19 + $0x38] sm:$0xff] }
 0xb05   : > { %v3222_v56 = vmul.f32 %v5430_v53, %v3217_v54  ;;  %6026 = vmatprep.subr.bf16.mxu0 %v6025_v11  ;;  %v6037_v53 = vpack.c.bf16 %v3845_v52, %v3844_v51  ;;  %v4269_v52 = vld [vmem:[#allocation45 + $0x8] sm:$0xff] (!%p5454_p10) }
 0xb07   : > { %v3227_v57 = vadd.f32 %v5431_v55, %v3222_v56 }
 0xb08   : > { %v6400_v14 = vpop.eup %6399 }
 0xb09   : > { %5791 = vmatmul.mubr.msk.f32.vlgmr.msra.gmra.mrb[14].mxu1 %vm2065_vm5, %v3227_v57  ;;  %v3387_v15 = vrot.slane %v6400_v14, %v8748_v5 }
 0xb0a   : > { %5814 = vmatprep.mubr.msk.f32.mxu1 %vm7572_vm4, %v7573_v26 }
 0xb0b   : > { %v3388_v22 = vmul.f32 %v3387_v15, %v8752_v16  ;;  %v3389_v35 = vmul.f32 %v3387_v15, %v8754_v17  ;;  %v3840_v17 = vld [vmem:[%s8597_s19 + $0x10] sm:$0xff] }
 0xb0c   : > { %v6029_v41 = vpack.c.bf16 %v3841_v40, %v3840_v17 }
 0xb0d   : > { %v3394_v29 = vmul.f32 %v5434_v23, %v3388_v22  ;;  %v3395_v16 = vmul.f32 %v5434_v23, %v3389_v35  ;;  %v5452_v35 = vld [vmem:[%s8606_s1 + $0x6] ss:$0 sm:$0xff] }
 0xb0f   : > { %v3400_v38 = vadd.f32 %v5435_v33, %v3394_v29  ;;  %v3401_v39 = vadd.f32 %v5435_v33, %v3395_v16  ;;  %v5453_v16 = vld [vmem:[%s8606_s1 + $0x7] ss:$0 sm:$0xff] }
 0xbdc   : > { %v3482_v62 = vpop.f32.mrb[14].mxu1 }
 0xbdd   : > { %v3483_v63 = vadd.f32 %v5436_v61, %v3482_v62  ;;  %v5792_v0 = vpop.f32.mrb[15].mxu1 }
 0xbdf   : > { %v3486_v1 = vmax.f32 %v3483_v63, 0.0 }
 0xbe1   : > { %5810 = vmatmul.mubr.msk.f32.vlgmr.msra.gmra.mrb[18].mxu0 %vm3502_vm8, %v3486_v1 }
 0xbe2   : > { %6028 = vmatpush3.bf16.msra.mxu0 %v6025_v11  ;;  %v5447_v11 = vld [vmem:[%s1662_s15] ss:$0 sm:$0xff] }
 0xbe3   : > { %6030 = vmatprep.subr.bf16.mxu0 %v6029_v41 }
 0xbe6   : > { %6032 = vmatpush3.bf16.msra.mxu0 %v6029_v41 }
 0xbe7   : > { %6034 = vmatprep.subr.bf16.mxu0 %v6033_v49 }
 0xbea   : > { %6036 = vmatpush3.bf16.msra.mxu0 %v6033_v49  ;;  %v4275_v49 = vld [vmem:[#allocation46 + $0x18] sm:$0xff] (!%p5454_p10) }
 0xbeb   : > { %6038 = vmatprep.subr.bf16.mxu0 %v6037_v53 }
 0xbee   : > { %6040 = vmatpush3.bf16.msra.mxu0 %v6037_v53 }
 0xcb4   : > { %v3572_v4 = vpop.f32.mrb[18].mxu0 }
 0xcb5   : > { %v3573_v6 = vadd.f32 %v5438_v3, %v3572_v4  ;;  %v5811_v7 = vpop.f32.mrb[19].mxu0  ;;  %v5442_v4 = vld [vmem:[%s8606_s1 + $0x4] ss:$0 sm:$0xff] }
 0xcb6   : > { %v5443_v7 = vld [vmem:[%s8606_s1 + $0x5] ss:$0 sm:$0xff] }
 0xcb7   : > { %v3576_v8 = vadd.f32 %v3573_v6, %v3227_v57 }
 0xcb9   : > { %5813 = vmatpush3.msra.mxu1 %v3576_v8 }
 0xcba   : > { %5815 = vmatmul.mubr.msk.f32.vlgmr.msra.gmra.mrb[16].mxu1 %vm2372_vm6, %v7574_v2  ;;  %5817 = vmatprep.subr.mxu1 %v7573_v26 }
 0xcbb   : > { %5819 = vmatprep.mubr.msk.f32.mxu1 %vm7572_vm4, %v7573_v26 }
 0xd8d   : > { %v3645_v19 = vpop.f32.mrb[16].mxu1 }
 0xd8e   : > { %v3649_v20 = vmul.f32 0.125, %v3645_v19  ;;  %v5816_v21 = vpop.f32.mrb[17].mxu1 }
 0xd90   : > { %v3653_v24 = vrot.slane %v3649_v20, %v8748_v5 }
 0xd92   : > { %v3654_v28 = vsub.f32 %v3576_v8, %v3653_v24 }
 0xd94   : > { %v3655_v34 = vmul.f32 %v3654_v28, %v3654_v28 }
 0xd96   : > { %5818 = vmatpush3.msra.mxu1 %v3655_v34 }
 0xd97   : > { %5820 = vmatmul.mubr.msk.f32.vlgmr.msra.gmra.mrb[18].mxu1 %vm2372_vm6, %v7574_v2  ;;  %6018 = vmatprep.subr.bf16.mxu1 %v6017_v32 }
 0xd98   : > { %6020 = vmatpush3.bf16.msra.mxu1 %v6017_v32  ;;  %5830 = vmatprep.mubr.msk.f32.mxu1 %vm2065_vm5, %v3400_v38 }
 0xd99   : > { %6022 = vmatprep.subr.bf16.mxu1 %v6021_v37 }
 0xd9c   : > { %6024 = vmatpush3.bf16.msra.mxu1 %v6021_v37 }
 0xd9d   : > { %6041 = vmatprep.subr.bf16.mxu1 %v7571_v18 }
 0xd9f   : > { %5831 = vmatmul.mubr.msk.f32.vlgmr.msra.gmra.mrb[20].mxu1 %vm2065_vm5, %v3401_v39 }
 0xda0   : > { %5856 = vmatprep.mubr.msk.f32.mxu1 %vm7572_vm4, %v7573_v26 }
 0xe6a   : > { %v3722_v54 = vpop.f32.mrb[18].mxu1 }
 0xe6b   : > { %v3726_v55 = vmul.f32 0.125, %v3722_v54  ;;  %v5821_v56 = vpop.f32.mrb[19].mxu1  ;;  %v4536_v54 = vld [vmem:[#allocation51] sm:$0xff] (!%p5454_p10) }
 0xe6c   : > { %v4538_v56 = vld [vmem:[#allocation51 + $0x10] sm:$0xff] (!%p5454_p10) }
 0xe6d   : > { %v3727_v57 = vadd.f32 1e-05, %v3726_v55  ;;  %v4537_v55 = vld [vmem:[#allocation51 + $0x8] sm:$0xff] (!%p5454_p10) }
 0xe6f   : > { %6401 = vrsqrt.f32 %v3727_v57  ;;  %v4539_v57 = vld [vmem:[#allocation51 + $0x18] sm:$0xff] (!%p5454_p10) }
 0xe72   : > { %v5832_v59 = vpop.f32.mrb[20].mxu1 }
 0xe73   : > { %v3833_v60 = vadd.f32 %v5832_v59, %v5444_v58  ;;  %v3827_v61 = vpop.f32.mrb[21].mxu1  ;;  %v4540_v59 = vld [vmem:[#allocation51 + $0x20] sm:$0xff] (!%p5454_p10) }
 0xe74   : > { %v3828_v62 = vadd.f32 %v5444_v58, %v3827_v61  ;;  %v6075_v58 = vpack.c.bf16 (!%p5454_p10), %v4539_v57, %v4538_v56  ;;  %v4271_v61 = vld [vmem:[#allocation45 + $0x18] sm:$0xff] (!%p5454_p10) }
 0xe75   : > { %v3837_v0 = vmax.f32 %v3833_v60, 0.0  ;;  %v4541_v60 = vld [vmem:[#allocation51 + $0x28] sm:$0xff] (!%p5454_p10) }
 0xe76   : > { %v3836_v63 = vmax.f32 %v3828_v62, 0.0 }
 0xe78   : > { %5849 = vmatprep.mubr.msk.f32.mxu0 %vm3502_vm8, %v3836_v63 }
 0xe79   : > { %v6402_v1 = vpop.eup %6401  ;;  %5850 = vmatmul.mubr.msk.f32.vlgmr.msra.gmra.mrb[20].mxu0 %vm3502_vm8, %v3837_v0 }
 0xe7a   : > { %v3732_v3 = vrot.slane %v6402_v1, %v8748_v5  ;;  %5868 = vmatprep.mubr.msk.f32.mxu0 (!%p5454_p10), %vm2372_vm6, %v8678_v46  ;;  %v6079_v46 = vpack.c.bf16 (!%p5454_p10), %v4541_v60, %v4540_v59 }
 0xe7c   : > { %v3733_v6 = vmul.f32 %v3732_v3, %v3654_v28  ;;  %v4438_v3 = vld [vmem:[#allocation48] sm:$0xff] (!%p5454_p10) }
 0xe7e   : > { %v3738_v8 = vmul.f32 %v5442_v4, %v3733_v6  ;;  %v4439_v4 = vld [vmem:[#allocation48 + $0x8] sm:$0xff] (!%p5454_p10) }
 0xe80   : > { %v3743_v9 = vadd.f32 %v5443_v7, %v3738_v8  ;;  %v6063_v7 = vpack.c.bf16 (!%p5454_p10), %v4439_v4, %v4438_v3  ;;  %v4440_v8 = vld [vmem:[#allocation48 + $0x10] sm:$0xff] (!%p5454_p10) }
 0xe82   : > { %v4108_v10 = vadd.f32 %v3743_v9, %v8656_v36  ;;  %v4441_v9 = vld [vmem:[#allocation48 + $0x18] sm:$0xff] (!%p5454_p10) }
 0xe84   : > { %4111 = vst.msk [vmem:[#allocation2] sm:$0xff] %vm2065_vm5, %v4108_v10  ;;  %5866 = vmatprep.subr.mxu0 (!%p5454_p10), %v4108_v10 }
 0xe85   : > { %5867 = vmatpush3.msra.mxu0 (!%p5454_p10), %v4108_v10 }
 0xe86   : > { %5869 = vmatmul.mubr.msk.f32.vlgmr.msra.gmra.mrb[0].mxu0 (!%p5454_p10), %vm2372_vm6, %v8690_v50  ;;  %v4270_v50 = vld [vmem:[#allocation45 + $0x10] sm:$0xff] (!%p5454_p10) }
 0xe87   : > { %v6059_v0 = vpack.c.bf16 (!%p5454_p10), %v4271_v61, %v4270_v50 }
 0xf4c   : > { %v5851_v12 = vpop.f32.mrb[20].mxu0 }
 0xf4d   : > { %v3931_v13 = vadd.f32 %v5851_v12, %v5447_v11  ;;  %v3925_v14 = vpop.f32.mrb[21].mxu0  ;;  %v4543_v12 = vld [vmem:[#allocation51 + $0x38] sm:$0xff] (!%p5454_p10) }
 0xf4e   : > { %v3926_v15 = vadd.f32 %v5447_v11, %v3925_v14  ;;  %v4542_v11 = vld [vmem:[#allocation51 + $0x30] sm:$0xff] (!%p5454_p10)  ;;  %v4634_v14 = vld [vmem:[#allocation54] sm:$0xff] (!%p5454_p10) }
 0xf4f   : > { %v3935_v19 = vadd.f32 %v3931_v13, %v3401_v39  ;;  %v6083_v13 = vpack.c.bf16 (!%p5454_p10), %v4543_v12, %v4542_v11 }
 0xf50   : > { %v3934_v20 = vadd.f32 %v3926_v15, %v3400_v38  ;;  %v4635_v15 = vld [vmem:[#allocation54 + $0x8] sm:$0xff] (!%p5454_p10) }
 0xf52   : > { %v6042_v21 = vpack.c.bf16 %v3935_v19, %v3934_v20 }
 0xf54   : > { %6043 = vmatpush3.bf16.msra.mxu1 %v6042_v21 }
 0xf55   : > { %6044 = vmatprep.subr.bf16.mxu1 %v7571_v18 }
 0xf57   : > { %5857 = vmatmul.mubr.msk.f32.vlgmr.msra.gmra.mrb[22].mxu1 %vm2739_vm7, %v7574_v2 }
 0xf58   : > { %5863 = vmatprep.mubr.msk.f32.mxu1 %vm7572_vm4, %v7573_v26 }
 0xf59   : > { %v5870_v1 = vpop.f32.mrb[0].mxu0 (!%p5454_p10) }
 0xf5a   : > { %v4184_v6 = vpop.f32.mrb[1].mxu0 (!%p5454_p10) }
0x102a   : > { %v4004_v36 = vpop.f32.mrb[22].mxu1 }
0x102b   : > { %v4008_v22 = vmul.f32 0.0625, %v4004_v36  ;;  %v5858_v23 = vpop.f32.mrb[23].mxu1 }
0x102d   : > { %v4012_v24 = vrot.slane %v4008_v22, %v8748_v5 }
0x102f   : > { %v4013_v25 = vsub.f32 %v3934_v20, %v4012_v24  ;;  %v4014_v27 = vsub.f32 %v3935_v19, %v4012_v24  ;;  %v6087_v19 = vpack.c.bf16 (!%p5454_p10), %v4635_v15, %v4634_v14  ;;  %v5465_v20 = vld [vmem:[#allocation49] ss:$0 sm:$0xff] (!%p5454_p10) }
0x1031   : > { %v4015_v28 = vmul.f32 %v4013_v25, %v4013_v25  ;;  %v4016_v29 = vmul.f32 %v4014_v27, %v4014_v27 }
0x1033   : > { %v6045_v30 = vpack.c.bf16 %v4016_v29, %v4015_v28  ;;  %v4637_v28 = vld [vmem:[#allocation54 + $0x18] sm:$0xff] (!%p5454_p10) }
0x1035   : > { %6046 = vmatpush3.bf16.msra.mxu1 %v6045_v30  ;;  %v5466_v30 = vld [vmem:[#allocation52] ss:$0 sm:$0xff] (!%p5454_p10) }
0x1036   : > { %5871 = vmatprep.subr.mxu1 (!%p5454_p10), %v4108_v10 }
0x1038   : > { %5864 = vmatmul.mubr.msk.f32.vlgmr.msra.gmra.mrb[24].mxu1 %vm2739_vm7, %v7574_v2 }
0x1039   : > { %5873 = vmatprep.mubr.msk.f32.mxu1 (!%p5454_p10), %vm2372_vm6, %v8680_v47  ;;  %5872 = vmatpush3.msra.mxu1 (!%p5454_p10), %v4108_v10  ;;  %v4268_v47 = vld [vmem:[#allocation45] sm:$0xff] (!%p5454_p10)  ;;  %v6067_v10 = vpack.c.bf16 (!%p5454_p10), %v4441_v9, %v4440_v8 }
0x103a   : > { %v6055_v53 = vpack.c.bf16 (!%p5454_p10), %v4269_v52, %v4268_v47 }
0x103c   : > { %5874 = vmatmul.mubr.msk.f32.vlgmr.msra.gmra.mrb[0].mxu1 (!%p5454_p10), %vm2372_vm6, %v8687_v48  ;;  %v6071_v48 = vpack.c.bf16 (!%p5454_p10), %v4537_v55, %v4536_v54 }
0x103e   : > { %6072 = vmatprep.subr.bf16.mxu1 (!%p5454_p10), %v6071_v48 }
0x103f   : > { %6074 = vmatpush3.bf16.msra.mxu1 (!%p5454_p10), %v6071_v48 }
0x1040   : > { %6076 = vmatprep.subr.bf16.mxu1 (!%p5454_p10), %v6075_v58 }
0x1043   : > { %6078 = vmatpush3.bf16.msra.mxu1 (!%p5454_p10), %v6075_v58 }
0x1044   : > { %6080 = vmatprep.subr.bf16.mxu1 (!%p5454_p10), %v6079_v46 }
0x1047   : > { %6082 = vmatpush3.bf16.msra.mxu1 (!%p5454_p10), %v6079_v46 }
0x1048   : > { %6084 = vmatprep.subr.bf16.mxu1 (!%p5454_p10), %v6083_v13 }
0x104b   : > { %6086 = vmatpush3.bf16.msra.mxu1 (!%p5454_p10), %v6083_v13 }
0x104c   : > { %6088 = vmatprep.subr.bf16.mxu1 (!%p5454_p10), %v6087_v19 }
0x110b   : > { %v4083_v18 = vpop.f32.mrb[24].mxu1 }
0x110c   : > { %v4087_v31 = vmul.f32 0.0625, %v4083_v18  ;;  %v5865_v32 = vpop.f32.mrb[25].mxu1 }
0x110e   : > { %v4088_v26 = vadd.f32 1e-05, %v4087_v31 }
0x110f   : > { %v5875_v62 = vpop.f32.mrb[0].mxu1 (!%p5454_p10) }
0x1110   : > { %6403 = vrsqrt.f32 %v4088_v26  ;;  %v4259_v63 = vpop.f32.mrb[1].mxu1 (!%p5454_p10) }
0x1111   : > { %5884 = vmatprep.mubr.msk.f32.mxu0 (!%p5454_p10), %vm2065_vm5, %v4259_v63 }
0x111a   : > { %v6404_v33 = vpop.eup %6403 }
0x111b   : > { %v4093_v34 = vrot.slane %v6404_v33, %v8748_v5  ;;  %v4272_v5 = vld [vmem:[#allocation46] sm:$0xff] (!%p5454_p10) }
0x111d   : > { %v4094_v37 = vmul.f32 %v4093_v34, %v4013_v25  ;;  %v4095_v38 = vmul.f32 %v4093_v34, %v4014_v27  ;;  %v4636_v27 = vld [vmem:[#allocation54 + $0x10] sm:$0xff] (!%p5454_p10) }
0x111e   : > { %v6091_v29 = vpack.c.bf16 (!%p5454_p10), %v4637_v28, %v4636_v27 }
0x111f   : > { %v4100_v39 = vmul.f32 %v5452_v35, %v4094_v37  ;;  %v4101_v17 = vmul.f32 %v5452_v35, %v4095_v38  ;;  %4117 = sbr.rel (%p5454_p10) target bundleno = 5065 (0x13c9), region = 300  ;;  %v5469_v35 = vld [vmem:[#allocation55] ss:$0 sm:$0xff] (!%p5454_p10) }
0x1121   : > { %v4106_v40 = vadd.f32 %v5453_v16, %v4100_v39  ;;  %v4107_v41 = vadd.f32 %v5453_v16, %v4101_v17 }
0x1123   : > { %v8851_v44 = vadd.f32 %v4106_v40, %v8665_v42  ;;  %v8854_v2 = vadd.f32 %v4107_v41, %v8672_v43  ;;  %v4274_v42 = vld [vmem:[#allocation46 + $0x10] sm:$0xff] (!%p5454_p10)  ;;  %v6047_v43 = vpack.c.bf16 (!%p5454_p10), %v4273_v45, %v4272_v5 }
0x1124   : > { %v6051_v51 = vpack.c.bf16 (!%p5454_p10), %v4275_v49, %v4274_v42 }
0x1125   : > { %4112 = vst.msk [vmem:[#allocation3] sm:$0xff] %vm2065_vm5, %v8851_v44  ;;  %4113 = vst.msk [vmem:[#allocation3 + $0x8] sm:$0xff] %vm2065_vm5, %v8854_v2  ;;  %6048 = vmatprep.subr.bf16.mxu0 (!%p5454_p10), %v6047_v43 }
0x1126   : > { %6050 = vmatpush3.bf16.msra.mxu0 %v6047_v43 }
0x1127   : > { %6052 = vmatprep.subr.bf16.mxu0 %v6051_v51 }
0x112a   : > { %6054 = vmatpush3.bf16.msra.mxu0 %v6051_v51 }
0x112b   : > { %6056 = vmatprep.subr.bf16.mxu0 %v6055_v53 }
0x112d   : > { %5885 = vmatmul.mubr.msk.f32.vlgmr.msra.gmra.mrb[2].mxu0 %vm2065_vm5, %v5875_v62 }
0x112e   : > { %6058 = vmatpush3.bf16.msra.mxu0 %v6055_v53  ;;  %5895 = vmatprep.mubr.msk.f32.mxu0 %vm2065_vm5, %v4184_v6 }
0x112f   : > { %6060 = vmatprep.subr.bf16.mxu0 %v6059_v0 }
0x1132   : > { %6062 = vmatpush3.bf16.msra.mxu0 %v6059_v0 }
0x1133   : > { %6064 = vmatprep.subr.bf16.mxu0 %v6063_v7 }
0x1135   : > { %5896 = vmatmul.mubr.msk.f32.vlgmr.msra.gmra.mrb[2].mxu0 %vm2065_vm5, %v5870_v1 }
0x1136   : > { %6066 = vmatpush3.bf16.msra.mxu0 %v6063_v7  ;;  %5906 = vmatprep.mubr.msk.f32.mxu0 %vm2065_vm5, %v8851_v44 }
0x1137   : > { %6068 = vmatprep.subr.bf16.mxu0 %v6067_v10 }
0x113a   : > { %6070 = vmatpush3.bf16.msra.mxu0 %v6067_v10 }
0x113d   : > { %5907 = vmatmul.mubr.msk.f32.vlgmr.msra.gmra.mrb[2].mxu0 %vm2065_vm5, %v8854_v2 }
0x1210   : > { %v5908_v21 = vpop.f32.mrb[2].mxu0 }
0x1211   : > { %v4533_v36 = vadd.f32 %v5908_v21, %v5465_v20  ;;  %v4514_v22 = vpop.f32.mrb[3].mxu0 }
0x1212   : > { %v4532_v23 = vadd.f32 %v5465_v20, %v4514_v22 }
0x1213   : > { %v4535_v25 = vmax.f32 %v4533_v36, 0.0 }
0x1214   : > { %v4534_v24 = vmax.f32 %v4532_v23, 0.0 }
0x1216   : > { %5925 = vmatprep.mubr.msk.f32.mxu1 %vm3502_vm8, %v4534_v24 }
0x1217   : > { %5926 = vmatmul.mubr.msk.f32.vlgmr.msra.gmra.mrb[2].mxu1 %vm3502_vm8, %v4535_v25 }
0x1218   : > { %6090 = vmatpush3.bf16.msra.mxu1 %v6087_v19 }
0x1219   : > { %6092 = vmatprep.subr.bf16.mxu1 %v6091_v29 }
0x121c   : > { %6094 = vmatpush3.bf16.msra.mxu1 %v6091_v29 }
0x12ea   : > { %v5927_v18 = vpop.f32.mrb[2].mxu1 }
0x12eb   : > { %v4629_v31 = vadd.f32 %v5927_v18, %v5466_v30  ;;  %v4623_v32 = vpop.f32.mrb[3].mxu1 }
0x12ec   : > { %v4624_v26 = vadd.f32 %v5466_v30, %v4623_v32 }
0x12ed   : > { %v4633_v34 = vmax.f32 %v4629_v31, 0.0 }
0x12ee   : > { %v4632_v33 = vmax.f32 %v4624_v26, 0.0 }
0x12f0   : > { %5936 = vmatprep.mubr.msk.f32.mxu1 %vm2065_vm5, %v4632_v33 }
0x12f1   : > { %5937 = vmatmul.mubr.msk.f32.vlgmr.msra.gmra.mrb[4].mxu1 %vm2065_vm5, %v4633_v34 }
0x13c4   : > { %v5938_v37 = vpop.f32.mrb[4].mxu1 }
0x13c5   : > { %v4723_v38 = vadd.f32 %v5938_v37, %v5469_v35  ;;  %v4717_v16 = vpop.f32.mrb[5].mxu1 }
0x13c6   : > { %v4718_v39 = vadd.f32 %v5469_v35, %v4717_v16 }
0x13c7   : > { %4727 = vst [vmem:[#allocation57 + $0x8] sm:$0xff] %v4723_v38 }
0x13c8   : > { %4726 = vst [vmem:[#allocation57] sm:$0xff] %v4718_v39 }
0x13c9 PF: > { %s9093_s19 = sld [smem:[#allocation108_spill]]  ;;  %s7575_s7 = smov [#allocation57]  }
0x13ca   : > { %s4734_s8 = sshll.u32 %s7575_s7, 4  ;;  %s4735_s8 = int_to_ptr.vmem [resolvable:$true] %s4734_s8 }
0x13cb   : > { %s7357_s3 = scalar_lea.vmem %s4735_s8, 256  ;;  %p7364_p13 = scmp.lt.s32.totalorder %s4735_s8, %s4735_s8 }
0x13cc   : > { %p7358_p6 = scmp.ne.s32.totalorder %s4735_s8, %s7357_s3  ;;  %p7365_p11 = scmp.lt.s32.totalorder %s7357_s3, %s7357_s3 }
0x13ce   : > { %p7366_p12 = por %p7365_p11, %p7364_p13 }
0x13cf   : > { %p6291_p3 = scmp.eq.s32.totalorder %s9093_s19, 1 }
0x13d1   : > { %p7359_p7 = pnand %p7358_p6, %p6291_p3 }
0x13d3   : > { %p7360_p4 = pneg %p7359_p7 }
0x13d5   : > { %p7367_p1 = pnand %p7366_p12, %p7360_p4 }
0x13d7   : > { %7370 = shalt.err (!%p7367_p1)
}
0x13d8   : > { %s9094_s0 = sld [smem:[#allocation106_spill]] }
0x13de   : > { %s9095_s26 = smov %s9094_s0  ;;  %s7371_s12 = scalar_lea.hbm %s9094_s0, 256 }
0x13df   : > { %p7372_p5 = scmp.ne.s32.totalorder %s9095_s26, %s7371_s12  ;;  %p7377_p2 = scmp.lt.u32.totalorder %s7371_s12, %s9095_s26 }
0x13e1   : > { %p7373_p8 = pnand %p7372_p5, %p6291_p3 }
0x13e3   : > { %p7374_p0 = pneg %p7373_p8 }
0x13e5   : > { %p7379_p9 = pnand %p7377_p2, %p7374_p0 }
0x13e7   : > { %7382 = shalt.err (!%p7379_p9)
}
0x13e8   : > { %s7576_s18 = smov 128   ;;  %s7577_s11 = smov 8  }
0x13e9   : > { %6202 = dma.vmem_to_hbm [thread:$0]  (%p6291_p3), %s4735_s8, 256, %s9095_s26, [#allocation6], %s7576_s18, %s7576_s18, %s7577_s11  }
0x13ea   : > { %7476 = dma.done.wait (%p6291_p3), [#allocation6], 256  }
0x13eb   : > { %7478 = vsyncadd (%p6291_p3), [#allocation6], 4294967040 }
0x13ec PF: > { %s9096_s18 = sld [smem:[#allocation109_spill]]  ;;  %s9097_s0 = sld [smem:[#allocation107_spill]] }
0x13ed   : > { %s9098_s4 = sld [smem:[#allocation110_spill]]  ;;  %s9099_s15 = smov %s7489_s16 }
0x13f2   : > { %p113_p10 = scmp.ge.s32.totalorder %s9096_s18, 4  }
0x13f3   : > { %s9100_s16 = smov %s9098_s4 }
0x13f4   :  { %115 = sbr.rel (!%p113_p10) target bundleno = 97 (0x61), region = 496 }
0x13fb   :  { %4750 = vsyncpa [#allocation5], 1 }
0x13fc   :  { %4752 = vsyncpa [#allocation5 + $0x1], 1 }
0x13fd   :  { %4753 = vsyncpa [#allocation8], 1 }
0x13fe   :  { %4754 = vsyncpa [#allocation11], 1 }
0x13ff   :  { %4755 = vsyncpa [#allocation14], 1 }
0x1400   :  { %4756 = vsyncpa [#allocation17], 1 }
0x1401   :  { %4757 = vsyncpa [#allocation20], 1 }
0x1402   :  { %4759 = vsyncpa [#allocation20 + $0x1], 1 }
0x1403   :  { %4760 = vsyncpa [#allocation23], 1 }
0x1404   :  { %4762 = vsyncpa [#allocation23 + $0x1], 1 }
0x1405   :  { %4763 = vsyncpa [#allocation26], 1 }
0x1406   :  { %4765 = vsyncpa [#allocation26 + $0x1], 1 }
0x1407   :  { %4766 = vsyncpa [#allocation29], 1 }
0x1408   :  { %4768 = vsyncpa [#allocation29 + $0x1], 1 }
0x1409   :  { %4769 = vsyncpa [#allocation32], 1 }
0x140a   :  { %4771 = vsyncpa [#allocation32 + $0x1], 1 }
0x140b   :  { %4772 = vsyncpa [#allocation35], 1 }
0x140c   :  { %4774 = vsyncpa [#allocation35 + $0x1], 1 }
0x140d   :  { %4775 = vsyncpa [#allocation38], 1 }
0x140e   :  { %4777 = vsyncpa [#allocation38 + $0x1], 1 }
0x140f   :  { %4778 = vsyncpa [#allocation41], 1 }
0x1410   :  { %4780 = vsyncpa [#allocation41 + $0x1], 1 }
0x1411   :  { %4781 = vsyncpa [#allocation44], 1 }
0x1412   :  { %4783 = vsyncpa [#allocation44 + $0x1], 1 }
0x1413   :  { %4784 = vsyncpa [#allocation47], 1 }
0x1414   :  { %4785 = vsyncpa [#allocation50], 1 }
0x1415   :  { %4786 = vsyncpa [#allocation53], 1 }
0x1416   :  { %4787 = vsyncpa [#allocation56], 1 }
0x1417   :  { %4788 = vsyncpa [#allocation6], 1 }
0x1418   :  { %4790 = vsyncpa [#allocation6 + $0x1], 1 }

</bundles_post_ra>
